<compile_context>
chip_gen: v6e
topology: v6e:2x2x1
jax: 0.10.0
libtpu: 0.0.40
codegen_flags: <defaults>
</compile_context>

<pallas_src>
import functools

import numpy as np
import jax
import jax.numpy as jnp
from jax import lax
from jax.experimental import pallas as pl
from jax.experimental.pallas import tpu as pltpu

# ------------------------------ geometry (LeNet, input_dim = 16*5*5) ---------
HIN = WIN = 32
CIN, C1OUT, C2OUT = 3, 6, 16
KH = KW = 5
HC1, WC1 = HIN - KH + 1, WIN - KW + 1     # 28, 28
HP1, WP1 = HC1 // 2, WC1 // 2             # 14, 14
HC2, WC2 = HP1 - KH + 1, WP1 - KW + 1     # 10, 10
HP2, WP2 = HC2 // 2, WC2 // 2             # 5, 5
FC1_OUT, FC2_OUT = 120, 84

LIN = WIN * CIN                            # 96 used input lanes (w*3 + c)
LINP = 128                                 # padded input / pool1 lane width
KB = KH * LINP                             # 640: im2col GEMM K (both convs)
LP1 = WP1 * C1OUT                          # 84: width-pooled conv1 lanes (w*6 + c)
LP2 = WP2 * C2OUT                          # 80: width-pooled conv2 lanes (w*16 + c)
FLAT = HP2 * LP2                           # 400: fc1 flatten (h*80 + w*16 + c)
FC1P = 128                                 # fc1 lanes padded 120 -> 128
FC2P = 128                                 # fc2 lanes padded  84 -> 128

TB_MAX = 128                               # max samples per grid step


# ------------------------------ fused kernel ---------------------------------
def _fused_forward_kernel(x_ref,                     # (HIN*TB, 128) rows (h, t)
                          w1e_ref, w1o_ref, b1_ref,  # (640, 84) x2, (1, 84)
                          w2e_ref, w2o_ref, b2_ref,  # (640, 80) x2, (1, 80)
                          w3_ref, b3_ref,            # (400, 128), (1, 128)
                          w4_ref, b4_ref,            # (128, 128), (1, 128)
                          o_ref,                     # (TB, 128)
                          p1_ref,                    # (28*TB, 640) im2col slab 1
                          wp1_ref,                   # (28*TB, 84)  width-pooled conv1
                          pool1_ref,                 # (14*TB, 128) pool1 (pad lanes 0)
                          p2_ref,                    # (10*TB, 640) im2col slab 2
                          wp2_ref,                   # (10*TB, 80)  width-pooled conv2
                          flat_ref):                 # (TB, 400)    fc1 flatten
    f32 = jnp.float32
    tb = o_ref.shape[0]

    # ---- conv1 im2col slab: 5 lane-aligned (128-wide) row-block copies -------
    for i in range(KH):
        p1_ref[:, i * LINP:(i + 1) * LINP] = x_ref[i * tb:(i + HC1) * tb, :]

    # ---- conv1 + bias + ReLU + width-pool (even/odd columns folded in weights)
    p1 = p1_ref[...]
    c1e = jnp.dot(p1, w1e_ref[...], preferred_element_type=f32) + b1_ref[...]
    c1o = jnp.dot(p1, w1o_ref[...], preferred_element_type=f32) + b1_ref[...]
    wp1_ref[...] = jnp.maximum(jnp.maximum(c1e, c1o), 0.0)

    # ---- pool1 rows: max of adjacent TB row blocks; keep pad lanes zeroed ----
    pool1_ref[:, LP1:] = jnp.zeros((HP1 * tb, LINP - LP1), f32)
    for ho in range(HP1):
        pool1_ref[ho * tb:(ho + 1) * tb, :LP1] = jnp.maximum(
            wp1_ref[(2 * ho) * tb:(2 * ho + 1) * tb, :],
            wp1_ref[(2 * ho + 1) * tb:(2 * ho + 2) * tb, :])

    # ---- conv2 im2col slab (bands 128-lane aligned thanks to pool1 padding) --
    for i in range(KH):
        p2_ref[:, i * LINP:(i + 1) * LINP] = pool1_ref[i * tb:(i + HC2) * tb, :]

    # ---- conv2 + bias + ReLU + width-pool -------------------------------------
    p2 = p2_ref[...]
    c2e = jnp.dot(p2, w2e_ref[...], preferred_element_type=f32) + b2_ref[...]
    c2o = jnp.dot(p2, w2o_ref[...], preferred_element_type=f32) + b2_ref[...]
    wp2_ref[...] = jnp.maximum(jnp.maximum(c2e, c2o), 0.0)

    # ---- pool2 rows written straight into the fc1 flatten slab ---------------
    for ho in range(HP2):
        flat_ref[:, ho * LP2:(ho + 1) * LP2] = jnp.maximum(
            wp2_ref[(2 * ho) * tb:(2 * ho + 1) * tb, :],
            wp2_ref[(2 * ho + 1) * tb:(2 * ho + 2) * tb, :])

    # ---- fc1 (single K=400 GEMM) + ReLU, fc2 + ReLU, lane-dense store --------
    x3 = jnp.maximum(
        jnp.dot(flat_ref[...], w3_ref[...], preferred_element_type=f32)
        + b3_ref[...], 0.0)
    o_ref[...] = jnp.maximum(
        jnp.dot(x3, w4_ref[...], preferred_element_type=f32) + b4_ref[...],
        0.0).astype(o_ref.dtype)


# ------------------------------ one-time weight re-layout --------------------
def _band_conv_matrix(w, lane_pad, wo_list):
    """Banded GEMM matrix for the width-on-lanes layout.

    Rows:   i*lane_pad + wi*C + c   (tap row i, input col wi, in-channel c;
                                     rows >= W_in*C within each band stay zero)
    Cols:   p*O + o                 (p-th requested output col wo_list[p], out-chan o)
    Value:  w[o, c, i, wi - wo]  when 0 <= wi - wo < KW.
    """
    w = np.asarray(w, np.float32)
    O, C, kh, kw = w.shape
    mat = np.zeros((kh * lane_pad, len(wo_list) * O), np.float32)
    for i in range(kh):
        for p, wo in enumerate(wo_list):
            for dw in range(kw):
                wi = wo + dw
                for c in range(C):
                    mat[i * lane_pad + wi * C + c, p * O:(p + 1) * O] = w[:, c, i, dw]
    return jnp.asarray(mat)


def prepare_params(params):
    """One-time re-layout of PyTorch-style parameters for the fused kernel."""
    # conv1: split output columns into even / odd width positions (width pool
    # then becomes an elementwise max of the two GEMM results).
    w1e = _band_conv_matrix(params["conv1_w"], LINP, list(range(0, WC1, 2)))
    w1o = _band_conv_matrix(params["conv1_w"], LINP, list(range(1, WC1, 2)))
    b1 = jnp.tile(params["conv1_b"], WP1)[None, :]                    # (1, 84)
    # conv2 (input = 128-lane-padded pool1, lanes w*6 + c).
    w2e = _band_conv_matrix(params["conv2_w"], LINP, list(range(0, WC2, 2)))
    w2o = _band_conv_matrix(params["conv2_w"], LINP, list(range(1, WC2, 2)))
    b2 = jnp.tile(params["conv2_b"], WP2)[None, :]                    # (1, 80)
    # fc1: PyTorch flatten index c*25 + h*5 + w  ->  our lane index h*80 + w*16 + c.
    w3 = params["fc1_w"].reshape(FC1_OUT, C2OUT, HP2, WP2)
    w3 = jnp.transpose(w3, (2, 3, 1, 0)).reshape(FLAT, FC1_OUT)
    w3 = jnp.pad(w3, ((0, 0), (0, FC1P - FC1_OUT)))                   # (400, 128)
    b3 = jnp.pad(params["fc1_b"], (0, FC1P - FC1_OUT))[None, :]       # (1, 128)
    # fc2: transpose + pad both dims to 128 (lane-dense output store).
    w4 = jnp.pad(params["fc2_w"].T,
                 ((0, FC1P - FC1_OUT), (0, FC2P - FC2_OUT)))          # (128, 128)
    b4 = jnp.pad(params["fc2_b"], (0, FC2P - FC2_OUT))[None, :]       # (1, 128)
    return dict(w1e=w1e, w1o=w1o, b1=b1, w2e=w2e, w2o=w2o, b2=b2,
                w3=w3, b3=b3, w4=w4, b4=b4)


# ------------------------------ forward wrapper ------------------------------
def _round_up(x, m):
    return ((x + m - 1) // m) * m


def _choose_tb(batch):
    """Adaptive batch tile: big for throughput, small for tiny batches,
    and >= 2 grid steps once there is enough work (v7x has 2 TensorCores)."""
    tb = min(TB_MAX, _round_up(batch, 8))
    if batch >= 16 and -(-batch // tb) < 2:
        tb = _round_up(-(-batch // 2), 8)
    return max(tb, 8)


def _full_spec(arr):
    n = arr.ndim
    return pl.BlockSpec(arr.shape, lambda b, _n=n: (0,) * _n)


@jax.jit
def simple_cnn_header_forward(x_nchw, prep):
    B, C, H, W = x_nchw.shape
    assert (C, H, W) == (CIN, HIN, WIN), "SimpleCNN_header expects 3x32x32 input"
    tb = _choose_tb(B)
    b_pad = _round_up(B, tb)
    g = b_pad // tb

    # NCHW -> (H, B, W*C); pad batch + lanes (96->128); regroup into per-tile
    # slabs (tile, h*TB + t, lane) so the kernel needs no in-VMEM reordering.
    xt = jnp.transpose(x_nchw, (2, 0, 3, 1)).reshape(HIN, B, LIN)
    xt = jnp.pad(xt, ((0, 0), (0, b_pad - B), (0, LINP - LIN)))
    xt = xt.reshape(HIN, g, tb, LINP).transpose(1, 0, 2, 3).reshape(g, HIN * tb, LINP)

    weight_keys = ("w1e", "w1o", "b1", "w2e", "w2o", "b2", "w3", "b3", "w4", "b4")
    in_specs = ([pl.BlockSpec((None, HIN * tb, LINP), lambda b: (b, 0, 0))]
                + [_full_spec(prep[k]) for k in weight_keys])

    scratch = [
        pltpu.VMEM((HC1 * tb, KB), jnp.float32),    # p1 im2col slab
        pltpu.VMEM((HC1 * tb, LP1), jnp.float32),   # width-pooled conv1
        pltpu.VMEM((HP1 * tb, LINP), jnp.float32),  # pool1 (lane-padded)
        pltpu.VMEM((HC2 * tb, KB), jnp.float32),    # p2 im2col slab
        pltpu.VMEM((HC2 * tb, LP2), jnp.float32),   # width-pooled conv2
        pltpu.VMEM((tb, FLAT), jnp.float32),        # fc1 flatten
    ]

    flops_per_sample = (2 * HC1 * KB * (2 * LP1)       # conv1 (even+odd GEMMs)
                        + 2 * HC2 * KB * (2 * LP2)     # conv2
                        + 2 * FLAT * FC1P              # fc1
                        + 2 * FC1P * FC2P)             # fc2
    weight_bytes = sum(int(prep[k].size) for k in weight_keys) * 4
    bytes_accessed = 4 * (b_pad * HIN * LINP + b_pad * FC2P) + weight_bytes

    out = pl.pallas_call(
        _fused_forward_kernel,
        out_shape=jax.ShapeDtypeStruct((b_pad, FC2P), jnp.float32),
        grid_spec=pltpu.PrefetchScalarGridSpec(
            num_scalar_prefetch=0,
            grid=(g,),
            in_specs=in_specs,
            out_specs=pl.BlockSpec((tb, FC2P), lambda b: (b, 0)),
            scratch_shapes=scratch,
        ),
        compiler_params=pltpu.CompilerParams(
            dimension_semantics=("parallel",),
            vmem_limit_bytes=48 * 1024 * 1024),
        cost_estimate=pl.CostEstimate(
            flops=int(flops_per_sample) * int(b_pad),
            transcendentals=0,
            bytes_accessed=int(bytes_accessed)),
    )(xt, *(prep[k] for k in weight_keys))
    return out[:B, :FC2_OUT]


# ------------------------------ init + reference -----------------------------
def init_params(key):
    ks = jax.random.split(key, 8)

    def u(k, shape, fan_in):
        bound = 1.0 / jnp.sqrt(jnp.float32(fan_in))
        return jax.random.uniform(k, shape, jnp.float32, -bound, bound)

    return dict(
        conv1_w=u(ks[0], (C1OUT, CIN, KH, KW), CIN * KH * KW),
        conv1_b=u(ks[1], (C1OUT,), CIN * KH * KW),
        conv2_w=u(ks[2], (C2OUT, C1OUT, KH, KW), C1OUT * KH * KW),
        conv2_b=u(ks[3], (C2OUT,), C1OUT * KH * KW),
        fc1_w=u(ks[4], (FC1_OUT, C2OUT * HP2 * WP2), C2OUT * HP2 * WP2),
        fc1_b=u(ks[5], (FC1_OUT,), C2OUT * HP2 * WP2),
        fc2_w=u(ks[6], (FC2_OUT, FC1_OUT), FC1_OUT),
        fc2_b=u(ks[7], (FC2_OUT,), FC1_OUT),
    )


def reference_forward(x, p):
    def conv(x, w, b):
        y = lax.conv_general_dilated(
            x, w, (1, 1), "VALID", dimension_numbers=("NCHW", "OIHW", "NCHW"))
        return jax.nn.relu(y + b[None, :, None, None])

    def pool(x):
        return lax.reduce_window(x, -jnp.inf, lax.max,
                                 (1, 1, 2, 2), (1, 1, 2, 2), "VALID")

    x = pool(conv(x, p["conv1_w"], p["conv1_b"]))
    x = pool(conv(x, p["conv2_w"], p["conv2_b"]))
    x = x.reshape(x.shape[0], -1)
    x = jax.nn.relu(x @ p["fc1_w"].T + p["fc1_b"])
    x = jax.nn.relu(x @ p["fc2_w"].T + p["fc2_b"])
    return x


if __name__ == "__main__":
    key = jax.random.PRNGKey(0)
    kx, kp = jax.random.split(key)
    # LeNet geometry: 3x32x32 input so the flatten is exactly 16*5*5 = 400.
    x = jax.random.normal(kx, (2, CIN, HIN, WIN), jnp.float32)
    params = init_params(kp)
    prep = prepare_params(params)   # one-time weight re-layout (out of hot path)

    out = jax.block_until_ready(simple_cnn_header_forward(x, prep))
    assert out.shape == (2, FC2_OUT), out.shape

    ref = jax.block_until_ready(reference_forward(x, params))
    err = float(jnp.max(jnp.abs(out - ref)))
    assert jnp.allclose(out, ref, rtol=1e-3, atol=1e-3), err

    print("KERNEL_OK")
</pallas_src>

<mosaic_0001>
module attributes {stable_mosaic.version = 11 : i64} {
  func.func @_fused_forward_kernel(%arg0: i32, %arg1: memref<1x256x128xf32, #tpu.memory_space<vmem>>, %arg2: memref<640x84xf32, #tpu.memory_space<vmem>>, %arg3: memref<640x84xf32, #tpu.memory_space<vmem>>, %arg4: memref<1x84xf32, #tpu.memory_space<vmem>>, %arg5: memref<640x80xf32, #tpu.memory_space<vmem>>, %arg6: memref<640x80xf32, #tpu.memory_space<vmem>>, %arg7: memref<1x80xf32, #tpu.memory_space<vmem>>, %arg8: memref<400x128xf32, #tpu.memory_space<vmem>>, %arg9: memref<1x128xf32, #tpu.memory_space<vmem>>, %arg10: memref<128x128xf32, #tpu.memory_space<vmem>>, %arg11: memref<1x128xf32, #tpu.memory_space<vmem>>, %arg12: memref<8x128xf32, #tpu.memory_space<vmem>>, %arg13: memref<224x640xf32, #tpu.memory_space<vmem>>, %arg14: memref<224x84xf32, #tpu.memory_space<vmem>>, %arg15: memref<112x128xf32, #tpu.memory_space<vmem>>, %arg16: memref<80x640xf32, #tpu.memory_space<vmem>>, %arg17: memref<80x80xf32, #tpu.memory_space<vmem>>, %arg18: memref<8x400xf32, #tpu.memory_space<vmem>>) attributes {dimension_semantics = [#tpu.dimension_semantics<parallel>], iteration_bounds = array<i64: 1>, scalar_prefetch = 0 : i64, scratch_operands = 6 : i64, tpu.core_type = #tpu.core_type<tc>, window_params = [{transform_indices = @transform_0, window_bounds = array<i64: 1, 256, 128>}, {pipeline_mode = #tpu.pipeline_mode<synchronous>, transform_indices = @transform_1, window_bounds = array<i64: 640, 84>}, {pipeline_mode = #tpu.pipeline_mode<synchronous>, transform_indices = @transform_2, window_bounds = array<i64: 640, 84>}, {pipeline_mode = #tpu.pipeline_mode<synchronous>, transform_indices = @transform_3, window_bounds = array<i64: 1, 84>}, {pipeline_mode = #tpu.pipeline_mode<synchronous>, transform_indices = @transform_4, window_bounds = array<i64: 640, 80>}, {pipeline_mode = #tpu.pipeline_mode<synchronous>, transform_indices = @transform_5, window_bounds = array<i64: 640, 80>}, {pipeline_mode = #tpu.pipeline_mode<synchronous>, transform_indices = @transform_6, window_bounds = array<i64: 1, 80>}, {pipeline_mode = #tpu.pipeline_mode<synchronous>, transform_indices = @transform_7, window_bounds = array<i64: 400, 128>}, {pipeline_mode = #tpu.pipeline_mode<synchronous>, transform_indices = @transform_8, window_bounds = array<i64: 1, 128>}, {pipeline_mode = #tpu.pipeline_mode<synchronous>, transform_indices = @transform_9, window_bounds = array<i64: 128, 128>}, {pipeline_mode = #tpu.pipeline_mode<synchronous>, transform_indices = @transform_10, window_bounds = array<i64: 1, 128>}, {transform_indices = @transform_11, window_bounds = array<i64: 8, 128>}]} {
    %c0 = arith.constant 0 : index
    %c0_0 = arith.constant 0 : index
    %c0_1 = arith.constant 0 : index
    %0 = vector.load %arg1[%c0, %c0_0, %c0_1] : memref<1x256x128xf32, #tpu.memory_space<vmem>>, vector<1x224x128xf32>
    %1 = vector.shape_cast %0 : vector<1x224x128xf32> to vector<224x128xf32>
    %c0_2 = arith.constant 0 : index
    %c0_3 = arith.constant 0 : index
    %2 = vector.load %arg13[%c0_2, %c0_3] : memref<224x640xf32, #tpu.memory_space<vmem>>, vector<224x128xf32>
    tpu.vector_store %arg13[%c0_2, %c0_3], %1 {strides = array<i32>} : memref<224x640xf32, #tpu.memory_space<vmem>>, vector<224x128xf32>,
    %c0_4 = arith.constant 0 : index
    %c8 = arith.constant 8 : index
    %c0_5 = arith.constant 0 : index
    %3 = vector.load %arg1[%c0_4, %c8, %c0_5] : memref<1x256x128xf32, #tpu.memory_space<vmem>>, vector<1x224x128xf32>
    %4 = vector.shape_cast %3 : vector<1x224x128xf32> to vector<224x128xf32>
    %c0_6 = arith.constant 0 : index
    %c128 = arith.constant 128 : index
    %5 = vector.load %arg13[%c0_6, %c128] : memref<224x640xf32, #tpu.memory_space<vmem>>, vector<224x128xf32>
    tpu.vector_store %arg13[%c0_6, %c128], %4 {strides = array<i32>} : memref<224x640xf32, #tpu.memory_space<vmem>>, vector<224x128xf32>,
    %c0_7 = arith.constant 0 : index
    %c16 = arith.constant 16 : index
    %c0_8 = arith.constant 0 : index
    %6 = vector.load %arg1[%c0_7, %c16, %c0_8] : memref<1x256x128xf32, #tpu.memory_space<vmem>>, vector<1x224x128xf32>
    %7 = vector.shape_cast %6 : vector<1x224x128xf32> to vector<224x128xf32>
    %c0_9 = arith.constant 0 : index
    %c256 = arith.constant 256 : index
    %8 = vector.load %arg13[%c0_9, %c256] : memref<224x640xf32, #tpu.memory_space<vmem>>, vector<224x128xf32>
    tpu.vector_store %arg13[%c0_9, %c256], %7 {strides = array<i32>} : memref<224x640xf32, #tpu.memory_space<vmem>>, vector<224x128xf32>,
    %c0_10 = arith.constant 0 : index
    %c24 = arith.constant 24 : index
    %c0_11 = arith.constant 0 : index
    %9 = vector.load %arg1[%c0_10, %c24, %c0_11] : memref<1x256x128xf32, #tpu.memory_space<vmem>>, vector<1x224x128xf32>
    %10 = vector.shape_cast %9 : vector<1x224x128xf32> to vector<224x128xf32>
    %c0_12 = arith.constant 0 : index
    %c384 = arith.constant 384 : index
    %11 = vector.load %arg13[%c0_12, %c384] : memref<224x640xf32, #tpu.memory_space<vmem>>, vector<224x128xf32>
    tpu.vector_store %arg13[%c0_12, %c384], %10 {strides = array<i32>} : memref<224x640xf32, #tpu.memory_space<vmem>>, vector<224x128xf32>,
    %c0_13 = arith.constant 0 : index
    %c32 = arith.constant 32 : index
    %c0_14 = arith.constant 0 : index
    %12 = vector.load %arg1[%c0_13, %c32, %c0_14] : memref<1x256x128xf32, #tpu.memory_space<vmem>>, vector<1x224x128xf32>
    %13 = vector.shape_cast %12 : vector<1x224x128xf32> to vector<224x128xf32>
    %c0_15 = arith.constant 0 : index
    %c512 = arith.constant 512 : index
    %14 = vector.load %arg13[%c0_15, %c512] : memref<224x640xf32, #tpu.memory_space<vmem>>, vector<224x128xf32>
    tpu.vector_store %arg13[%c0_15, %c512], %13 {strides = array<i32>} : memref<224x640xf32, #tpu.memory_space<vmem>>, vector<224x128xf32>,
    %c0_16 = arith.constant 0 : index
    %c0_17 = arith.constant 0 : index
    %15 = vector.load %arg13[%c0_16, %c0_17] : memref<224x640xf32, #tpu.memory_space<vmem>>, vector<224x640xf32>
    %c0_18 = arith.constant 0 : index
    %c0_19 = arith.constant 0 : index
    %16 = vector.load %arg2[%c0_18, %c0_19] : memref<640x84xf32, #tpu.memory_space<vmem>>, vector<640x84xf32>
    %cst = arith.constant dense<0.000000e+00> : vector<224x84xf32>
    %17 = tpu.matmul %15, %16, %cst {dimension_numbers = #tpu.dot_dimension_numbers<[1], [0], [0], [1], [0, 0, 1, 1], [], []>} : vector<224x640xf32>, vector<640x84xf32>, vector<224x84xf32> -> vector<224x84xf32>
    %c0_20 = arith.constant 0 : index
    %c0_21 = arith.constant 0 : index
    %18 = vector.load %arg4[%c0_20, %c0_21] : memref<1x84xf32, #tpu.memory_space<vmem>>, vector<1x84xf32>
    %19 = vector.broadcast %18 : vector<1x84xf32> to vector<224x84xf32>
    %20 = arith.addf %17, %19 : vector<224x84xf32>
    %c0_22 = arith.constant 0 : index
    %c0_23 = arith.constant 0 : index
    %21 = vector.load %arg3[%c0_22, %c0_23] : memref<640x84xf32, #tpu.memory_space<vmem>>, vector<640x84xf32>
    %cst_24 = arith.constant dense<0.000000e+00> : vector<224x84xf32>
    %22 = tpu.matmul %15, %21, %cst_24 {dimension_numbers = #tpu.dot_dimension_numbers<[1], [0], [0], [1], [0, 0, 1, 1], [], []>} : vector<224x640xf32>, vector<640x84xf32>, vector<224x84xf32> -> vector<224x84xf32>
    %c0_25 = arith.constant 0 : index
    %c0_26 = arith.constant 0 : index
    %23 = vector.load %arg4[%c0_25, %c0_26] : memref<1x84xf32, #tpu.memory_space<vmem>>, vector<1x84xf32>
    %24 = vector.broadcast %23 : vector<1x84xf32> to vector<224x84xf32>
    %25 = arith.addf %22, %24 : vector<224x84xf32>
    %26 = arith.maximumf %20, %25 : vector<224x84xf32>
    %cst_27 = arith.constant 0.000000e+00 : f32
    %27 = vector.broadcast %cst_27 : f32 to vector<224x84xf32>
    %28 = arith.maximumf %26, %27 : vector<224x84xf32>
    %c0_28 = arith.constant 0 : index
    %c0_29 = arith.constant 0 : index
    %29 = vector.load %arg14[%c0_28, %c0_29] : memref<224x84xf32, #tpu.memory_space<vmem>>, vector<224x84xf32>
    tpu.vector_store %arg14[%c0_28, %c0_29], %28 {strides = array<i32>} : memref<224x84xf32, #tpu.memory_space<vmem>>, vector<224x84xf32>,
    %cst_30 = arith.constant 0.000000e+00 : f32
    %30 = vector.broadcast %cst_30 : f32 to vector<112x44xf32>
    %c0_31 = arith.constant 0 : index
    %c84 = arith.constant 84 : index
    %31 = vector.load %arg15[%c0_31, %c84] : memref<112x128xf32, #tpu.memory_space<vmem>>, vector<112x44xf32>
    tpu.vector_store %arg15[%c0_31, %c84], %30 {strides = array<i32>} : memref<112x128xf32, #tpu.memory_space<vmem>>, vector<112x44xf32>,
    %c0_32 = arith.constant 0 : index
    %c0_33 = arith.constant 0 : index
    %32 = vector.load %arg14[%c0_32, %c0_33] : memref<224x84xf32, #tpu.memory_space<vmem>>, vector<8x84xf32>
    %c8_34 = arith.constant 8 : index
    %c0_35 = arith.constant 0 : index
    %33 = vector.load %arg14[%c8_34, %c0_35] : memref<224x84xf32, #tpu.memory_space<vmem>>, vector<8x84xf32>
    %34 = arith.maximumf %32, %33 : vector<8x84xf32>
    %c0_36 = arith.constant 0 : index
    %c0_37 = arith.constant 0 : index
    %35 = vector.load %arg15[%c0_36, %c0_37] : memref<112x128xf32, #tpu.memory_space<vmem>>, vector<8x84xf32>
    tpu.vector_store %arg15[%c0_36, %c0_37], %34 {strides = array<i32>} : memref<112x128xf32, #tpu.memory_space<vmem>>, vector<8x84xf32>,
    %c16_38 = arith.constant 16 : index
    %c0_39 = arith.constant 0 : index
    %36 = vector.load %arg14[%c16_38, %c0_39] : memref<224x84xf32, #tpu.memory_space<vmem>>, vector<8x84xf32>
    %c24_40 = arith.constant 24 : index
    %c0_41 = arith.constant 0 : index
    %37 = vector.load %arg14[%c24_40, %c0_41] : memref<224x84xf32, #tpu.memory_space<vmem>>, vector<8x84xf32>
    %38 = arith.maximumf %36, %37 : vector<8x84xf32>
    %c8_42 = arith.constant 8 : index
    %c0_43 = arith.constant 0 : index
    %39 = vector.load %arg15[%c8_42, %c0_43] : memref<112x128xf32, #tpu.memory_space<vmem>>, vector<8x84xf32>
    tpu.vector_store %arg15[%c8_42, %c0_43], %38 {strides = array<i32>} : memref<112x128xf32, #tpu.memory_space<vmem>>, vector<8x84xf32>,
    %c32_44 = arith.constant 32 : index
    %c0_45 = arith.constant 0 : index
    %40 = vector.load %arg14[%c32_44, %c0_45] : memref<224x84xf32, #tpu.memory_space<vmem>>, vector<8x84xf32>
    %c40 = arith.constant 40 : index
    %c0_46 = arith.constant 0 : index
    %41 = vector.load %arg14[%c40, %c0_46] : memref<224x84xf32, #tpu.memory_space<vmem>>, vector<8x84xf32>
    %42 = arith.maximumf %40, %41 : vector<8x84xf32>
    %c16_47 = arith.constant 16 : index
    %c0_48 = arith.constant 0 : index
    %43 = vector.load %arg15[%c16_47, %c0_48] : memref<112x128xf32, #tpu.memory_space<vmem>>, vector<8x84xf32>
    tpu.vector_store %arg15[%c16_47, %c0_48], %42 {strides = array<i32>} : memref<112x128xf32, #tpu.memory_space<vmem>>, vector<8x84xf32>,
    %c48 = arith.constant 48 : index
    %c0_49 = arith.constant 0 : index
    %44 = vector.load %arg14[%c48, %c0_49] : memref<224x84xf32, #tpu.memory_space<vmem>>, vector<8x84xf32>
    %c56 = arith.constant 56 : index
    %c0_50 = arith.constant 0 : index
    %45 = vector.load %arg14[%c56, %c0_50] : memref<224x84xf32, #tpu.memory_space<vmem>>, vector<8x84xf32>
    %46 = arith.maximumf %44, %45 : vector<8x84xf32>
    %c24_51 = arith.constant 24 : index
    %c0_52 = arith.constant 0 : index
    %47 = vector.load %arg15[%c24_51, %c0_52] : memref<112x128xf32, #tpu.memory_space<vmem>>, vector<8x84xf32>
    tpu.vector_store %arg15[%c24_51, %c0_52], %46 {strides = array<i32>} : memref<112x128xf32, #tpu.memory_space<vmem>>, vector<8x84xf32>,
    %c64 = arith.constant 64 : index
    %c0_53 = arith.constant 0 : index
    %48 = vector.load %arg14[%c64, %c0_53] : memref<224x84xf32, #tpu.memory_space<vmem>>, vector<8x84xf32>
    %c72 = arith.constant 72 : index
    %c0_54 = arith.constant 0 : index
    %49 = vector.load %arg14[%c72, %c0_54] : memref<224x84xf32, #tpu.memory_space<vmem>>, vector<8x84xf32>
    %50 = arith.maximumf %48, %49 : vector<8x84xf32>
    %c32_55 = arith.constant 32 : index
    %c0_56 = arith.constant 0 : index
    %51 = vector.load %arg15[%c32_55, %c0_56] : memref<112x128xf32, #tpu.memory_space<vmem>>, vector<8x84xf32>
    tpu.vector_store %arg15[%c32_55, %c0_56], %50 {strides = array<i32>} : memref<112x128xf32, #tpu.memory_space<vmem>>, vector<8x84xf32>,
    %c80 = arith.constant 80 : index
    %c0_57 = arith.constant 0 : index
    %52 = vector.load %arg14[%c80, %c0_57] : memref<224x84xf32, #tpu.memory_space<vmem>>, vector<8x84xf32>
    %c88 = arith.constant 88 : index
    %c0_58 = arith.constant 0 : index
    %53 = vector.load %arg14[%c88, %c0_58] : memref<224x84xf32, #tpu.memory_space<vmem>>, vector<8x84xf32>
    %54 = arith.maximumf %52, %53 : vector<8x84xf32>
    %c40_59 = arith.constant 40 : index
    %c0_60 = arith.constant 0 : index
    %55 = vector.load %arg15[%c40_59, %c0_60] : memref<112x128xf32, #tpu.memory_space<vmem>>, vector<8x84xf32>
    tpu.vector_store %arg15[%c40_59, %c0_60], %54 {strides = array<i32>} : memref<112x128xf32, #tpu.memory_space<vmem>>, vector<8x84xf32>,
    %c96 = arith.constant 96 : index
    %c0_61 = arith.constant 0 : index
    %56 = vector.load %arg14[%c96, %c0_61] : memref<224x84xf32, #tpu.memory_space<vmem>>, vector<8x84xf32>
    %c104 = arith.constant 104 : index
    %c0_62 = arith.constant 0 : index
    %57 = vector.load %arg14[%c104, %c0_62] : memref<224x84xf32, #tpu.memory_space<vmem>>, vector<8x84xf32>
    %58 = arith.maximumf %56, %57 : vector<8x84xf32>
    %c48_63 = arith.constant 48 : index
    %c0_64 = arith.constant 0 : index
    %59 = vector.load %arg15[%c48_63, %c0_64] : memref<112x128xf32, #tpu.memory_space<vmem>>, vector<8x84xf32>
    tpu.vector_store %arg15[%c48_63, %c0_64], %58 {strides = array<i32>} : memref<112x128xf32, #tpu.memory_space<vmem>>, vector<8x84xf32>,
    %c112 = arith.constant 112 : index
    %c0_65 = arith.constant 0 : index
    %60 = vector.load %arg14[%c112, %c0_65] : memref<224x84xf32, #tpu.memory_space<vmem>>, vector<8x84xf32>
    %c120 = arith.constant 120 : index
    %c0_66 = arith.constant 0 : index
    %61 = vector.load %arg14[%c120, %c0_66] : memref<224x84xf32, #tpu.memory_space<vmem>>, vector<8x84xf32>
    %62 = arith.maximumf %60, %61 : vector<8x84xf32>
    %c56_67 = arith.constant 56 : index
    %c0_68 = arith.constant 0 : index
    %63 = vector.load %arg15[%c56_67, %c0_68] : memref<112x128xf32, #tpu.memory_space<vmem>>, vector<8x84xf32>
    tpu.vector_store %arg15[%c56_67, %c0_68], %62 {strides = array<i32>} : memref<112x128xf32, #tpu.memory_space<vmem>>, vector<8x84xf32>,
    %c128_69 = arith.constant 128 : index
    %c0_70 = arith.constant 0 : index
    %64 = vector.load %arg14[%c128_69, %c0_70] : memref<224x84xf32, #tpu.memory_space<vmem>>, vector<8x84xf32>
    %c136 = arith.constant 136 : index
    %c0_71 = arith.constant 0 : index
    %65 = vector.load %arg14[%c136, %c0_71] : memref<224x84xf32, #tpu.memory_space<vmem>>, vector<8x84xf32>
    %66 = arith.maximumf %64, %65 : vector<8x84xf32>
    %c64_72 = arith.constant 64 : index
    %c0_73 = arith.constant 0 : index
    %67 = vector.load %arg15[%c64_72, %c0_73] : memref<112x128xf32, #tpu.memory_space<vmem>>, vector<8x84xf32>
    tpu.vector_store %arg15[%c64_72, %c0_73], %66 {strides = array<i32>} : memref<112x128xf32, #tpu.memory_space<vmem>>, vector<8x84xf32>,
    %c144 = arith.constant 144 : index
    %c0_74 = arith.constant 0 : index
    %68 = vector.load %arg14[%c144, %c0_74] : memref<224x84xf32, #tpu.memory_space<vmem>>, vector<8x84xf32>
    %c152 = arith.constant 152 : index
    %c0_75 = arith.constant 0 : index
    %69 = vector.load %arg14[%c152, %c0_75] : memref<224x84xf32, #tpu.memory_space<vmem>>, vector<8x84xf32>
    %70 = arith.maximumf %68, %69 : vector<8x84xf32>
    %c72_76 = arith.constant 72 : index
    %c0_77 = arith.constant 0 : index
    %71 = vector.load %arg15[%c72_76, %c0_77] : memref<112x128xf32, #tpu.memory_space<vmem>>, vector<8x84xf32>
    tpu.vector_store %arg15[%c72_76, %c0_77], %70 {strides = array<i32>} : memref<112x128xf32, #tpu.memory_space<vmem>>, vector<8x84xf32>,
    %c160 = arith.constant 160 : index
    %c0_78 = arith.constant 0 : index
    %72 = vector.load %arg14[%c160, %c0_78] : memref<224x84xf32, #tpu.memory_space<vmem>>, vector<8x84xf32>
    %c168 = arith.constant 168 : index
    %c0_79 = arith.constant 0 : index
    %73 = vector.load %arg14[%c168, %c0_79] : memref<224x84xf32, #tpu.memory_space<vmem>>, vector<8x84xf32>
    %74 = arith.maximumf %72, %73 : vector<8x84xf32>
    %c80_80 = arith.constant 80 : index
    %c0_81 = arith.constant 0 : index
    %75 = vector.load %arg15[%c80_80, %c0_81] : memref<112x128xf32, #tpu.memory_space<vmem>>, vector<8x84xf32>
    tpu.vector_store %arg15[%c80_80, %c0_81], %74 {strides = array<i32>} : memref<112x128xf32, #tpu.memory_space<vmem>>, vector<8x84xf32>,
    %c176 = arith.constant 176 : index
    %c0_82 = arith.constant 0 : index
    %76 = vector.load %arg14[%c176, %c0_82] : memref<224x84xf32, #tpu.memory_space<vmem>>, vector<8x84xf32>
    %c184 = arith.constant 184 : index
    %c0_83 = arith.constant 0 : index
    %77 = vector.load %arg14[%c184, %c0_83] : memref<224x84xf32, #tpu.memory_space<vmem>>, vector<8x84xf32>
    %78 = arith.maximumf %76, %77 : vector<8x84xf32>
    %c88_84 = arith.constant 88 : index
    %c0_85 = arith.constant 0 : index
    %79 = vector.load %arg15[%c88_84, %c0_85] : memref<112x128xf32, #tpu.memory_space<vmem>>, vector<8x84xf32>
    tpu.vector_store %arg15[%c88_84, %c0_85], %78 {strides = array<i32>} : memref<112x128xf32, #tpu.memory_space<vmem>>, vector<8x84xf32>,
    %c192 = arith.constant 192 : index
    %c0_86 = arith.constant 0 : index
    %80 = vector.load %arg14[%c192, %c0_86] : memref<224x84xf32, #tpu.memory_space<vmem>>, vector<8x84xf32>
    %c200 = arith.constant 200 : index
    %c0_87 = arith.constant 0 : index
    %81 = vector.load %arg14[%c200, %c0_87] : memref<224x84xf32, #tpu.memory_space<vmem>>, vector<8x84xf32>
    %82 = arith.maximumf %80, %81 : vector<8x84xf32>
    %c96_88 = arith.constant 96 : index
    %c0_89 = arith.constant 0 : index
    %83 = vector.load %arg15[%c96_88, %c0_89] : memref<112x128xf32, #tpu.memory_space<vmem>>, vector<8x84xf32>
    tpu.vector_store %arg15[%c96_88, %c0_89], %82 {strides = array<i32>} : memref<112x128xf32, #tpu.memory_space<vmem>>, vector<8x84xf32>,
    %c208 = arith.constant 208 : index
    %c0_90 = arith.constant 0 : index
    %84 = vector.load %arg14[%c208, %c0_90] : memref<224x84xf32, #tpu.memory_space<vmem>>, vector<8x84xf32>
    %c216 = arith.constant 216 : index
    %c0_91 = arith.constant 0 : index
    %85 = vector.load %arg14[%c216, %c0_91] : memref<224x84xf32, #tpu.memory_space<vmem>>, vector<8x84xf32>
    %86 = arith.maximumf %84, %85 : vector<8x84xf32>
    %c104_92 = arith.constant 104 : index
    %c0_93 = arith.constant 0 : index
    %87 = vector.load %arg15[%c104_92, %c0_93] : memref<112x128xf32, #tpu.memory_space<vmem>>, vector<8x84xf32>
    tpu.vector_store %arg15[%c104_92, %c0_93], %86 {strides = array<i32>} : memref<112x128xf32, #tpu.memory_space<vmem>>, vector<8x84xf32>,
    %c0_94 = arith.constant 0 : index
    %c0_95 = arith.constant 0 : index
    %88 = vector.load %arg15[%c0_94, %c0_95] : memref<112x128xf32, #tpu.memory_space<vmem>>, vector<80x128xf32>
    %c0_96 = arith.constant 0 : index
    %c0_97 = arith.constant 0 : index
    %89 = vector.load %arg16[%c0_96, %c0_97] : memref<80x640xf32, #tpu.memory_space<vmem>>, vector<80x128xf32>
    tpu.vector_store %arg16[%c0_96, %c0_97], %88 {strides = array<i32>} : memref<80x640xf32, #tpu.memory_space<vmem>>, vector<80x128xf32>,
    %c8_98 = arith.constant 8 : index
    %c0_99 = arith.constant 0 : index
    %90 = vector.load %arg15[%c8_98, %c0_99] : memref<112x128xf32, #tpu.memory_space<vmem>>, vector<80x128xf32>
    %c0_100 = arith.constant 0 : index
    %c128_101 = arith.constant 128 : index
    %91 = vector.load %arg16[%c0_100, %c128_101] : memref<80x640xf32, #tpu.memory_space<vmem>>, vector<80x128xf32>
    tpu.vector_store %arg16[%c0_100, %c128_101], %90 {strides = array<i32>} : memref<80x640xf32, #tpu.memory_space<vmem>>, vector<80x128xf32>,
    %c16_102 = arith.constant 16 : index
    %c0_103 = arith.constant 0 : index
    %92 = vector.load %arg15[%c16_102, %c0_103] : memref<112x128xf32, #tpu.memory_space<vmem>>, vector<80x128xf32>
    %c0_104 = arith.constant 0 : index
    %c256_105 = arith.constant 256 : index
    %93 = vector.load %arg16[%c0_104, %c256_105] : memref<80x640xf32, #tpu.memory_space<vmem>>, vector<80x128xf32>
    tpu.vector_store %arg16[%c0_104, %c256_105], %92 {strides = array<i32>} : memref<80x640xf32, #tpu.memory_space<vmem>>, vector<80x128xf32>,
    %c24_106 = arith.constant 24 : index
    %c0_107 = arith.constant 0 : index
    %94 = vector.load %arg15[%c24_106, %c0_107] : memref<112x128xf32, #tpu.memory_space<vmem>>, vector<80x128xf32>
    %c0_108 = arith.constant 0 : index
    %c384_109 = arith.constant 384 : index
    %95 = vector.load %arg16[%c0_108, %c384_109] : memref<80x640xf32, #tpu.memory_space<vmem>>, vector<80x128xf32>
    tpu.vector_store %arg16[%c0_108, %c384_109], %94 {strides = array<i32>} : memref<80x640xf32, #tpu.memory_space<vmem>>, vector<80x128xf32>,
    %c32_110 = arith.constant 32 : index
    %c0_111 = arith.constant 0 : index
    %96 = vector.load %arg15[%c32_110, %c0_111] : memref<112x128xf32, #tpu.memory_space<vmem>>, vector<80x128xf32>
    %c0_112 = arith.constant 0 : index
    %c512_113 = arith.constant 512 : index
    %97 = vector.load %arg16[%c0_112, %c512_113] : memref<80x640xf32, #tpu.memory_space<vmem>>, vector<80x128xf32>
    tpu.vector_store %arg16[%c0_112, %c512_113], %96 {strides = array<i32>} : memref<80x640xf32, #tpu.memory_space<vmem>>, vector<80x128xf32>,
    %c0_114 = arith.constant 0 : index
    %c0_115 = arith.constant 0 : index
    %98 = vector.load %arg16[%c0_114, %c0_115] : memref<80x640xf32, #tpu.memory_space<vmem>>, vector<80x640xf32>
    %c0_116 = arith.constant 0 : index
    %c0_117 = arith.constant 0 : index
    %99 = vector.load %arg5[%c0_116, %c0_117] : memref<640x80xf32, #tpu.memory_space<vmem>>, vector<640x80xf32>
    %cst_118 = arith.constant dense<0.000000e+00> : vector<80x80xf32>
    %100 = tpu.matmul %98, %99, %cst_118 {dimension_numbers = #tpu.dot_dimension_numbers<[1], [0], [0], [1], [0, 0, 1, 1], [], []>} : vector<80x640xf32>, vector<640x80xf32>, vector<80x80xf32> -> vector<80x80xf32>
    %c0_119 = arith.constant 0 : index
    %c0_120 = arith.constant 0 : index
    %101 = vector.load %arg7[%c0_119, %c0_120] : memref<1x80xf32, #tpu.memory_space<vmem>>, vector<1x80xf32>
    %102 = vector.broadcast %101 : vector<1x80xf32> to vector<80x80xf32>
    %103 = arith.addf %100, %102 : vector<80x80xf32>
    %c0_121 = arith.constant 0 : index
    %c0_122 = arith.constant 0 : index
    %104 = vector.load %arg6[%c0_121, %c0_122] : memref<640x80xf32, #tpu.memory_space<vmem>>, vector<640x80xf32>
    %cst_123 = arith.constant dense<0.000000e+00> : vector<80x80xf32>
    %105 = tpu.matmul %98, %104, %cst_123 {dimension_numbers = #tpu.dot_dimension_numbers<[1], [0], [0], [1], [0, 0, 1, 1], [], []>} : vector<80x640xf32>, vector<640x80xf32>, vector<80x80xf32> -> vector<80x80xf32>
    %c0_124 = arith.constant 0 : index
    %c0_125 = arith.constant 0 : index
    %106 = vector.load %arg7[%c0_124, %c0_125] : memref<1x80xf32, #tpu.memory_space<vmem>>, vector<1x80xf32>
    %107 = vector.broadcast %106 : vector<1x80xf32> to vector<80x80xf32>
    %108 = arith.addf %105, %107 : vector<80x80xf32>
    %109 = arith.maximumf %103, %108 : vector<80x80xf32>
    %cst_126 = arith.constant 0.000000e+00 : f32
    %110 = vector.broadcast %cst_126 : f32 to vector<80x80xf32>
    %111 = arith.maximumf %109, %110 : vector<80x80xf32>
    %c0_127 = arith.constant 0 : index
    %c0_128 = arith.constant 0 : index
    %112 = vector.load %arg17[%c0_127, %c0_128] : memref<80x80xf32, #tpu.memory_space<vmem>>, vector<80x80xf32>
    tpu.vector_store %arg17[%c0_127, %c0_128], %111 {strides = array<i32>} : memref<80x80xf32, #tpu.memory_space<vmem>>, vector<80x80xf32>,
    %c0_129 = arith.constant 0 : index
    %c0_130 = arith.constant 0 : index
    %113 = vector.load %arg17[%c0_129, %c0_130] : memref<80x80xf32, #tpu.memory_space<vmem>>, vector<8x80xf32>
    %c8_131 = arith.constant 8 : index
    %c0_132 = arith.constant 0 : index
    %114 = vector.load %arg17[%c8_131, %c0_132] : memref<80x80xf32, #tpu.memory_space<vmem>>, vector<8x80xf32>
    %115 = arith.maximumf %113, %114 : vector<8x80xf32>
    %c0_133 = arith.constant 0 : index
    %c0_134 = arith.constant 0 : index
    %116 = vector.load %arg18[%c0_133, %c0_134] : memref<8x400xf32, #tpu.memory_space<vmem>>, vector<8x80xf32>
    tpu.vector_store %arg18[%c0_133, %c0_134], %115 {strides = array<i32>} : memref<8x400xf32, #tpu.memory_space<vmem>>, vector<8x80xf32>,
    %c16_135 = arith.constant 16 : index
    %c0_136 = arith.constant 0 : index
    %117 = vector.load %arg17[%c16_135, %c0_136] : memref<80x80xf32, #tpu.memory_space<vmem>>, vector<8x80xf32>
    %c24_137 = arith.constant 24 : index
    %c0_138 = arith.constant 0 : index
    %118 = vector.load %arg17[%c24_137, %c0_138] : memref<80x80xf32, #tpu.memory_space<vmem>>, vector<8x80xf32>
    %119 = arith.maximumf %117, %118 : vector<8x80xf32>
    %c0_139 = arith.constant 0 : index
    %c80_140 = arith.constant 80 : index
    %120 = vector.load %arg18[%c0_139, %c80_140] : memref<8x400xf32, #tpu.memory_space<vmem>>, vector<8x80xf32>
    tpu.vector_store %arg18[%c0_139, %c80_140], %119 {strides = array<i32>} : memref<8x400xf32, #tpu.memory_space<vmem>>, vector<8x80xf32>,
    %c32_141 = arith.constant 32 : index
    %c0_142 = arith.constant 0 : index
    %121 = vector.load %arg17[%c32_141, %c0_142] : memref<80x80xf32, #tpu.memory_space<vmem>>, vector<8x80xf32>
    %c40_143 = arith.constant 40 : index
    %c0_144 = arith.constant 0 : index
    %122 = vector.load %arg17[%c40_143, %c0_144] : memref<80x80xf32, #tpu.memory_space<vmem>>, vector<8x80xf32>
    %123 = arith.maximumf %121, %122 : vector<8x80xf32>
    %c0_145 = arith.constant 0 : index
    %c160_146 = arith.constant 160 : index
    %124 = vector.load %arg18[%c0_145, %c160_146] : memref<8x400xf32, #tpu.memory_space<vmem>>, vector<8x80xf32>
    tpu.vector_store %arg18[%c0_145, %c160_146], %123 {strides = array<i32>} : memref<8x400xf32, #tpu.memory_space<vmem>>, vector<8x80xf32>,
    %c48_147 = arith.constant 48 : index
    %c0_148 = arith.constant 0 : index
    %125 = vector.load %arg17[%c48_147, %c0_148] : memref<80x80xf32, #tpu.memory_space<vmem>>, vector<8x80xf32>
    %c56_149 = arith.constant 56 : index
    %c0_150 = arith.constant 0 : index
    %126 = vector.load %arg17[%c56_149, %c0_150] : memref<80x80xf32, #tpu.memory_space<vmem>>, vector<8x80xf32>
    %127 = arith.maximumf %125, %126 : vector<8x80xf32>
    %c0_151 = arith.constant 0 : index
    %c240 = arith.constant 240 : index
    %128 = vector.load %arg18[%c0_151, %c240] : memref<8x400xf32, #tpu.memory_space<vmem>>, vector<8x80xf32>
    tpu.vector_store %arg18[%c0_151, %c240], %127 {strides = array<i32>} : memref<8x400xf32, #tpu.memory_space<vmem>>, vector<8x80xf32>,
    %c64_152 = arith.constant 64 : index
    %c0_153 = arith.constant 0 : index
    %129 = vector.load %arg17[%c64_152, %c0_153] : memref<80x80xf32, #tpu.memory_space<vmem>>, vector<8x80xf32>
    %c72_154 = arith.constant 72 : index
    %c0_155 = arith.constant 0 : index
    %130 = vector.load %arg17[%c72_154, %c0_155] : memref<80x80xf32, #tpu.memory_space<vmem>>, vector<8x80xf32>
    %131 = arith.maximumf %129, %130 : vector<8x80xf32>
    %c0_156 = arith.constant 0 : index
    %c320 = arith.constant 320 : index
    %132 = vector.load %arg18[%c0_156, %c320] : memref<8x400xf32, #tpu.memory_space<vmem>>, vector<8x80xf32>
    tpu.vector_store %arg18[%c0_156, %c320], %131 {strides = array<i32>} : memref<8x400xf32, #tpu.memory_space<vmem>>, vector<8x80xf32>,
    %c0_157 = arith.constant 0 : index
    %c0_158 = arith.constant 0 : index
    %133 = vector.load %arg18[%c0_157, %c0_158] : memref<8x400xf32, #tpu.memory_space<vmem>>, vector<8x400xf32>
    %c0_159 = arith.constant 0 : index
    %c0_160 = arith.constant 0 : index
    %134 = vector.load %arg8[%c0_159, %c0_160] : memref<400x128xf32, #tpu.memory_space<vmem>>, vector<400x128xf32>
    %cst_161 = arith.constant dense<0.000000e+00> : vector<8x128xf32>
    %135 = tpu.matmul %133, %134, %cst_161 {dimension_numbers = #tpu.dot_dimension_numbers<[1], [0], [0], [1], [0, 0, 1, 1], [], []>} : vector<8x400xf32>, vector<400x128xf32>, vector<8x128xf32> -> vector<8x128xf32>
    %c0_162 = arith.constant 0 : index
    %c0_163 = arith.constant 0 : index
    %136 = vector.load %arg9[%c0_162, %c0_163] : memref<1x128xf32, #tpu.memory_space<vmem>>, vector<1x128xf32>
    %137 = vector.broadcast %136 : vector<1x128xf32> to vector<8x128xf32>
    %138 = arith.addf %135, %137 : vector<8x128xf32>
    %cst_164 = arith.constant 0.000000e+00 : f32
    %139 = vector.broadcast %cst_164 : f32 to vector<8x128xf32>
    %140 = arith.maximumf %138, %139 : vector<8x128xf32>
    %c0_165 = arith.constant 0 : index
    %c0_166 = arith.constant 0 : index
    %141 = vector.load %arg10[%c0_165, %c0_166] : memref<128x128xf32, #tpu.memory_space<vmem>>, vector<128x128xf32>
    %cst_167 = arith.constant dense<0.000000e+00> : vector<8x128xf32>
    %142 = tpu.matmul %140, %141, %cst_167 {dimension_numbers = #tpu.dot_dimension_numbers<[1], [0], [0], [1], [0, 0, 1, 1], [], []>} : vector<8x128xf32>, vector<128x128xf32>, vector<8x128xf32> -> vector<8x128xf32>
    %c0_168 = arith.constant 0 : index
    %c0_169 = arith.constant 0 : index
    %143 = vector.load %arg11[%c0_168, %c0_169] : memref<1x128xf32, #tpu.memory_space<vmem>>, vector<1x128xf32>
    %144 = vector.broadcast %143 : vector<1x128xf32> to vector<8x128xf32>
    %145 = arith.addf %142, %144 : vector<8x128xf32>
    %cst_170 = arith.constant 0.000000e+00 : f32
    %146 = vector.broadcast %cst_170 : f32 to vector<8x128xf32>
    %147 = arith.maximumf %145, %146 : vector<8x128xf32>
    %c0_171 = arith.constant 0 : index
    %c0_172 = arith.constant 0 : index
    %148 = vector.load %arg12[%c0_171, %c0_172] : memref<8x128xf32, #tpu.memory_space<vmem>>, vector<8x128xf32>
    tpu.vector_store %arg12[%c0_171, %c0_172], %147 {strides = array<i32>} : memref<8x128xf32, #tpu.memory_space<vmem>>, vector<8x128xf32>,
    return
  }
  func.func @transform_0(%arg0: i32) -> (i32, i32, i32) {
    %c0_i32 = arith.constant 0 : i32
    %c0_i32_0 = arith.constant 0 : i32
    %c0_i32_1 = arith.constant 0 : i32
    return %arg0, %c0_i32, %c0_i32_0 : i32, i32, i32
  }
  func.func @transform_1(%arg0: i32) -> (i32, i32) {
    %c0_i32 = arith.constant 0 : i32
    %c0_i32_0 = arith.constant 0 : i32
    %c0_i32_1 = arith.constant 0 : i32
    return %c0_i32, %c0_i32_0 : i32, i32
  }
  func.func @transform_2(%arg0: i32) -> (i32, i32) {
    %c0_i32 = arith.constant 0 : i32
    %c0_i32_0 = arith.constant 0 : i32
    %c0_i32_1 = arith.constant 0 : i32
    return %c0_i32, %c0_i32_0 : i32, i32
  }
  func.func @transform_3(%arg0: i32) -> (i32, i32) {
    %c0_i32 = arith.constant 0 : i32
    %c0_i32_0 = arith.constant 0 : i32
    %c0_i32_1 = arith.constant 0 : i32
    return %c0_i32, %c0_i32_0 : i32, i32
  }
  func.func @transform_4(%arg0: i32) -> (i32, i32) {
    %c0_i32 = arith.constant 0 : i32
    %c0_i32_0 = arith.constant 0 : i32
    %c0_i32_1 = arith.constant 0 : i32
    return %c0_i32, %c0_i32_0 : i32, i32
  }
  func.func @transform_5(%arg0: i32) -> (i32, i32) {
    %c0_i32 = arith.constant 0 : i32
    %c0_i32_0 = arith.constant 0 : i32
    %c0_i32_1 = arith.constant 0 : i32
    return %c0_i32, %c0_i32_0 : i32, i32
  }
  func.func @transform_6(%arg0: i32) -> (i32, i32) {
    %c0_i32 = arith.constant 0 : i32
    %c0_i32_0 = arith.constant 0 : i32
    %c0_i32_1 = arith.constant 0 : i32
    return %c0_i32, %c0_i32_0 : i32, i32
  }
  func.func @transform_7(%arg0: i32) -> (i32, i32) {
    %c0_i32 = arith.constant 0 : i32
    %c0_i32_0 = arith.constant 0 : i32
    %c0_i32_1 = arith.constant 0 : i32
    return %c0_i32, %c0_i32_0 : i32, i32
  }
  func.func @transform_8(%arg0: i32) -> (i32, i32) {
    %c0_i32 = arith.constant 0 : i32
    %c0_i32_0 = arith.constant 0 : i32
    %c0_i32_1 = arith.constant 0 : i32
    return %c0_i32, %c0_i32_0 : i32, i32
  }
  func.func @transform_9(%arg0: i32) -> (i32, i32) {
    %c0_i32 = arith.constant 0 : i32
    %c0_i32_0 = arith.constant 0 : i32
    %c0_i32_1 = arith.constant 0 : i32
    return %c0_i32, %c0_i32_0 : i32, i32
  }
  func.func @transform_10(%arg0: i32) -> (i32, i32) {
    %c0_i32 = arith.constant 0 : i32
    %c0_i32_0 = arith.constant 0 : i32
    %c0_i32_1 = arith.constant 0 : i32
    return %c0_i32, %c0_i32_0 : i32, i32
  }
  func.func @transform_11(%arg0: i32) -> (i32, i32) {
    %c0_i32 = arith.constant 0 : i32
    %c0_i32_0 = arith.constant 0 : i32
    return %arg0, %c0_i32 : i32, i32
  }
}

</mosaic_0001>

<bundles_post_ra>
// kernel: simple_cnn_header_forward.1
= control target key start
LH: loop header
LB: loop body
LE: loop exit
PB: predicated region body
PF: predicated region fallthrough
CT: control target
= control target key end

     0   :  { %v6740_v0 = vmov 0.0   ;;  %vm1940_vm0 = vcmask 1048224   ;;  %vm1911_vm1 = vcmask 687104   ;;  %vm3038_vm2 = vcmask 654336   ;;  %s4153_s12 = smov 80   ;;  %s4155_s22 = smov 112   ;;  %s6728_s1 = inlined_call_operand.vmem [shape: f32[640,84], index: 1, kind: input, shape index: {}]   ;;  %s6729_s0 = inlined_call_operand.vmem [shape: f32[1,256,128], index: 0, kind: input, shape index: {}]   ;;  %s6730_s2 = inlined_call_operand.vmem [shape: f32[640,84], index: 2, kind: input, shape index: {}]   ;;  %s6731_s3 = inlined_call_operand.vmem [shape: f32[1,84], index: 3, kind: input, shape index: {}]   ;;  %s6732_s4 = inlined_call_operand.vmem [shape: f32[640,80], index: 4, kind: input, shape index: {}]   ;;  %s6733_s5 = inlined_call_operand.vmem [shape: f32[640,80], index: 5, kind: input, shape index: {}]   ;;  %s6734_s6 = inlined_call_operand.vmem [shape: f32[1,80], index: 6, kind: input, shape index: {}]   ;;  %s6735_s7 = inlined_call_operand.vmem [shape: f32[400,128], index: 7, kind: input, shape index: {}]   ;;  %s6736_s9 = inlined_call_operand.vmem [shape: f32[128,128], index: 9, kind: input, shape index: {}]   ;;  %s6737_s8 = inlined_call_operand.vmem [shape: f32[1,128], index: 8, kind: input, shape index: {}]   ;;  %s6738_s10 = inlined_call_operand.vmem [shape: f32[1,128], index: 10, kind: input, shape index: {}]   ;;  %s6739_s11 = inlined_call_operand.vmem [shape: f32[8,128], index: 11, kind: output, shape index: {}]  }
   0x1   :  { %545 = vmatprep.subr.mxu0 %v6740_v0  ;;  %750 = vmatprep.subr.mxu1 %v6740_v0  ;;  %v473_v1 = vld [vmem:[%s6728_s1 + $0x78] sm:$0xff]  ;;  %v472_v3 = vld [vmem:[%s6728_s1 + $0x70] sm:$0xff]  ;;  %v471_v5 = vld [vmem:[%s6728_s1 + $0x68] sm:$0xff]  ;;  %1942 = vst.msk [vmem:[#allocation4 + $0x8] sm:$0xff] %vm1940_vm0, %v6740_v0  ;;  %vm3060_vm3 = vcmask 1048192   ;;  %vm3062_vm4 = vcmask 261120  }
   0x2   :  { %v505_v2 = vld [vmem:[%s6728_s1 + $0x178] sm:$0xff]  ;;  %546 = vmatpush1.msra.mxu0 %v473_v1  ;;  %v504_v4 = vld [vmem:[%s6728_s1 + $0x170] sm:$0xff]  ;;  %v503_v6 = vld [vmem:[%s6728_s1 + $0x168] sm:$0xff]  ;;  %1941 = vst.msk [vmem:[#allocation4] sm:$0xff] %vm1940_vm0, %v6740_v0  ;;  %vm3071_vm5 = vcmask 916736   ;;  %vm3080_vm6 = vcmask 1048448  }
   0x3   :  { %751 = vmatpush1.msra.mxu1 %v505_v2  ;;  %547 = vmatprep.subr.mxu0 %v6740_v0  ;;  %v470_v7 = vld [vmem:[%s6728_s1 + $0x60] sm:$0xff]  ;;  %v469_v9 = vld [vmem:[%s6728_s1 + $0x58] sm:$0xff]  ;;  %v468_v11 = vld [vmem:[%s6728_s1 + $0x50] sm:$0xff]  ;;  %1943 = vst.msk [vmem:[#allocation4 + $0x10] sm:$0xff] %vm1940_vm0, %v6740_v0  ;;  %vm3082_vm7 = vcmask 523264   ;;  %vm3091_vm8 = vcmask 1048064  }
   0x4   :  { %752 = vmatprep.subr.mxu1 %v6740_v0  ;;  %548 = vmatpush1.msra.mxu0 %v472_v3  ;;  %v502_v8 = vld [vmem:[%s6728_s1 + $0x160] sm:$0xff]  ;;  %v501_v10 = vld [vmem:[%s6728_s1 + $0x158] sm:$0xff]  ;;  %v500_v12 = vld [vmem:[%s6728_s1 + $0x150] sm:$0xff]  ;;  %1944 = vst.msk [vmem:[#allocation4 + $0x18] sm:$0xff] %vm1940_vm0, %v6740_v0  ;;  %vm3093_vm9 = vcmask 130048   ;;  %vm4157_vm10 = vmmov 0  }
   0x5   :  { %753 = vmatpush1.msra.mxu1 %v504_v4  ;;  %549 = vmatprep.subr.mxu0 %v6740_v0  ;;  %v467_v13 = vld [vmem:[%s6728_s1 + $0x48] sm:$0xff]  ;;  %v466_v15 = vld [vmem:[%s6728_s1 + $0x40] sm:$0xff]  ;;  %v465_v17 = vld [vmem:[%s6728_s1 + $0x38] sm:$0xff]  ;;  %1945 = vst.msk [vmem:[#allocation4 + $0x20] sm:$0xff] %vm1940_vm0, %v6740_v0 }
   0x6   :  { %754 = vmatprep.subr.mxu1 %v6740_v0  ;;  %550 = vmatpush1.msra.mxu0 %v471_v5  ;;  %v499_v14 = vld [vmem:[%s6728_s1 + $0x148] sm:$0xff]  ;;  %v498_v16 = vld [vmem:[%s6728_s1 + $0x140] sm:$0xff]  ;;  %v497_v18 = vld [vmem:[%s6728_s1 + $0x138] sm:$0xff]  ;;  %1946 = vst.msk [vmem:[#allocation4 + $0x28] sm:$0xff] %vm1940_vm0, %v6740_v0 }
   0x7   :  { %755 = vmatpush1.msra.mxu1 %v503_v6  ;;  %551 = vmatprep.subr.mxu0 %v6740_v0  ;;  %v464_v19 = vld [vmem:[%s6728_s1 + $0x30] sm:$0xff]  ;;  %v463_v21 = vld [vmem:[%s6728_s1 + $0x28] sm:$0xff]  ;;  %v462_v23 = vld [vmem:[%s6728_s1 + $0x20] sm:$0xff]  ;;  %1947 = vst.msk [vmem:[#allocation4 + $0x30] sm:$0xff] %vm1940_vm0, %v6740_v0 }
   0x8   :  { %756 = vmatprep.subr.mxu1 %v6740_v0  ;;  %552 = vmatpush1.msra.mxu0 %v470_v7  ;;  %v496_v20 = vld [vmem:[%s6728_s1 + $0x130] sm:$0xff]  ;;  %v495_v22 = vld [vmem:[%s6728_s1 + $0x128] sm:$0xff]  ;;  %v494_v24 = vld [vmem:[%s6728_s1 + $0x120] sm:$0xff]  ;;  %1948 = vst.msk [vmem:[#allocation4 + $0x38] sm:$0xff] %vm1940_vm0, %v6740_v0 }
   0x9   :  { %757 = vmatpush1.msra.mxu1 %v502_v8  ;;  %553 = vmatprep.subr.mxu0 %v6740_v0  ;;  %v461_v25 = vld [vmem:[%s6728_s1 + $0x18] sm:$0xff]  ;;  %v460_v27 = vld [vmem:[%s6728_s1 + $0x10] sm:$0xff]  ;;  %v459_v29 = vld [vmem:[%s6728_s1 + $0x8] sm:$0xff]  ;;  %1949 = vst.msk [vmem:[#allocation4 + $0x40] sm:$0xff] %vm1940_vm0, %v6740_v0 }
   0xa   :  { %758 = vmatprep.subr.mxu1 %v6740_v0  ;;  %554 = vmatpush1.msra.mxu0 %v469_v9  ;;  %v493_v26 = vld [vmem:[%s6728_s1 + $0x118] sm:$0xff]  ;;  %v492_v28 = vld [vmem:[%s6728_s1 + $0x110] sm:$0xff]  ;;  %v491_v30 = vld [vmem:[%s6728_s1 + $0x108] sm:$0xff]  ;;  %1950 = vst.msk [vmem:[#allocation4 + $0x48] sm:$0xff] %vm1940_vm0, %v6740_v0 }
   0xb   :  { %759 = vmatpush1.msra.mxu1 %v501_v10  ;;  %555 = vmatprep.subr.mxu0 %v6740_v0  ;;  %v458_v31 = vld [vmem:[%s6728_s1] sm:$0xff]  ;;  %v489_v33 = vld [vmem:[%s6728_s1 + $0xf8] sm:$0xff]  ;;  %v488_v35 = vld [vmem:[%s6728_s1 + $0xf0] sm:$0xff]  ;;  %1951 = vst.msk [vmem:[#allocation4 + $0x50] sm:$0xff] %vm1940_vm0, %v6740_v0 }
   0xc   :  { %760 = vmatprep.subr.mxu1 %v6740_v0  ;;  %556 = vmatpush1.msra.mxu0 %v468_v11  ;;  %v490_v32 = vld [vmem:[%s6728_s1 + $0x100] sm:$0xff]  ;;  %v521_v34 = vld [vmem:[%s6728_s1 + $0x1f8] sm:$0xff]  ;;  %v520_v36 = vld [vmem:[%s6728_s1 + $0x1f0] sm:$0xff]  ;;  %1952 = vst.msk [vmem:[#allocation4 + $0x58] sm:$0xff] %vm1940_vm0, %v6740_v0 }
   0xd   :  { %761 = vmatpush1.msra.mxu1 %v500_v12  ;;  %557 = vmatprep.subr.mxu0 %v6740_v0  ;;  %v487_v37 = vld [vmem:[%s6728_s1 + $0xe8] sm:$0xff]  ;;  %v486_v39 = vld [vmem:[%s6728_s1 + $0xe0] sm:$0xff]  ;;  %v485_v41 = vld [vmem:[%s6728_s1 + $0xd8] sm:$0xff]  ;;  %1953 = vst.msk [vmem:[#allocation4 + $0x60] sm:$0xff] %vm1940_vm0, %v6740_v0 }
   0xe   :  { %762 = vmatprep.subr.mxu1 %v6740_v0  ;;  %558 = vmatpush1.msra.mxu0 %v467_v13  ;;  %v519_v38 = vld [vmem:[%s6728_s1 + $0x1e8] sm:$0xff]  ;;  %v518_v40 = vld [vmem:[%s6728_s1 + $0x1e0] sm:$0xff]  ;;  %v517_v42 = vld [vmem:[%s6728_s1 + $0x1d8] sm:$0xff]  ;;  %1954 = vst.msk [vmem:[#allocation4 + $0x68] sm:$0xff] %vm1940_vm0, %v6740_v0 }
   0xf   :  { %763 = vmatpush1.msra.mxu1 %v499_v14  ;;  %559 = vmatprep.subr.mxu0 %v6740_v0  ;;  %v484_v43 = vld [vmem:[%s6728_s1 + $0xd0] sm:$0xff]  ;;  %v483_v45 = vld [vmem:[%s6728_s1 + $0xc8] sm:$0xff]  ;;  %v482_v47 = vld [vmem:[%s6728_s1 + $0xc0] sm:$0xff] }
  0x10   :  { %764 = vmatprep.subr.mxu1 %v6740_v0  ;;  %560 = vmatpush1.msra.mxu0 %v466_v15  ;;  %v516_v44 = vld [vmem:[%s6728_s1 + $0x1d0] sm:$0xff]  ;;  %v515_v46 = vld [vmem:[%s6728_s1 + $0x1c8] sm:$0xff]  ;;  %v514_v48 = vld [vmem:[%s6728_s1 + $0x1c0] sm:$0xff] }
  0x11   :  { %765 = vmatpush1.msra.mxu1 %v498_v16  ;;  %561 = vmatprep.subr.mxu0 %v6740_v0  ;;  %v481_v49 = vld [vmem:[%s6728_s1 + $0xb8] sm:$0xff]  ;;  %v480_v51 = vld [vmem:[%s6728_s1 + $0xb0] sm:$0xff]  ;;  %v479_v53 = vld [vmem:[%s6728_s1 + $0xa8] sm:$0xff] }
  0x12   :  { %766 = vmatprep.subr.mxu1 %v6740_v0  ;;  %562 = vmatpush1.msra.mxu0 %v465_v17  ;;  %v513_v50 = vld [vmem:[%s6728_s1 + $0x1b8] sm:$0xff]  ;;  %v512_v52 = vld [vmem:[%s6728_s1 + $0x1b0] sm:$0xff]  ;;  %v511_v54 = vld [vmem:[%s6728_s1 + $0x1a8] sm:$0xff] }
  0x13   :  { %767 = vmatpush1.msra.mxu1 %v497_v18  ;;  %563 = vmatprep.subr.mxu0 %v6740_v0  ;;  %v478_v55 = vld [vmem:[%s6728_s1 + $0xa0] sm:$0xff]  ;;  %v477_v57 = vld [vmem:[%s6728_s1 + $0x98] sm:$0xff]  ;;  %v476_v59 = vld [vmem:[%s6728_s1 + $0x90] sm:$0xff] }
  0x14   :  { %768 = vmatprep.subr.mxu1 %v6740_v0  ;;  %564 = vmatpush1.msra.mxu0 %v464_v19  ;;  %v510_v56 = vld [vmem:[%s6728_s1 + $0x1a0] sm:$0xff]  ;;  %v509_v58 = vld [vmem:[%s6728_s1 + $0x198] sm:$0xff]  ;;  %v508_v60 = vld [vmem:[%s6728_s1 + $0x190] sm:$0xff] }
  0x15   :  { %769 = vmatpush1.msra.mxu1 %v496_v20  ;;  %565 = vmatprep.subr.mxu0 %v6740_v0  ;;  %v475_v61 = vld [vmem:[%s6728_s1 + $0x88] sm:$0xff]  ;;  %v474_v63 = vld [vmem:[%s6728_s1 + $0x80] sm:$0xff]  ;;  %v4480_v3 = vld [vmem:[%s6729_s0 + $0x18] sm:$0xff] }
  0x16   :  { %770 = vmatprep.subr.mxu1 %v6740_v0  ;;  %566 = vmatpush1.msra.mxu0 %v463_v21  ;;  %v507_v62 = vld [vmem:[%s6728_s1 + $0x188] sm:$0xff]  ;;  %v506_v2 = vld [vmem:[%s6728_s1 + $0x180] sm:$0xff]  ;;  %v4492_v5 = vld [vmem:[%s6729_s0 + $0x10] sm:$0xff] }
  0x17   :  { %771 = vmatpush1.msra.mxu1 %v495_v22  ;;  %567 = vmatprep.subr.mxu0 %v6740_v0  ;;  %v4472_v1 = vld [vmem:[%s6729_s0 + $0x8] sm:$0xff]  ;;  %v4487_v4 = vld [vmem:[%s6729_s0] sm:$0xff]  ;;  %v537_v6 = vld [vmem:[%s6728_s1 + $0x278] sm:$0xff] }
  0x18   :  { %772 = vmatprep.subr.mxu1 %v6740_v0  ;;  %568 = vmatpush1.msra.mxu0 %v462_v23  ;;  %v1175_v7 = vld [vmem:[%s6730_s2 + $0x78] sm:$0xff]  ;;  %v4507_v8 = vld [vmem:[%s6729_s0 + $0x20] sm:$0xff]  ;;  %v1174_v9 = vld [vmem:[%s6730_s2 + $0x70] sm:$0xff] }
  0x19   :  { %773 = vmatpush1.msra.mxu1 %v494_v24  ;;  %569 = vmatprep.subr.mxu0 %v6740_v0  ;;  %v4518_v10 = vld [vmem:[%s6729_s0 + $0x28] sm:$0xff]  ;;  %v536_v11 = vld [vmem:[%s6728_s1 + $0x270] sm:$0xff]  ;;  %v1172_v15 = vld [vmem:[%s6730_s2 + $0x60] sm:$0xff] }
  0x1a   :  { %774 = vmatprep.subr.mxu1 %v6740_v0  ;;  %570 = vmatpush1.msra.mxu0 %v461_v25  ;;  %v1173_v12 = vld [vmem:[%s6730_s2 + $0x68] sm:$0xff]  ;;  %v4535_v13 = vld [vmem:[%s6729_s0 + $0x30] sm:$0xff]  ;;  %v4551_v16 = vld [vmem:[%s6729_s0 + $0x38] sm:$0xff] }
  0x1b   :  { %775 = vmatpush1.msra.mxu1 %v493_v26  ;;  %571 = vmatprep.subr.mxu0 %v6740_v0  ;;  %v535_v14 = vld [vmem:[%s6728_s1 + $0x268] sm:$0xff]  ;;  %v1171_v17 = vld [vmem:[%s6730_s2 + $0x58] sm:$0xff]  ;;  %v4564_v18 = vld [vmem:[%s6729_s0 + $0x40] sm:$0xff] }
  0x1c   :  { %776 = vmatprep.subr.mxu1 %v6740_v0  ;;  %572 = vmatpush1.msra.mxu0 %v460_v27  ;;  %v1170_v19 = vld [vmem:[%s6730_s2 + $0x50] sm:$0xff]  ;;  %v534_v20 = vld [vmem:[%s6728_s1 + $0x260] sm:$0xff]  ;;  %v1169_v21 = vld [vmem:[%s6730_s2 + $0x48] sm:$0xff] }
  0x1d   :  { %777 = vmatpush1.msra.mxu1 %v492_v28  ;;  %573 = vmatprep.subr.mxu0 %v6740_v0  ;;  %v4584_v22 = vld [vmem:[%s6729_s0 + $0x48] sm:$0xff]  ;;  %v533_v23 = vld [vmem:[%s6728_s1 + $0x258] sm:$0xff]  ;;  %v1168_v24 = vld [vmem:[%s6730_s2 + $0x40] sm:$0xff] }
  0x1e   :  { %778 = vmatprep.subr.mxu1 %v6740_v0  ;;  %574 = vmatpush1.msra.mxu0 %v459_v29  ;;  %v4600_v25 = vld [vmem:[%s6729_s0 + $0x50] sm:$0xff]  ;;  %v1167_v26 = vld [vmem:[%s6730_s2 + $0x38] sm:$0xff] }
  0x1f   :  { %779 = vmatpush1.msra.mxu1 %v491_v30  ;;  %575 = vmatprep.subr.mxu0 %v6740_v0  ;;  %v4613_v27 = vld [vmem:[%s6729_s0 + $0x58] sm:$0xff]  ;;  %v532_v28 = vld [vmem:[%s6728_s1 + $0x250] sm:$0xff]  ;;  %v4629_v30 = vld [vmem:[%s6729_s0 + $0x60] sm:$0xff] }
  0x20   :  { %780 = vmatprep.subr.mxu1 %v6740_v0  ;;  %576 = vmatpush1.msra.mxu0 %v458_v31  ;;  %v1166_v29 = vld [vmem:[%s6730_s2 + $0x30] sm:$0xff]  ;;  %v531_v31 = vld [vmem:[%s6728_s1 + $0x248] sm:$0xff] }
  0x21   :  { %781 = vmatpush1.msra.mxu1 %v490_v32  ;;  %577 = vmatprep.subr.mxu0 %v6740_v0  ;;  %v1165_v32 = vld [vmem:[%s6730_s2 + $0x28] sm:$0xff] }
  0x22   :  { %782 = vmatprep.subr.mxu1 %v6740_v0  ;;  %578 = vmatpush2.msra.mxu0 %v489_v33  ;;  %v4645_v33 = vld [vmem:[%s6729_s0 + $0x68] sm:$0xff] }
  0x23   :  { %783 = vmatpush2.msra.mxu1 %v521_v34  ;;  %579 = vmatprep.subr.mxu0 %v6740_v0  ;;  %v530_v34 = vld [vmem:[%s6728_s1 + $0x240] sm:$0xff] }
  0x24   :  { %784 = vmatprep.subr.mxu1 %v6740_v0  ;;  %580 = vmatpush2.msra.mxu0 %v488_v35  ;;  %v1164_v35 = vld [vmem:[%s6730_s2 + $0x20] sm:$0xff] }
  0x25   :  { %785 = vmatpush2.msra.mxu1 %v520_v36  ;;  %581 = vmatprep.subr.mxu0 %v6740_v0  ;;  %v4661_v36 = vld [vmem:[%s6729_s0 + $0x70] sm:$0xff] }
  0x26   :  { %786 = vmatprep.subr.mxu1 %v6740_v0  ;;  %582 = vmatpush2.msra.mxu0 %v487_v37  ;;  %v1163_v37 = vld [vmem:[%s6730_s2 + $0x18] sm:$0xff] }
  0x27   :  { %787 = vmatpush2.msra.mxu1 %v519_v38  ;;  %583 = vmatprep.subr.mxu0 %v6740_v0  ;;  %v529_v38 = vld [vmem:[%s6728_s1 + $0x238] sm:$0xff] }
  0x28   :  { %788 = vmatprep.subr.mxu1 %v6740_v0  ;;  %584 = vmatpush2.msra.mxu0 %v486_v39  ;;  %v4677_v39 = vld [vmem:[%s6729_s0 + $0x78] sm:$0xff] }
  0x29   :  { %789 = vmatpush2.msra.mxu1 %v518_v40  ;;  %585 = vmatprep.subr.mxu0 %v6740_v0  ;;  %v1162_v40 = vld [vmem:[%s6730_s2 + $0x10] sm:$0xff] }
  0x2a   :  { %790 = vmatprep.subr.mxu1 %v6740_v0  ;;  %586 = vmatpush2.msra.mxu0 %v485_v41  ;;  %v528_v41 = vld [vmem:[%s6728_s1 + $0x230] sm:$0xff] }
  0x2b   :  { %791 = vmatpush2.msra.mxu1 %v517_v42  ;;  %587 = vmatprep.subr.mxu0 %v6740_v0  ;;  %v1161_v42 = vld [vmem:[%s6730_s2 + $0x8] sm:$0xff] }
  0x2c   :  { %792 = vmatprep.subr.mxu1 %v6740_v0  ;;  %588 = vmatpush2.msra.mxu0 %v484_v43  ;;  %v4697_v43 = vld [vmem:[%s6729_s0 + $0x80] sm:$0xff] }
  0x2d   :  { %793 = vmatpush2.msra.mxu1 %v516_v44  ;;  %589 = vmatprep.subr.mxu0 %v6740_v0  ;;  %v1160_v44 = vld [vmem:[%s6730_s2] sm:$0xff] }
  0x2e   :  { %794 = vmatprep.subr.mxu1 %v6740_v0  ;;  %590 = vmatpush2.msra.mxu0 %v483_v45  ;;  %v4710_v45 = vld [vmem:[%s6729_s0 + $0x88] sm:$0xff] }
  0x2f   :  { %795 = vmatpush2.msra.mxu1 %v515_v46  ;;  %591 = vmatprep.subr.mxu0 %v6740_v0  ;;  %v527_v46 = vld [vmem:[%s6728_s1 + $0x228] sm:$0xff] }
  0x30   :  { %796 = vmatprep.subr.mxu1 %v6740_v0  ;;  %592 = vmatpush2.msra.mxu0 %v482_v47  ;;  %v1191_v47 = vld [vmem:[%s6730_s2 + $0xf8] sm:$0xff] }
  0x31   :  { %797 = vmatpush2.msra.mxu1 %v514_v48  ;;  %593 = vmatprep.subr.mxu0 %v6740_v0  ;;  %v4726_v48 = vld [vmem:[%s6729_s0 + $0x90] sm:$0xff] }
  0x32   :  { %798 = vmatprep.subr.mxu1 %v6740_v0  ;;  %594 = vmatpush2.msra.mxu0 %v481_v49  ;;  %v526_v49 = vld [vmem:[%s6728_s1 + $0x220] sm:$0xff] }
  0x33   :  { %799 = vmatpush2.msra.mxu1 %v513_v50  ;;  %595 = vmatprep.subr.mxu0 %v6740_v0  ;;  %v1190_v50 = vld [vmem:[%s6730_s2 + $0xf0] sm:$0xff] }
  0x34   :  { %800 = vmatprep.subr.mxu1 %v6740_v0  ;;  %596 = vmatpush2.msra.mxu0 %v480_v51  ;;  %v4742_v51 = vld [vmem:[%s6729_s0 + $0x98] sm:$0xff] }
  0x35   :  { %801 = vmatpush2.msra.mxu1 %v512_v52  ;;  %597 = vmatprep.subr.mxu0 %v6740_v0  ;;  %v525_v52 = vld [vmem:[%s6728_s1 + $0x218] sm:$0xff] }
  0x36   :  { %802 = vmatprep.subr.mxu1 %v6740_v0  ;;  %598 = vmatpush2.msra.mxu0 %v479_v53  ;;  %v1189_v53 = vld [vmem:[%s6730_s2 + $0xe8] sm:$0xff] }
  0x37   :  { %803 = vmatpush2.msra.mxu1 %v511_v54  ;;  %599 = vmatprep.subr.mxu0 %v6740_v0  ;;  %v4758_v54 = vld [vmem:[%s6729_s0 + $0xa0] sm:$0xff] }
  0x38   :  { %804 = vmatprep.subr.mxu1 %v6740_v0  ;;  %600 = vmatpush2.msra.mxu0 %v478_v55  ;;  %v524_v55 = vld [vmem:[%s6728_s1 + $0x210] sm:$0xff] }
  0x39   :  { %805 = vmatpush2.msra.mxu1 %v510_v56  ;;  %601 = vmatprep.subr.mxu0 %v6740_v0  ;;  %v1188_v56 = vld [vmem:[%s6730_s2 + $0xe0] sm:$0xff] }
  0x3a   :  { %806 = vmatprep.subr.mxu1 %v6740_v0  ;;  %602 = vmatpush2.msra.mxu0 %v477_v57  ;;  %v4774_v57 = vld [vmem:[%s6729_s0 + $0xa8] sm:$0xff] }
  0x3b   :  { %807 = vmatpush2.msra.mxu1 %v509_v58  ;;  %603 = vmatprep.subr.mxu0 %v6740_v0  ;;  %v1187_v58 = vld [vmem:[%s6730_s2 + $0xd8] sm:$0xff] }
  0x3c   :  { %808 = vmatprep.subr.mxu1 %v6740_v0  ;;  %604 = vmatpush2.msra.mxu0 %v476_v59  ;;  %v523_v59 = vld [vmem:[%s6728_s1 + $0x208] sm:$0xff] }
  0x3d   :  { %809 = vmatpush2.msra.mxu1 %v508_v60  ;;  %605 = vmatprep.subr.mxu0 %v6740_v0  ;;  %v4790_v60 = vld [vmem:[%s6729_s0 + $0xb0] sm:$0xff] }
  0x3e   :  { %810 = vmatprep.subr.mxu1 %v6740_v0  ;;  %606 = vmatpush2.msra.mxu0 %v475_v61  ;;  %v1186_v61 = vld [vmem:[%s6730_s2 + $0xd0] sm:$0xff] }
  0x3f   :  { %811 = vmatpush2.msra.mxu1 %v507_v62  ;;  %607 = vmatprep.subr.mxu0 %v6740_v0  ;;  %v522_v62 = vld [vmem:[%s6728_s1 + $0x200] sm:$0xff]  ;;  %s4156_s1 = smov 64  }
  0x40   :  { %812 = vmatprep.subr.mxu1 %v6740_v0  ;;  %608 = vmatpush2.msra.mxu0 %v474_v63  ;;  %v1185_v63 = vld [vmem:[%s6730_s2 + $0xc8] sm:$0xff] }
  0x41   :  { %609 = vmatprep.mubr.f32.mxu0 %v4472_v1  ;;  %813 = vmatpush2.msra.mxu1 %v506_v2  ;;  %v4810_v2 = vld [vmem:[%s6729_s0 + $0xb8] sm:$0xff] }
  0x42   :  { %814 = vmatprep.mubr.f32.mxu1 %v4480_v3  ;;  %610 = vmatmul.mubr.f32.vlgmr.msra.gmra.mxu0 %v4487_v4 }
  0x43   :  { %815 = vmatmul.mubr.f32.vlgmr.msra.gmra.mxu1 %v4492_v5  ;;  %1240 = vmatprep.subr.mxu1 %v6740_v0 }
  0x44   :  { %3844 = vmatprep.subr.mxu0 %v537_v6  ;;  %1241 = vmatpush1.msra.mxu1 %v1175_v7  ;;  %v4823_v7 = vld [vmem:[%s6729_s0 + $0xc0] sm:$0xff] }
  0x45   :  { %614 = vmatprep.mubr.f32.mxu0 %v4492_v5  ;;  %819 = vmatprep.mubr.f32.mxu1 %v4507_v8 }
  0x46   :  { %3845 = vmatpush3.msra.mxu0 %v537_v6  ;;  %1242 = vmatprep.subr.mxu1 %v6740_v0  ;;  %v1184_v6 = vld [vmem:[%s6730_s2 + $0xc0] sm:$0xff] }
  0x47   :  { %615 = vmatmul.mubr.f32.gmra.mxu0 %v4472_v1  ;;  %820 = vmatmul.mubr.f32.gmra.mxu1 %v4480_v3 }
  0x48   :  { %619 = vmatprep.mubr.f32.mxu0 %v4480_v3  ;;  %1243 = vmatpush1.msra.mxu1 %v1174_v9  ;;  %v1183_v9 = vld [vmem:[%s6730_s2 + $0xb8] sm:$0xff] }
  0x49   :  { %824 = vmatprep.mubr.f32.mxu1 %v4518_v10  ;;  %1244 = vmatprep.subr.mxu1 %v6740_v0 }
  0x4a   :  { %3846 = vmatprep.subr.mxu0 %v536_v11  ;;  %1245 = vmatpush1.msra.mxu1 %v1173_v12  ;;  %v1182_v12 = vld [vmem:[%s6730_s2 + $0xb0] sm:$0xff] }
  0x4b   :  { %620 = vmatmul.mubr.f32.gmra.mxu0 %v4492_v5  ;;  %825 = vmatmul.mubr.f32.gmra.mxu1 %v4507_v8 }
  0x4c   :  { %3847 = vmatpush3.msra.mxu0 %v536_v11  ;;  %624 = vmatprep.mubr.f32.mxu0 %v4507_v8  ;;  %v4836_v11 = vld [vmem:[%s6729_s0 + $0xc8] sm:$0xff] }
  0x4d   :  { %829 = vmatprep.mubr.f32.mxu1 %v4535_v13  ;;  %1246 = vmatprep.subr.mxu1 %v6740_v0 }
  0x4e   :  { %3848 = vmatprep.subr.mxu0 %v535_v14  ;;  %1247 = vmatpush1.msra.mxu1 %v1172_v15  ;;  %v1181_v15 = vld [vmem:[%s6730_s2 + $0xa8] sm:$0xff] }
  0x4f   :  { %625 = vmatmul.mubr.f32.gmra.mxu0 %v4480_v3  ;;  %830 = vmatmul.mubr.f32.gmra.mxu1 %v4518_v10 }
  0x50   :  { %629 = vmatprep.mubr.f32.mxu0 %v4518_v10  ;;  %1248 = vmatprep.subr.mxu1 %v6740_v0 }
  0x51   :  { %834 = vmatprep.mubr.f32.mxu1 %v4551_v16  ;;  %1249 = vmatpush1.msra.mxu1 %v1171_v17  ;;  %v4863_v17 = vld [vmem:[%s6729_s0 + $0xd8] sm:$0xff] }
  0x52   :  { %3849 = vmatpush3.msra.mxu0 %v535_v14  ;;  %1250 = vmatprep.subr.mxu1 %v6740_v0  ;;  %v4850_v14 = vld [vmem:[%s6729_s0 + $0xd0] sm:$0xff] }
  0x53   :  { %630 = vmatmul.mubr.f32.gmra.mxu0 %v4507_v8  ;;  %835 = vmatmul.mubr.f32.gmra.mxu1 %v4535_v13 }
  0x54   :  { %634 = vmatprep.mubr.f32.mxu0 %v4535_v13  ;;  %839 = vmatprep.mubr.f32.mxu1 %v4564_v18 }
  0x55   :  { %1251 = vmatpush1.msra.mxu1 %v1170_v19  ;;  %3850 = vmatprep.subr.mxu0 %v534_v20  ;;  %v1180_v19 = vld [vmem:[%s6730_s2 + $0xa0] sm:$0xff] }
  0x56   :  { %1252 = vmatprep.subr.mxu1 %v6740_v0  ;;  %3851 = vmatpush3.msra.mxu0 %v534_v20  ;;  %v4876_v20 = vld [vmem:[%s6729_s0 + $0xe0] sm:$0xff] }
  0x57   :  { %635 = vmatmul.mubr.f32.gmra.mxu0 %v4518_v10  ;;  %840 = vmatmul.mubr.f32.gmra.mxu1 %v4551_v16 }
  0x58   :  { %1253 = vmatpush1.msra.mxu1 %v1169_v21  ;;  %639 = vmatprep.mubr.f32.mxu0 %v4551_v16  ;;  %v1179_v21 = vld [vmem:[%s6730_s2 + $0x98] sm:$0xff] }
  0x59   :  { %844 = vmatprep.mubr.f32.mxu1 %v4584_v22  ;;  %1254 = vmatprep.subr.mxu1 %v6740_v0 }
  0x5a   :  { %3852 = vmatprep.subr.mxu0 %v533_v23  ;;  %1255 = vmatpush1.msra.mxu1 %v1168_v24  ;;  %v1178_v24 = vld [vmem:[%s6730_s2 + $0x90] sm:$0xff] }
  0x5b   :  { %640 = vmatmul.mubr.f32.gmra.mxu0 %v4535_v13  ;;  %845 = vmatmul.mubr.f32.gmra.mxu1 %v4564_v18 }
  0x5c   :  { %644 = vmatprep.mubr.f32.mxu0 %v4564_v18  ;;  %849 = vmatprep.mubr.f32.mxu1 %v4600_v25 }
  0x5d   :  { %1256 = vmatprep.subr.mxu1 %v6740_v0  ;;  %3853 = vmatpush3.msra.mxu0 %v533_v23  ;;  %v4889_v23 = vld [vmem:[%s6729_s0 + $0xe8] sm:$0xff] }
  0x5e   :  { %1257 = vmatpush1.msra.mxu1 %v1167_v26  ;;  %3854 = vmatprep.subr.mxu0 %v532_v28  ;;  %v1177_v26 = vld [vmem:[%s6730_s2 + $0x88] sm:$0xff] }
  0x5f   :  { %645 = vmatmul.mubr.f32.gmra.mxu0 %v4551_v16  ;;  %850 = vmatmul.mubr.f32.gmra.mxu1 %v4584_v22 }
  0x60   :  { %649 = vmatprep.mubr.f32.mxu0 %v4584_v22  ;;  %854 = vmatprep.mubr.f32.mxu1 %v4613_v27 }
  0x61   :  { %1258 = vmatprep.subr.mxu1 %v6740_v0  ;;  %3855 = vmatpush3.msra.mxu0 %v532_v28  ;;  %v4906_v28 = vld [vmem:[%s6729_s0 + $0xf0] sm:$0xff] }
  0x62   :  { %1259 = vmatpush1.msra.mxu1 %v1166_v29  ;;  %3856 = vmatprep.subr.mxu0 %v531_v31  ;;  %v1176_v29 = vld [vmem:[%s6730_s2 + $0x80] sm:$0xff] }
  0x63   :  { %650 = vmatmul.mubr.f32.gmra.mxu0 %v4564_v18  ;;  %855 = vmatmul.mubr.f32.gmra.mxu1 %v4600_v25 }
  0x64   :  { %654 = vmatprep.mubr.f32.mxu0 %v4600_v25  ;;  %859 = vmatprep.mubr.f32.mxu1 %v4629_v30 }
  0x65   :  { %1260 = vmatprep.subr.mxu1 %v6740_v0  ;;  %3857 = vmatpush3.msra.mxu0 %v531_v31  ;;  %v1239_v31 = vld [vmem:[%s6730_s2 + $0x278] sm:$0xff] }
  0x66   :  { %1261 = vmatpush1.msra.mxu1 %v1165_v32  ;;  %3858 = vmatprep.subr.mxu0 %v530_v34  ;;  %v1207_v32 = vld [vmem:[%s6730_s2 + $0x178] sm:$0xff] }
  0x67   :  { %655 = vmatmul.mubr.f32.gmra.mxu0 %v4584_v22  ;;  %860 = vmatmul.mubr.f32.gmra.mxu1 %v4613_v27 }
  0x68   :  { %659 = vmatprep.mubr.f32.mxu0 %v4613_v27  ;;  %864 = vmatprep.mubr.f32.mxu1 %v4645_v33 }
  0x69   :  { %1262 = vmatprep.subr.mxu1 %v6740_v0  ;;  %3859 = vmatpush3.msra.mxu0 %v530_v34  ;;  %v1206_v34 = vld [vmem:[%s6730_s2 + $0x170] sm:$0xff] }
  0x6a   :  { %1263 = vmatpush1.msra.mxu1 %v1164_v35  ;;  %3860 = vmatprep.subr.mxu0 %v529_v38  ;;  %v1205_v35 = vld [vmem:[%s6730_s2 + $0x168] sm:$0xff] }
  0x6b   :  { %660 = vmatmul.mubr.f32.gmra.mxu0 %v4600_v25  ;;  %865 = vmatmul.mubr.f32.gmra.mxu1 %v4629_v30 }
  0x6c   :  { %1264 = vmatprep.subr.mxu1 %v6740_v0  ;;  %664 = vmatprep.mubr.f32.mxu0 %v4629_v30 }
  0x6d   :  { %869 = vmatprep.mubr.f32.mxu1 %v4661_v36  ;;  %1265 = vmatpush1.msra.mxu1 %v1163_v37  ;;  %v1238_v37 = vld [vmem:[%s6730_s2 + $0x270] sm:$0xff] }
  0x6e   :  { %1266 = vmatprep.subr.mxu1 %v6740_v0  ;;  %3861 = vmatpush3.msra.mxu0 %v529_v38  ;;  %v1203_v38 = vld [vmem:[%s6730_s2 + $0x158] sm:$0xff] }
  0x6f   :  { %665 = vmatmul.mubr.f32.gmra.mxu0 %v4613_v27  ;;  %870 = vmatmul.mubr.f32.gmra.mxu1 %v4645_v33 }
  0x70   :  { %669 = vmatprep.mubr.f32.mxu0 %v4645_v33  ;;  %874 = vmatprep.mubr.f32.mxu1 %v4677_v39 }
  0x71   :  { %1267 = vmatpush1.msra.mxu1 %v1162_v40  ;;  %3862 = vmatprep.subr.mxu0 %v528_v41  ;;  %v1201_v40 = vld [vmem:[%s6730_s2 + $0x148] sm:$0xff] }
  0x72   :  { %1268 = vmatprep.subr.mxu1 %v6740_v0  ;;  %3863 = vmatpush3.msra.mxu0 %v528_v41  ;;  %v1237_v41 = vld [vmem:[%s6730_s2 + $0x268] sm:$0xff] }
  0x73   :  { %670 = vmatmul.mubr.f32.gmra.mxu0 %v4629_v30  ;;  %875 = vmatmul.mubr.f32.gmra.mxu1 %v4661_v36 }
  0x74   :  { %1269 = vmatpush1.msra.mxu1 %v1161_v42  ;;  %674 = vmatprep.mubr.f32.mxu0 %v4661_v36  ;;  %v1200_v42 = vld [vmem:[%s6730_s2 + $0x140] sm:$0xff] }
  0x75   :  { %879 = vmatprep.mubr.f32.mxu1 %v4697_v43  ;;  %1270 = vmatprep.subr.mxu1 %v6740_v0 }
  0x76   :  { %1271 = vmatpush1.msra.mxu1 %v1160_v44  ;;  %3864 = vmatprep.subr.mxu0 %v527_v46  ;;  %v1199_v44 = vld [vmem:[%s6730_s2 + $0x138] sm:$0xff] }
  0x77   :  { %675 = vmatmul.mubr.f32.gmra.mxu0 %v4645_v33  ;;  %880 = vmatmul.mubr.f32.gmra.mxu1 %v4677_v39 }
  0x78   :  { %679 = vmatprep.mubr.f32.mxu0 %v4677_v39  ;;  %884 = vmatprep.mubr.f32.mxu1 %v4710_v45 }
  0x79   :  { %1272 = vmatprep.subr.mxu1 %v6740_v0  ;;  %3865 = vmatpush3.msra.mxu0 %v527_v46  ;;  %v1198_v46 = vld [vmem:[%s6730_s2 + $0x130] sm:$0xff] }
  0x7a   :  { %1273 = vmatpush2.msra.mxu1 %v1191_v47  ;;  %3866 = vmatprep.subr.mxu0 %v526_v49  ;;  %v1197_v47 = vld [vmem:[%s6730_s2 + $0x128] sm:$0xff] }
  0x7b   :  { %680 = vmatmul.mubr.f32.gmra.mxu0 %v4661_v36  ;;  %885 = vmatmul.mubr.f32.gmra.mxu1 %v4697_v43 }
  0x7c   :  { %684 = vmatprep.mubr.f32.mxu0 %v4697_v43  ;;  %889 = vmatprep.mubr.f32.mxu1 %v4726_v48 }
  0x7d   :  { %1274 = vmatprep.subr.mxu1 %v6740_v0  ;;  %3867 = vmatpush3.msra.mxu0 %v526_v49  ;;  %v1236_v49 = vld [vmem:[%s6730_s2 + $0x260] sm:$0xff] }
  0x7e   :  { %1275 = vmatpush2.msra.mxu1 %v1190_v50  ;;  %3868 = vmatprep.subr.mxu0 %v525_v52  ;;  %v1196_v50 = vld [vmem:[%s6730_s2 + $0x120] sm:$0xff] }
  0x7f   :  { %685 = vmatmul.mubr.f32.gmra.mxu0 %v4677_v39  ;;  %890 = vmatmul.mubr.f32.gmra.mxu1 %v4710_v45 }
  0x80   :  { %689 = vmatprep.mubr.f32.mxu0 %v4710_v45  ;;  %894 = vmatprep.mubr.f32.mxu1 %v4742_v51 }
  0x81   :  { %1276 = vmatprep.subr.mxu1 %v6740_v0  ;;  %3869 = vmatpush3.msra.mxu0 %v525_v52  ;;  %v1195_v52 = vld [vmem:[%s6730_s2 + $0x118] sm:$0xff] }
  0x82   :  { %1277 = vmatpush2.msra.mxu1 %v1189_v53  ;;  %3870 = vmatprep.subr.mxu0 %v524_v55  ;;  %v1194_v53 = vld [vmem:[%s6730_s2 + $0x110] sm:$0xff] }
  0x83   :  { %690 = vmatmul.mubr.f32.gmra.mxu0 %v4697_v43  ;;  %895 = vmatmul.mubr.f32.gmra.mxu1 %v4726_v48 }
  0x84   :  { %694 = vmatprep.mubr.f32.mxu0 %v4726_v48  ;;  %899 = vmatprep.mubr.f32.mxu1 %v4758_v54 }
  0x85   :  { %1278 = vmatprep.subr.mxu1 %v6740_v0  ;;  %3871 = vmatpush3.msra.mxu0 %v524_v55  ;;  %v1193_v55 = vld [vmem:[%s6730_s2 + $0x108] sm:$0xff] }
  0x86   :  { %1279 = vmatpush2.msra.mxu1 %v1188_v56  ;;  %3872 = vmatprep.subr.mxu0 %v523_v59  ;;  %v1235_v56 = vld [vmem:[%s6730_s2 + $0x258] sm:$0xff] }
  0x87   :  { %695 = vmatmul.mubr.f32.gmra.mxu0 %v4710_v45  ;;  %900 = vmatmul.mubr.f32.gmra.mxu1 %v4742_v51 }
  0x88   :  { %1280 = vmatprep.subr.mxu1 %v6740_v0  ;;  %699 = vmatprep.mubr.f32.mxu0 %v4742_v51 }
  0x89   :  { %904 = vmatprep.mubr.f32.mxu1 %v4774_v57  ;;  %1281 = vmatpush2.msra.mxu1 %v1187_v58  ;;  %v1192_v58 = vld [vmem:[%s6730_s2 + $0x100] sm:$0xff] }
  0x8a   :  { %1282 = vmatprep.subr.mxu1 %v6740_v0  ;;  %3873 = vmatpush3.msra.mxu0 %v523_v59  ;;  %v1223_v59 = vld [vmem:[%s6730_s2 + $0x1f8] sm:$0xff] }
  0x8b   :  { %700 = vmatmul.mubr.f32.gmra.mxu0 %v4726_v48  ;;  %905 = vmatmul.mubr.f32.gmra.mxu1 %v4758_v54 }
  0x8c   :  { %704 = vmatprep.mubr.f32.mxu0 %v4758_v54  ;;  %909 = vmatprep.mubr.f32.mxu1 %v4790_v60 }
  0x8d   :  { %1283 = vmatpush2.msra.mxu1 %v1186_v61  ;;  %3874 = vmatprep.subr.mxu0 %v522_v62  ;;  %v1222_v61 = vld [vmem:[%s6730_s2 + $0x1f0] sm:$0xff] }
  0x8e   :  { %1284 = vmatprep.subr.mxu1 %v6740_v0  ;;  %3875 = vmatpush3.msra.mxu0 %v522_v62  ;;  %v1234_v62 = vld [vmem:[%s6730_s2 + $0x250] sm:$0xff] }
  0x8f   :  { %705 = vmatmul.mubr.f32.gmra.mxu0 %v4742_v51  ;;  %910 = vmatmul.mubr.f32.gmra.mxu1 %v4774_v57 }
  0x90   :  { %1285 = vmatpush2.msra.mxu1 %v1185_v63  ;;  %709 = vmatprep.mubr.f32.mxu0 %v4774_v57  ;;  %v1221_v63 = vld [vmem:[%s6730_s2 + $0x1e8] sm:$0xff] }
  0x91   :  { %914 = vmatprep.mubr.f32.mxu1 %v4810_v2  ;;  %1286 = vmatprep.subr.mxu1 %v6740_v0 }
  0x92   :  { %1287 = vmatpush2.msra.mxu1 %v1184_v6  ;;  %1445 = vmatprep.subr.mxu0 %v6740_v0  ;;  %v1220_v6 = vld [vmem:[%s6730_s2 + $0x1e0] sm:$0xff] }
  0x93   :  { %710 = vmatmul.mubr.f32.gmra.mxu0 %v4758_v54  ;;  %915 = vmatmul.mubr.f32.gmra.mxu1 %v4790_v60 }
  0x94   :  { %714 = vmatprep.mubr.f32.mxu0 %v4790_v60  ;;  %919 = vmatprep.mubr.f32.mxu1 %v4823_v7 }
  0x95   :  { %1288 = vmatprep.subr.mxu1 %v6740_v0 }
  0x96   :  { %1289 = vmatpush2.msra.mxu1 %v1183_v9  ;;  %v1219_v9 = vld [vmem:[%s6730_s2 + $0x1d8] sm:$0xff] }
  0x97   :  { %715 = vmatmul.mubr.f32.gmra.mxu0 %v4774_v57  ;;  %920 = vmatmul.mubr.f32.gmra.mxu1 %v4810_v2 }
  0x98   :  { %719 = vmatprep.mubr.f32.mxu0 %v4810_v2  ;;  %924 = vmatprep.mubr.f32.mxu1 %v4836_v11 }
  0x99   :  { %1290 = vmatprep.subr.mxu1 %v6740_v0 }
  0x9a   :  { %1291 = vmatpush2.msra.mxu1 %v1182_v12  ;;  %v1233_v12 = vld [vmem:[%s6730_s2 + $0x248] sm:$0xff] }
  0x9b   :  { %720 = vmatmul.mubr.f32.gmra.mxu0 %v4790_v60  ;;  %925 = vmatmul.mubr.f32.gmra.mxu1 %v4823_v7 }
  0x9c   :  { %724 = vmatprep.mubr.f32.mxu0 %v4823_v7  ;;  %929 = vmatprep.mubr.f32.mxu1 %v4850_v14 }
  0x9d   :  { %1292 = vmatprep.subr.mxu1 %v6740_v0 }
  0x9e   :  { %1293 = vmatpush2.msra.mxu1 %v1181_v15  ;;  %v1218_v15 = vld [vmem:[%s6730_s2 + $0x1d0] sm:$0xff] }
  0x9f   :  { %725 = vmatmul.mubr.f32.gmra.mxu0 %v4810_v2  ;;  %930 = vmatmul.mubr.f32.gmra.mxu1 %v4836_v11 }
  0xa0   :  { %729 = vmatprep.mubr.f32.mxu0 %v4836_v11  ;;  %934 = vmatprep.mubr.f32.mxu1 %v4863_v17 }
  0xa1   :  { %1294 = vmatprep.subr.mxu1 %v6740_v0 }
  0xa2   :  { %1295 = vmatpush2.msra.mxu1 %v1180_v19  ;;  %v1217_v19 = vld [vmem:[%s6730_s2 + $0x1c8] sm:$0xff] }
  0xa3   :  { %730 = vmatmul.mubr.f32.gmra.mxu0 %v4823_v7  ;;  %935 = vmatmul.mubr.f32.gmra.mxu1 %v4850_v14 }
  0xa4   :  { %1296 = vmatprep.subr.mxu1 %v6740_v0  ;;  %734 = vmatprep.mubr.f32.mxu0 %v4850_v14 }
  0xa5   :  { %939 = vmatprep.mubr.f32.mxu1 %v4876_v20  ;;  %1297 = vmatpush2.msra.mxu1 %v1179_v21  ;;  %v1216_v21 = vld [vmem:[%s6730_s2 + $0x1c0] sm:$0xff] }
  0xa6   :  { %1298 = vmatprep.subr.mxu1 %v6740_v0 }
  0xa7   :  { %735 = vmatmul.mubr.f32.gmra.mxu0 %v4836_v11  ;;  %940 = vmatmul.mubr.f32.gmra.mxu1 %v4863_v17 }
  0xa8   :  { %739 = vmatprep.mubr.f32.mxu0 %v4863_v17  ;;  %944 = vmatprep.mubr.f32.mxu1 %v4889_v23 }
  0xa9   :  { %1299 = vmatpush2.msra.mxu1 %v1178_v24  ;;  %v1215_v24 = vld [vmem:[%s6730_s2 + $0x1b8] sm:$0xff] }
  0xaa   :  { %1300 = vmatprep.subr.mxu1 %v6740_v0 }
  0xab   :  { %740 = vmatmul.mubr.f32.gmra.mxu0 %v4850_v14  ;;  %945 = vmatmul.mubr.f32.gmra.mxu1 %v4876_v20 }
  0xac   :  { %1301 = vmatpush2.msra.mxu1 %v1177_v26  ;;  %744 = vmatprep.mubr.f32.mxu0 %v4876_v20  ;;  %v1232_v26 = vld [vmem:[%s6730_s2 + $0x240] sm:$0xff] }
  0xad   :  { %949 = vmatprep.mubr.f32.mxu1 %v4906_v28  ;;  %1302 = vmatprep.subr.mxu1 %v6740_v0 }
  0xae   :  { %1303 = vmatpush2.msra.mxu1 %v1176_v29  ;;  %v1214_v29 = vld [vmem:[%s6730_s2 + $0x1b0] sm:$0xff] }
  0xaf   :  { %745 = vmatmul.mubr.f32.gmra.mxu0 %v4863_v17  ;;  %950 = vmatmul.mubr.f32.gmra.mxu1 %v4889_v23 }
  0xb0   :  { %3876 = vmatprep.mubr.f32.mxu0 %v4507_v8  ;;  %1304 = vmatprep.mubr.f32.mxu1 %v4472_v1 }
  0xb1   :  { %3918 = vmatprep.subr.mxu1 %v1239_v31 }
  0xb3   :  { %3877 = vmatmul.mubr.f32.vlgmr.msra.gmra.mxu0 %v4518_v10  ;;  %1305 = vmatmul.mubr.f32.vlgmr.msra.gmra.mxu1 %v4487_v4  ;;  %v1204_v4 = vld [vmem:[%s6730_s2 + $0x160] sm:$0xff] }
  0xb4   :  { %1446 = vmatpush1.msra.mxu0 %v1207_v32  ;;  %3919 = vmatpush3.msra.mxu1 %v1239_v31  ;;  %v5100_v31 = vld [vmem:[%s6729_s0 + $0xf8] sm:$0xff]  ;;  %v1213_v32 = vld [vmem:[%s6730_s2 + $0x1a8] sm:$0xff] }
  0xb5   :  { %1447 = vmatprep.subr.mxu0 %v6740_v0  ;;  %3879 = vmatprep.mubr.f32.mxu0 %v4535_v13 }
  0xb6   :  { %1448 = vmatpush1.msra.mxu0 %v1206_v34  ;;  %1309 = vmatprep.mubr.f32.mxu1 %v4492_v5  ;;  %v1212_v34 = vld [vmem:[%s6730_s2 + $0x1a0] sm:$0xff] }
  0xb7   :  { %1449 = vmatprep.subr.mxu0 %v6740_v0  ;;  %3880 = vmatmul.mubr.f32.gmra.mxu0 %v4551_v16 }
  0xb8   :  { %1310 = vmatmul.mubr.f32.gmra.mxu1 %v4472_v1  ;;  %1450 = vmatpush1.msra.mxu0 %v1205_v35  ;;  %v1202_v1 = vld [vmem:[%s6730_s2 + $0x150] sm:$0xff]  ;;  %v1231_v35 = vld [vmem:[%s6730_s2 + $0x238] sm:$0xff] }
  0xb9   :  { %1451 = vmatprep.subr.mxu0 %v6740_v0  ;;  %3882 = vmatprep.mubr.f32.mxu0 %v4564_v18 }
  0xba   :  { %1452 = vmatpush1.msra.mxu0 %v1204_v4  ;;  %1314 = vmatprep.mubr.f32.mxu1 %v4480_v3  ;;  %v1211_v4 = vld [vmem:[%s6730_s2 + $0x198] sm:$0xff] }
  0xbb   :  { %1453 = vmatprep.subr.mxu0 %v6740_v0  ;;  %3920 = vmatprep.subr.mxu1 %v1238_v37 }
  0xbc   :  { %3883 = vmatmul.mubr.f32.gmra.mxu0 %v4584_v22  ;;  %1315 = vmatmul.mubr.f32.gmra.mxu1 %v4492_v5 }
  0xbd   :  { %1454 = vmatpush1.msra.mxu0 %v1203_v38  ;;  %3921 = vmatpush3.msra.mxu1 %v1238_v37  ;;  %v1210_v37 = vld [vmem:[%s6730_s2 + $0x190] sm:$0xff] }
  0xbe   :  { %1455 = vmatprep.subr.mxu0 %v6740_v0  ;;  %3885 = vmatprep.mubr.f32.mxu0 %v4600_v25  ;;  %v1230_v38 = vld [vmem:[%s6730_s2 + $0x230] sm:$0xff] }
  0xbf   :  { %1456 = vmatpush1.msra.mxu0 %v1202_v1  ;;  %1319 = vmatprep.mubr.f32.mxu1 %v4507_v8  ;;  %v1209_v1 = vld [vmem:[%s6730_s2 + $0x188] sm:$0xff] }
  0xc0   :  { %1457 = vmatprep.subr.mxu0 %v6740_v0  ;;  %3886 = vmatmul.mubr.f32.gmra.mxu0 %v4613_v27 }
  0xc1   :  { %1320 = vmatmul.mubr.f32.gmra.mxu1 %v4480_v3  ;;  %1458 = vmatpush1.msra.mxu0 %v1201_v40  ;;  %v1208_v40 = vld [vmem:[%s6730_s2 + $0x180] sm:$0xff] }
  0xc2   :  { %1459 = vmatprep.subr.mxu0 %v6740_v0  ;;  %3922 = vmatprep.subr.mxu1 %v1237_v41 }
  0xc3   :  { %1460 = vmatpush1.msra.mxu0 %v1200_v42  ;;  %3888 = vmatprep.mubr.f32.mxu0 %v4629_v30  ;;  %v1228_v42 = vld [vmem:[%s6730_s2 + $0x220] sm:$0xff] }
  0xc4   :  { %1324 = vmatprep.mubr.f32.mxu1 %v4518_v10  ;;  %1461 = vmatprep.subr.mxu0 %v6740_v0 }
  0xc5   :  { %3923 = vmatpush3.msra.mxu1 %v1237_v41  ;;  %3889 = vmatmul.mubr.f32.gmra.mxu0 %v4645_v33  ;;  %v1229_v41 = vld [vmem:[%s6730_s2 + $0x228] sm:$0xff] }
  0xc6   :  { %1325 = vmatmul.mubr.f32.gmra.mxu1 %v4507_v8  ;;  %1462 = vmatpush1.msra.mxu0 %v1199_v44  ;;  %v1227_v44 = vld [vmem:[%s6730_s2 + $0x218] sm:$0xff] }
  0xc7   :  { %1463 = vmatprep.subr.mxu0 %v6740_v0  ;;  %3891 = vmatprep.mubr.f32.mxu0 %v4661_v36 }
  0xc8   :  { %1464 = vmatpush1.msra.mxu0 %v1198_v46  ;;  %1329 = vmatprep.mubr.f32.mxu1 %v4535_v13  ;;  %v5165_v46 = vld [vmem:[%s6731_s3] ss:$0 sm:$0xff] }
  0xc9   :  { %1465 = vmatprep.subr.mxu0 %v6740_v0  ;;  %3892 = vmatmul.mubr.f32.gmra.mxu0 %v4677_v39 }
  0xca   :  { %1330 = vmatmul.mubr.f32.gmra.mxu1 %v4518_v10  ;;  %1466 = vmatpush1.msra.mxu0 %v1197_v47 }
  0xcb   :  { %1467 = vmatprep.subr.mxu0 %v6740_v0  ;;  %3924 = vmatprep.subr.mxu1 %v1236_v49 }
  0xcc   :  { %1468 = vmatpush1.msra.mxu0 %v1196_v50  ;;  %3925 = vmatpush3.msra.mxu1 %v1236_v49 }
  0xcd   :  { %3894 = vmatprep.mubr.f32.mxu0 %v4697_v43  ;;  %1334 = vmatprep.mubr.f32.mxu1 %v4551_v16 }
  0xce   :  { %1469 = vmatprep.subr.mxu0 %v6740_v0  ;;  %3895 = vmatmul.mubr.f32.gmra.mxu0 %v4710_v45 }
  0xcf   :  { %1335 = vmatmul.mubr.f32.gmra.mxu1 %v4535_v13  ;;  %1470 = vmatpush1.msra.mxu0 %v1195_v52 }
  0xd0   :  { %1471 = vmatprep.subr.mxu0 %v6740_v0  ;;  %3897 = vmatprep.mubr.f32.mxu0 %v4726_v48 }
  0xd1   :  { %1472 = vmatpush1.msra.mxu0 %v1194_v53  ;;  %1339 = vmatprep.mubr.f32.mxu1 %v4564_v18 }
  0xd2   :  { %1473 = vmatprep.subr.mxu0 %v6740_v0  ;;  %3898 = vmatmul.mubr.f32.gmra.mxu0 %v4742_v51 }
  0xd3   :  { %1340 = vmatmul.mubr.f32.gmra.mxu1 %v4551_v16  ;;  %1474 = vmatpush1.msra.mxu0 %v1193_v55 }
  0xd4   :  { %3926 = vmatprep.subr.mxu1 %v1235_v56  ;;  %1475 = vmatprep.subr.mxu0 %v6740_v0 }
  0xd5   :  { %3927 = vmatpush3.msra.mxu1 %v1235_v56  ;;  %1476 = vmatpush1.msra.mxu0 %v1192_v58 }
  0xd6   :  { %3900 = vmatprep.mubr.f32.mxu0 %v4758_v54  ;;  %1344 = vmatprep.mubr.f32.mxu1 %v4584_v22 }
  0xd7   :  { %1477 = vmatprep.subr.mxu0 %v6740_v0  ;;  %3901 = vmatmul.mubr.f32.gmra.mxu0 %v4774_v57 }
  0xd8   :  { %1345 = vmatmul.mubr.f32.gmra.mxu1 %v4564_v18  ;;  %1478 = vmatpush2.msra.mxu0 %v1223_v59 }
  0xd9   :  { %1479 = vmatprep.subr.mxu0 %v6740_v0  ;;  %3903 = vmatprep.mubr.f32.mxu0 %v4790_v60 }
  0xda   :  { %1480 = vmatpush2.msra.mxu0 %v1222_v61  ;;  %1349 = vmatprep.mubr.f32.mxu1 %v4600_v25 }
  0xdb   :  { %1481 = vmatprep.subr.mxu0 %v6740_v0  ;;  %3928 = vmatprep.subr.mxu1 %v1234_v62 }
  0xdc   :  { %3904 = vmatmul.mubr.f32.gmra.mxu0 %v4810_v2  ;;  %1350 = vmatmul.mubr.f32.gmra.mxu1 %v4584_v22 }
  0xdd   :  { %1482 = vmatpush2.msra.mxu0 %v1221_v63  ;;  %3929 = vmatpush3.msra.mxu1 %v1234_v62 }
  0xde   :  { %1483 = vmatprep.subr.mxu0 %v6740_v0  ;;  %3906 = vmatprep.mubr.f32.mxu0 %v4823_v7 }
  0xdf   :  { %1484 = vmatpush2.msra.mxu0 %v1220_v6  ;;  %1354 = vmatprep.mubr.f32.mxu1 %v4613_v27 }
  0xe0   :  { %1485 = vmatprep.subr.mxu0 %v6740_v0  ;;  %3907 = vmatmul.mubr.f32.gmra.mxu0 %v4836_v11 }
  0xe1   :  { %1355 = vmatmul.mubr.f32.gmra.mxu1 %v4600_v25  ;;  %1486 = vmatpush2.msra.mxu0 %v1219_v9 }
  0xe2   :  { %1487 = vmatprep.subr.mxu0 %v6740_v0  ;;  %3930 = vmatprep.subr.mxu1 %v1233_v12 }
  0xe3   :  { %1488 = vmatpush2.msra.mxu0 %v1218_v15  ;;  %3909 = vmatprep.mubr.f32.mxu0 %v4850_v14 }
  0xe4   :  { %1359 = vmatprep.mubr.f32.mxu1 %v4629_v30  ;;  %1489 = vmatprep.subr.mxu0 %v6740_v0 }
  0xe5   :  { %3931 = vmatpush3.msra.mxu1 %v1233_v12  ;;  %3910 = vmatmul.mubr.f32.gmra.mxu0 %v4863_v17 }
  0xe6   :  { %1360 = vmatmul.mubr.f32.gmra.mxu1 %v4613_v27  ;;  %1490 = vmatpush2.msra.mxu0 %v1217_v19 }
  0xe7   :  { %1491 = vmatprep.subr.mxu0 %v6740_v0  ;;  %3912 = vmatprep.mubr.f32.mxu0 %v4876_v20 }
  0xe8   :  { %1492 = vmatpush2.msra.mxu0 %v1216_v21  ;;  %1364 = vmatprep.mubr.f32.mxu1 %v4645_v33 }
  0xe9   :  { %1493 = vmatprep.subr.mxu0 %v6740_v0  ;;  %3913 = vmatmul.mubr.f32.gmra.mxu0 %v4889_v23 }
  0xea   :  { %1365 = vmatmul.mubr.f32.gmra.mxu1 %v4629_v30  ;;  %1494 = vmatpush2.msra.mxu0 %v1215_v24 }
  0xeb   :  { %1495 = vmatprep.subr.mxu0 %v6740_v0  ;;  %3932 = vmatprep.subr.mxu1 %v1232_v26 }
  0xec   :  { %1496 = vmatpush2.msra.mxu0 %v1214_v29  ;;  %3933 = vmatpush3.msra.mxu1 %v1232_v26 }
  0xed   :  { %3915 = vmatprep.mubr.f32.mxu0 %v4906_v28  ;;  %1369 = vmatprep.mubr.f32.mxu1 %v4661_v36 }
  0xee   :  { %1497 = vmatprep.subr.mxu0 %v6740_v0  ;;  %3916 = vmatmul.mubr.f32.gmra.mxu0 %v5100_v31 }
  0xef   :  { %1370 = vmatmul.mubr.f32.gmra.mxu1 %v4645_v33  ;;  %1498 = vmatpush2.msra.mxu0 %v1213_v32 }
  0xf0   :  { %1499 = vmatprep.subr.mxu0 %v6740_v0  ;;  %1374 = vmatprep.mubr.f32.mxu1 %v4677_v39 }
  0xf1   :  { %1500 = vmatpush2.msra.mxu0 %v1212_v34  ;;  %3934 = vmatprep.subr.mxu1 %v1231_v35 }
  0xf2   :  { %1501 = vmatprep.subr.mxu0 %v6740_v0  ;;  %3935 = vmatpush3.msra.mxu1 %v1231_v35 }
  0xf3   :  { %1375 = vmatmul.mubr.f32.gmra.mxu1 %v4661_v36  ;;  %1502 = vmatpush2.msra.mxu0 %v1211_v4 }
  0xf4   :  { %1503 = vmatprep.subr.mxu0 %v6740_v0  ;;  %1379 = vmatprep.mubr.f32.mxu1 %v4697_v43 }
  0xf5   :  { %1504 = vmatpush2.msra.mxu0 %v1210_v37  ;;  %1509 = vmatprep.mubr.f32.mxu0 %v4480_v3 }
  0xf6   :  { %1505 = vmatprep.subr.mxu0 %v6740_v0  ;;  %3936 = vmatprep.subr.mxu1 %v1230_v38 }
  0xf7   :  { %1380 = vmatmul.mubr.f32.gmra.mxu1 %v4677_v39  ;;  %1506 = vmatpush2.msra.mxu0 %v1209_v1 }
  0xf8   :  { %1507 = vmatprep.subr.mxu0 %v6740_v0  ;;  %1384 = vmatprep.mubr.f32.mxu1 %v4710_v45 }
  0xf9   :  { %1508 = vmatpush2.msra.mxu0 %v1208_v40  ;;  %3937 = vmatpush3.msra.mxu1 %v1230_v38 }
  0xfa   :  { %1510 = vmatmul.mubr.f32.vlgmr.msra.gmra.mxu0 %v4492_v5  ;;  %3938 = vmatprep.subr.mxu1 %v1229_v41  ;;  %v1226_v5 = vld [vmem:[%s6730_s2 + $0x210] sm:$0xff] }
  0xfb   :  { %1385 = vmatmul.mubr.f32.gmra.mxu1 %v4697_v43  ;;  %1514 = vmatprep.mubr.f32.mxu0 %v4507_v8 }
  0xfc   :  { %1389 = vmatprep.mubr.f32.mxu1 %v4726_v48  ;;  %3939 = vmatpush3.msra.mxu1 %v1229_v41 }
  0xfd   :  { %3940 = vmatprep.subr.mxu1 %v1228_v42 }
  0xfe   :  { %1515 = vmatmul.mubr.f32.gmra.mxu0 %v4480_v3  ;;  %3941 = vmatpush3.msra.mxu1 %v1228_v42  ;;  %v1225_v3 = vld [vmem:[%s6730_s2 + $0x208] sm:$0xff] }
  0xff   :  { %1390 = vmatmul.mubr.f32.gmra.mxu1 %v4710_v45  ;;  %1519 = vmatprep.mubr.f32.mxu0 %v4518_v10 }
 0x100   :  { %1394 = vmatprep.mubr.f32.mxu1 %v4742_v51  ;;  %3942 = vmatprep.subr.mxu1 %v1227_v44 }
 0x101   :  { %3943 = vmatpush3.msra.mxu1 %v1227_v44 }
 0x102   :  { %1520 = vmatmul.mubr.f32.gmra.mxu0 %v4507_v8  ;;  %3944 = vmatprep.subr.mxu1 %v1226_v5  ;;  %v611_v47 = vpop.f32.mrf.mxu0  ;;  %v1224_v8 = vld [vmem:[%s6730_s2 + $0x200] sm:$0xff] }
 0x103   :  { %1395 = vmatmul.mubr.f32.gmra.mxu1 %v4726_v48  ;;  %1524 = vmatprep.mubr.f32.mxu0 %v4535_v13  ;;  %v816_v49 = vpop.f32.mrf.mxu1  ;;  %v612_v50 = vadd.f32 %v5165_v46, %v611_v47 }
 0x104   :  { %1399 = vmatprep.mubr.f32.mxu1 %v4758_v54  ;;  %3945 = vmatpush3.msra.mxu1 %v1226_v5  ;;  %v613_v52 = vpop.f32.mrf.mxu0 }
 0x105   :  { %v818_v53 = vpop.f32.mrf.mxu1  ;;  %3946 = vmatprep.subr.mxu1 %v1225_v3  ;;  %v5179_v55 = vadd.f32 %v816_v49, %v612_v50 }
 0x106   :  { %1525 = vmatmul.mubr.f32.gmra.mxu0 %v4518_v10  ;;  %3947 = vmatpush3.msra.mxu1 %v1225_v3 }
 0x107   :  { %1400 = vmatmul.mubr.f32.gmra.mxu1 %v4742_v51  ;;  %1529 = vmatprep.mubr.f32.mxu0 %v4551_v16  ;;  %v616_v56 = vpop.f32.mrf.mxu0  ;;  %v821_v58 = vpop.f32.mrf.mxu1 }
 0x108   :  { %1404 = vmatprep.mubr.f32.mxu1 %v4774_v57  ;;  %v617_v59 = vadd.f32 %v5165_v46, %v616_v56  ;;  %3948 = vmatprep.subr.mxu1 %v1224_v8 }
 0x109   :  { %v618_v61 = vpop.f32.mrf.mxu0  ;;  %v823_v62 = vpop.f32.mrf.mxu1  ;;  %3949 = vmatpush3.msra.mxu1 %v1224_v8 }
 0x10a   :  { %1530 = vmatmul.mubr.f32.gmra.mxu0 %v4535_v13  ;;  %v5186_v10 = vadd.f32 %v821_v58, %v617_v59 }
 0x10b   :  { %1405 = vmatmul.mubr.f32.gmra.mxu1 %v4758_v54  ;;  %1534 = vmatprep.mubr.f32.mxu0 %v4564_v18  ;;  %v621_v63 = vpop.f32.mrf.mxu0  ;;  %v826_v6 = vpop.f32.mrf.mxu1 }
 0x10c   :  { %1409 = vmatprep.mubr.f32.mxu1 %v4790_v60  ;;  %v622_v9 = vadd.f32 %v5165_v46, %v621_v63 }
 0x10d   :  { %v623_v12 = vpop.f32.mrf.mxu0  ;;  %v828_v15 = vpop.f32.mrf.mxu1 }
 0x10e   :  { %1535 = vmatmul.mubr.f32.gmra.mxu0 %v4551_v16  ;;  %v5193_v19 = vadd.f32 %v826_v6, %v622_v9  ;;  %v4127_v12 = vld [vmem:[%s6729_s0 + $0x20] sm:$0xff] }
 0x10f   :  { %1410 = vmatmul.mubr.f32.gmra.mxu1 %v4774_v57  ;;  %1539 = vmatprep.mubr.f32.mxu0 %v4584_v22  ;;  %v626_v13 = vpop.f32.mrf.mxu0  ;;  %v831_v21 = vpop.f32.mrf.mxu1 }
 0x110   :  { %1414 = vmatprep.mubr.f32.mxu1 %v4810_v2  ;;  %v627_v24 = vadd.f32 %v5165_v46, %v626_v13  ;;  %v2224_v13 = vld [vmem:[%s6732_s4 + $0x1f8] sm:$0xff] }
 0x111   :  { %v628_v26 = vpop.f32.mrf.mxu0  ;;  %v833_v29 = vpop.f32.mrf.mxu1  ;;  %3554 = vmatprep.subr.mxu0 %v2224_v13 }
 0x112   :  { %1540 = vmatmul.mubr.f32.gmra.mxu0 %v4564_v18  ;;  %v5200_v32 = vadd.f32 %v831_v21, %v627_v24  ;;  %v2208_v24 = vld [vmem:[%s6732_s4 + $0x178] sm:$0xff]  ;;  %v4128_v29 = vld [vmem:[%s6729_s0 + $0x28] sm:$0xff] }
 0x113   :  { %1415 = vmatmul.mubr.f32.gmra.mxu1 %v4790_v60  ;;  %1544 = vmatprep.mubr.f32.mxu0 %v4600_v25  ;;  %v631_v16 = vpop.f32.mrf.mxu0  ;;  %v836_v34 = vpop.f32.mrf.mxu1 }
 0x114   :  { %1419 = vmatprep.mubr.f32.mxu1 %v4823_v7  ;;  %v632_v35 = vadd.f32 %v5165_v46, %v631_v16  ;;  %3555 = vmatpush3.msra.mxu0 %v2208_v24 }
 0x115   :  { %v633_v4 = vpop.f32.mrf.mxu0  ;;  %v838_v37 = vpop.f32.mrf.mxu1 }
 0x116   :  { %1545 = vmatmul.mubr.f32.gmra.mxu0 %v4584_v22  ;;  %v5207_v38 = vadd.f32 %v836_v34, %v632_v35  ;;  %v4129_v35 = vld [vmem:[%s6729_s0 + $0x30] sm:$0xff] }
 0x117   :  { %1420 = vmatmul.mubr.f32.gmra.mxu1 %v4810_v2  ;;  %1549 = vmatprep.mubr.f32.mxu0 %v4613_v27  ;;  %v636_v18 = vpop.f32.mrf.mxu0  ;;  %v841_v1 = vpop.f32.mrf.mxu1 }
 0x118   :  { %1424 = vmatprep.mubr.f32.mxu1 %v4836_v11  ;;  %v637_v40 = vadd.f32 %v5165_v46, %v636_v18 }
 0x119   :  { %v638_v41 = vpop.f32.mrf.mxu0  ;;  %v843_v42 = vpop.f32.mrf.mxu1 }
 0x11a   :  { %1550 = vmatmul.mubr.f32.gmra.mxu0 %v4600_v25  ;;  %v5214_v44 = vadd.f32 %v841_v1, %v637_v40  ;;  %v4130_v1 = vld [vmem:[%s6729_s0 + $0x38] sm:$0xff]  ;;  %v4131_v42 = vld [vmem:[%s6729_s0 + $0x40] sm:$0xff] }
 0x11b   :  { %1425 = vmatmul.mubr.f32.gmra.mxu1 %v4823_v7  ;;  %1554 = vmatprep.mubr.f32.mxu0 %v4629_v30  ;;  %v641_v22 = vpop.f32.mrf.mxu0  ;;  %v846_v5 = vpop.f32.mrf.mxu1 }
 0x11c   :  { %1429 = vmatprep.mubr.f32.mxu1 %v4850_v14  ;;  %v642_v3 = vadd.f32 %v5165_v46, %v641_v22 }
 0x11d   :  { %v643_v47 = vpop.f32.mrf.mxu0  ;;  %v848_v49 = vpop.f32.mrf.mxu1 }
 0x11e   :  { %1555 = vmatmul.mubr.f32.gmra.mxu0 %v4613_v27  ;;  %v5221_v50 = vadd.f32 %v846_v5, %v642_v3  ;;  %v2207_v47 = vld [vmem:[%s6732_s4 + $0x170] sm:$0xff] }
 0x11f   :  { %1430 = vmatmul.mubr.f32.gmra.mxu1 %v4836_v11  ;;  %1559 = vmatprep.mubr.f32.mxu0 %v4645_v33  ;;  %v646_v25 = vpop.f32.mrf.mxu0  ;;  %v851_v52 = vpop.f32.mrf.mxu1 }
 0x120   :  { %1434 = vmatprep.mubr.f32.mxu1 %v4863_v17  ;;  %v647_v53 = vadd.f32 %v5165_v46, %v646_v25  ;;  %v4132_v25 = vld [vmem:[%s6729_s0 + $0x48] sm:$0xff] }
 0x121   :  { %v648_v8 = vpop.f32.mrf.mxu0  ;;  %v853_v56 = vpop.f32.mrf.mxu1 }
 0x122   :  { %1560 = vmatmul.mubr.f32.gmra.mxu0 %v4629_v30  ;;  %v5228_v58 = vadd.f32 %v851_v52, %v647_v53  ;;  %v4133_v8 = vld [vmem:[%s6729_s0 + $0x50] sm:$0xff] }
 0x123   :  { %1435 = vmatmul.mubr.f32.gmra.mxu1 %v4850_v14  ;;  %1564 = vmatprep.mubr.f32.mxu0 %v4661_v36  ;;  %v651_v27 = vpop.f32.mrf.mxu0  ;;  %v856_v59 = vpop.f32.mrf.mxu1 }
 0x124   :  { %1439 = vmatprep.mubr.f32.mxu1 %v4876_v20  ;;  %v652_v61 = vadd.f32 %v5165_v46, %v651_v27 }
 0x125   :  { %v653_v62 = vpop.f32.mrf.mxu0  ;;  %v858_v63 = vpop.f32.mrf.mxu1 }
 0x126   :  { %1565 = vmatmul.mubr.f32.gmra.mxu0 %v4645_v33  ;;  %v5235_v6 = vadd.f32 %v856_v59, %v652_v61  ;;  %v2222_v59 = vld [vmem:[%s6732_s4 + $0x1e8] sm:$0xff]  ;;  %v4134_v62 = vld [vmem:[%s6729_s0 + $0x58] sm:$0xff] }
 0x127   :  { %1440 = vmatmul.mubr.f32.gmra.mxu1 %v4863_v17  ;;  %1569 = vmatprep.mubr.f32.mxu0 %v4677_v39  ;;  %v656_v30 = vpop.f32.mrf.mxu0  ;;  %v861_v9 = vpop.f32.mrf.mxu1 }
 0x128   :  { %3950 = vmatprep.mubr.f32.mxu1 %v4127_v12  ;;  %v657_v15 = vadd.f32 %v5165_v46, %v656_v30 }
 0x129   :  { %v658_v33 = vpop.f32.mrf.mxu0  ;;  %v863_v21 = vpop.f32.mrf.mxu1 }
 0x12a   :  { %1570 = vmatmul.mubr.f32.gmra.mxu0 %v4661_v36  ;;  %v5250_v26 = vadd.f32 %v861_v9, %v657_v15  ;;  %v4135_v9 = vld [vmem:[%s6729_s0 + $0x60] sm:$0xff]  ;;  %v4136_v21 = vld [vmem:[%s6729_s0 + $0x68] sm:$0xff] }
 0x12b   :  { %3951 = vmatmul.mubr.f32.vlgmr.msra.gmra.mxu1 %v4128_v29  ;;  %1574 = vmatprep.mubr.f32.mxu0 %v4697_v43  ;;  %v661_v16 = vpop.f32.mrf.mxu0  ;;  %v866_v34 = vpop.f32.mrf.mxu1 }
 0x12c   :  { %3953 = vmatprep.mubr.f32.mxu1 %v4129_v35  ;;  %v662_v4 = vadd.f32 %v5165_v46, %v661_v16  ;;  %v4137_v16 = vld [vmem:[%s6729_s0 + $0x70] sm:$0xff] }
 0x12d   :  { %v663_v36 = vpop.f32.mrf.mxu0  ;;  %v868_v37 = vpop.f32.mrf.mxu1 }
 0x12e   :  { %1575 = vmatmul.mubr.f32.gmra.mxu0 %v4677_v39  ;;  %v5261_v18 = vadd.f32 %v866_v34, %v662_v4  ;;  %v2223_v39 = vld [vmem:[%s6732_s4 + $0x1f0] sm:$0xff]  ;;  %v2221_v4 = vld [vmem:[%s6732_s4 + $0x1e0] sm:$0xff]  ;;  %v4138_v37 = vld [vmem:[%s6729_s0 + $0x78] sm:$0xff] }
 0x12f   :  { %3954 = vmatmul.mubr.f32.gmra.mxu1 %v4130_v1  ;;  %1579 = vmatprep.mubr.f32.mxu0 %v4710_v45  ;;  %v666_v40 = vpop.f32.mrf.mxu0  ;;  %v871_v41 = vpop.f32.mrf.mxu1 }
 0x130   :  { %3956 = vmatprep.mubr.f32.mxu1 %v4131_v42  ;;  %v667_v22 = vadd.f32 %v5165_v46, %v666_v40  ;;  %3556 = vmatprep.subr.mxu0 %v2223_v39 }
 0x131   :  { %v668_v5 = vpop.f32.mrf.mxu0  ;;  %v873_v3 = vpop.f32.mrf.mxu1  ;;  %3557 = vmatpush3.msra.mxu0 %v2207_v47 }
 0x132   :  { %1580 = vmatmul.mubr.f32.gmra.mxu0 %v4697_v43  ;;  %v5278_v49 = vadd.f32 %v871_v41, %v667_v22  ;;  %3558 = vmatprep.subr.mxu0 %v2222_v59  ;;  %v2205_v41 = vld [vmem:[%s6732_s4 + $0x160] sm:$0xff]  ;;  %v4140_v3 = vld [vmem:[%s6729_s0 + $0x88] sm:$0xff]  ;;  %v4142_v59 = vld [vmem:[%s6729_s0 + $0x98] sm:$0xff] }
 0x133   :  { %3957 = vmatmul.mubr.f32.gmra.mxu1 %v4132_v25  ;;  %1584 = vmatprep.mubr.f32.mxu0 %v4726_v48  ;;  %v671_v52 = vpop.f32.mrf.mxu0  ;;  %v876_v53 = vpop.f32.mrf.mxu1 }
 0x134   :  { %3959 = vmatprep.mubr.f32.mxu1 %v4133_v8  ;;  %v672_v56 = vadd.f32 %v5165_v46, %v671_v52  ;;  %v4141_v52 = vld [vmem:[%s6729_s0 + $0x90] sm:$0xff] }
 0x135   :  { %v673_v43 = vpop.f32.mrf.mxu0  ;;  %v878_v27 = vpop.f32.mrf.mxu1 }
 0x136   :  { %1585 = vmatmul.mubr.f32.gmra.mxu0 %v4710_v45  ;;  %v5292_v61 = vadd.f32 %v876_v53, %v672_v56  ;;  %v2206_v45 = vld [vmem:[%s6732_s4 + $0x168] sm:$0xff]  ;;  %v2204_v43 = vld [vmem:[%s6732_s4 + $0x158] sm:$0xff] }
 0x137   :  { %3960 = vmatmul.mubr.f32.gmra.mxu1 %v4134_v62  ;;  %1589 = vmatprep.mubr.f32.mxu0 %v4742_v51  ;;  %v676_v63 = vpop.f32.mrf.mxu0  ;;  %v881_v30 = vpop.f32.mrf.mxu1 }
 0x138   :  { %3962 = vmatprep.mubr.f32.mxu1 %v4135_v9  ;;  %v677_v12 = vadd.f32 %v5165_v46, %v676_v63  ;;  %3559 = vmatpush3.msra.mxu0 %v2206_v45 }
 0x139   :  { %v678_v15 = vpop.f32.mrf.mxu0  ;;  %v883_v13 = vpop.f32.mrf.mxu1  ;;  %3560 = vmatprep.subr.mxu0 %v2221_v4 }
 0x13a   :  { %1590 = vmatmul.mubr.f32.gmra.mxu0 %v4726_v48  ;;  %v5306_v33 = vadd.f32 %v881_v30, %v677_v12  ;;  %v4143_v30 = vld [vmem:[%s6729_s0 + $0xa0] sm:$0xff]  ;;  %v4144_v15 = vld [vmem:[%s6729_s0 + $0xa8] sm:$0xff] }
 0x13b   :  { %3963 = vmatmul.mubr.f32.gmra.mxu1 %v4136_v21  ;;  %1594 = vmatprep.mubr.f32.mxu0 %v4758_v54  ;;  %v681_v24 = vpop.f32.mrf.mxu0  ;;  %v886_v29 = vpop.f32.mrf.mxu1 }
 0x13c   :  { %3965 = vmatprep.mubr.f32.mxu1 %v4137_v16  ;;  %v682_v34 = vadd.f32 %v5165_v46, %v681_v24  ;;  %3561 = vmatpush3.msra.mxu0 %v2205_v41 }
 0x13d   :  { %v683_v35 = vpop.f32.mrf.mxu0  ;;  %v888_v48 = vpop.f32.mrf.mxu1 }
 0x13e   :  { %1595 = vmatmul.mubr.f32.gmra.mxu0 %v4742_v51  ;;  %v5320_v36 = vadd.f32 %v886_v29, %v682_v34  ;;  %v4139_v51 = vld [vmem:[%s6729_s0 + $0x80] sm:$0xff]  ;;  %v2219_v29 = vld [vmem:[%s6732_s4 + $0x1d0] sm:$0xff] }
 0x13f   :  { %3966 = vmatmul.mubr.f32.gmra.mxu1 %v4138_v37  ;;  %1599 = vmatprep.mubr.f32.mxu0 %v4774_v57  ;;  %v686_v1 = vpop.f32.mrf.mxu0  ;;  %v891_v40 = vpop.f32.mrf.mxu1  ;;  %v2203_v35 = vld [vmem:[%s6732_s4 + $0x150] sm:$0xff] }
 0x140   :  { %6744 = vst [vmem:[#allocation8_spill] sm:$0xff] %v5320_v36  ;;  %3968 = vmatprep.mubr.f32.mxu1 %v4139_v51  ;;  %v687_v42 = vadd.f32 %v5165_v46, %v686_v1 }
 0x141   :  { %v688_v22 = vpop.f32.mrf.mxu0  ;;  %v893_v39 = vpop.f32.mrf.mxu1 }
 0x142   :  { %1600 = vmatmul.mubr.f32.gmra.mxu0 %v4758_v54  ;;  %v5334_v5 = vadd.f32 %v891_v40, %v687_v42  ;;  %v2220_v54 = vld [vmem:[%s6732_s4 + $0x1d8] sm:$0xff]  ;;  %v2218_v42 = vld [vmem:[%s6732_s4 + $0x1c8] sm:$0xff] }
 0x143   :  { %3969 = vmatmul.mubr.f32.gmra.mxu1 %v4140_v3  ;;  %1604 = vmatprep.mubr.f32.mxu0 %v4790_v60  ;;  %v691_v47 = vpop.f32.mrf.mxu0  ;;  %v896_v25 = vpop.f32.mrf.mxu1  ;;  %v2176_v39 = vld [vmem:[%s6732_s4 + $0x78] sm:$0xff] }
 0x144   :  { %3971 = vmatprep.mubr.f32.mxu1 %v4141_v52  ;;  %v692_v53 = vadd.f32 %v5165_v46, %v691_v47  ;;  %3562 = vmatprep.subr.mxu0 %v2220_v54 }
 0x145   :  { %v693_v8 = vpop.f32.mrf.mxu0  ;;  %v898_v56 = vpop.f32.mrf.mxu1  ;;  %3563 = vmatpush3.msra.mxu0 %v2204_v43 }
 0x146   :  { %1605 = vmatmul.mubr.f32.gmra.mxu0 %v4774_v57  ;;  %v5351_v27 = vadd.f32 %v896_v25, %v692_v53  ;;  %3564 = vmatprep.subr.mxu0 %v2219_v29  ;;  %v2191_v8 = vld [vmem:[%s6732_s4 + $0xf0] sm:$0xff] }
 0x147   :  { %3972 = vmatmul.mubr.f32.gmra.mxu1 %v4142_v59  ;;  %1609 = vmatprep.mubr.f32.mxu0 %v4810_v2  ;;  %v696_v62 = vpop.f32.mrf.mxu0  ;;  %v901_v63 = vpop.f32.mrf.mxu1  ;;  %v2175_v56 = vld [vmem:[%s6732_s4 + $0x70] sm:$0xff] }
 0x148   :  { %6745 = vst [vmem:[#allocation9_spill] sm:$0xff] %v5351_v27  ;;  %3974 = vmatprep.mubr.f32.mxu1 %v4143_v30  ;;  %v697_v9 = vadd.f32 %v5165_v46, %v696_v62  ;;  %3565 = vmatpush3.msra.mxu0 %v2203_v35  ;;  %v4146_v62 = vld [vmem:[%s6729_s0 + $0xd0] sm:$0xff] }
 0x149   :  { %v698_v57 = vpop.f32.mrf.mxu0  ;;  %v903_v12 = vpop.f32.mrf.mxu1  ;;  %3566 = vmatprep.subr.mxu0 %v2218_v42  ;;  %v4150_v42 = vld [vmem:[%s6729_s0 + $0xf0] sm:$0xff] }
 0x14a   :  { %1610 = vmatmul.mubr.f32.gmra.mxu0 %v4790_v60  ;;  %v5362_v45 = vadd.f32 %v901_v63, %v697_v9  ;;  %v2190_v57 = vld [vmem:[%s6732_s4 + $0xe8] sm:$0xff]  ;;  %v2201_v12 = vld [vmem:[%s6732_s4 + $0x140] sm:$0xff] }
 0x14b   :  { %3975 = vmatmul.mubr.f32.gmra.mxu1 %v4144_v15  ;;  %1614 = vmatprep.mubr.f32.mxu0 %v4823_v7  ;;  %v701_v13 = vpop.f32.mrf.mxu0  ;;  %v906_v21 = vpop.f32.mrf.mxu1 }
 0x14c   :  { %3977 = vmatprep.mubr.f32.mxu1 %v4790_v60  ;;  %v702_v24 = vadd.f32 %v5165_v46, %v701_v13 }
 0x14d   :  { %v703_v16 = vpop.f32.mrf.mxu0  ;;  %v908_v34 = vpop.f32.mrf.mxu1 }
 0x14e   :  { %1615 = vmatmul.mubr.f32.gmra.mxu0 %v4810_v2  ;;  %v5377_v48 = vadd.f32 %v906_v21, %v702_v24  ;;  %v4147_v21 = vld [vmem:[%s6729_s0 + $0xd8] sm:$0xff]  ;;  %v2189_v34 = vld [vmem:[%s6732_s4 + $0xe0] sm:$0xff] }
 0x14f   :  { %3978 = vmatmul.mubr.f32.gmra.mxu1 %v4810_v2  ;;  %1619 = vmatprep.mubr.f32.mxu0 %v4836_v11  ;;  %v706_v60 = vpop.f32.mrf.mxu0  ;;  %v911_v4 = vpop.f32.mrf.mxu1 }
 0x150   :  { %6746 = vst [vmem:[#allocation10_spill] sm:$0xff] %v5377_v48  ;;  %3980 = vmatprep.mubr.f32.mxu1 %v4823_v7  ;;  %v707_v37 = vadd.f32 %v5165_v46, %v706_v60  ;;  %v2173_v60 = vld [vmem:[%s6732_s4 + $0x60] sm:$0xff] }
 0x151   :  { %v708_v1 = vpop.f32.mrf.mxu0  ;;  %v913_v40 = vpop.f32.mrf.mxu1 }
 0x152   :  { %1620 = vmatmul.mubr.f32.gmra.mxu0 %v4823_v7  ;;  %v5384_v41 = vadd.f32 %v911_v4, %v707_v37  ;;  %v2192_v7 = vld [vmem:[%s6732_s4 + $0xf8] sm:$0xff] }
 0x153   :  { %3981 = vmatmul.mubr.f32.gmra.mxu1 %v4836_v11  ;;  %1624 = vmatprep.mubr.f32.mxu0 %v4850_v14  ;;  %v711_v2 = vpop.f32.mrf.mxu0  ;;  %v916_v51 = vpop.f32.mrf.mxu1  ;;  %v2202_v11 = vld [vmem:[%s6732_s4 + $0x148] sm:$0xff]  ;;  %v2216_v4 = vld [vmem:[%s6732_s4 + $0x1b8] sm:$0xff] }
 0x154   :  { %3983 = vmatprep.mubr.f32.mxu1 %v4850_v14  ;;  %v712_v22 = vadd.f32 %v5165_v46, %v711_v2  ;;  %3492 = vmatprep.subr.mxu1 %v2192_v7  ;;  %v4145_v14 = vld [vmem:[%s6729_s0 + $0xc8] sm:$0xff]  ;;  %v2200_v40 = vld [vmem:[%s6732_s4 + $0x138] sm:$0xff]  ;;  %v4149_v2 = vld [vmem:[%s6729_s0 + $0xe0] sm:$0xff] }
 0x155   :  { %v713_v3 = vpop.f32.mrf.mxu0  ;;  %v918_v47 = vpop.f32.mrf.mxu1  ;;  %3567 = vmatpush3.msra.mxu0 %v2202_v11  ;;  %3493 = vmatpush3.msra.mxu1 %v2176_v39  ;;  %v2172_v11 = vld [vmem:[%s6732_s4 + $0x58] sm:$0xff] }
 0x156   :  { %1625 = vmatmul.mubr.f32.gmra.mxu0 %v4145_v14  ;;  %v5405_v25 = vadd.f32 %v916_v51, %v712_v22  ;;  %3494 = vmatprep.subr.mxu1 %v2191_v8  ;;  %v2187_v14 = vld [vmem:[%s6732_s4 + $0xd0] sm:$0xff] }
 0x157   :  { %3984 = vmatmul.mubr.f32.gmra.mxu1 %v4863_v17  ;;  %1629 = vmatprep.mubr.f32.mxu0 %v4863_v17  ;;  %v716_v52 = vpop.f32.mrf.mxu0  ;;  %v921_v53 = vpop.f32.mrf.mxu1  ;;  %v2217_v17 = vld [vmem:[%s6732_s4 + $0x1c0] sm:$0xff]  ;;  %v2171_v8 = vld [vmem:[%s6732_s4 + $0x50] sm:$0xff] }
 0x158   :  { %6747 = vst [vmem:[#allocation11_spill] sm:$0xff] %v5405_v25  ;;  %3986 = vmatprep.mubr.f32.mxu1 %v4876_v20  ;;  %v717_v54 = vadd.f32 %v5165_v46, %v716_v52  ;;  %3495 = vmatpush3.msra.mxu1 %v2175_v56 }
 0x159   :  { %v718_v43 = vpop.f32.mrf.mxu0  ;;  %v923_v59 = vpop.f32.mrf.mxu1  ;;  %3568 = vmatprep.subr.mxu0 %v2217_v17  ;;  %3496 = vmatprep.subr.mxu1 %v2190_v57  ;;  %v2199_v17 = vld [vmem:[%s6732_s4 + $0x130] sm:$0xff] }
 0x15a   :  { %1630 = vmatmul.mubr.f32.gmra.mxu0 %v4146_v62  ;;  %v5423_v63 = vadd.f32 %v921_v53, %v717_v54  ;;  %v2215_v43 = vld [vmem:[%s6732_s4 + $0x1b0] sm:$0xff]  ;;  %v2186_v59 = vld [vmem:[%s6732_s4 + $0xc8] sm:$0xff] }
 0x15b   :  { %3987 = vmatmul.mubr.f32.gmra.mxu1 %v4889_v23  ;;  %1634 = vmatprep.mubr.f32.mxu0 %v4876_v20  ;;  %v721_v30 = vpop.f32.mrf.mxu0  ;;  %v926_v9 = vpop.f32.mrf.mxu1  ;;  %v2174_v23 = vld [vmem:[%s6732_s4 + $0x68] sm:$0xff] }
 0x15c   :  { %3989 = vmatprep.mubr.f32.mxu1 %v4906_v28  ;;  %v722_v15 = vadd.f32 %v5165_v46, %v721_v30  ;;  %3569 = vmatpush3.msra.mxu0 %v2201_v12  ;;  %v4148_v28 = vld [vmem:[%s6729_s0 + $0xe8] sm:$0xff]  ;;  %s4154_s0 = smov 32  }
 0x15d   :  { %v723_v20 = vpop.f32.mrf.mxu0  ;;  %v928_v13 = vpop.f32.mrf.mxu1  ;;  %3497 = vmatpush3.msra.mxu1 %v2174_v23  ;;  %3570 = vmatprep.subr.mxu0 %v2216_v4 }
 0x15e   :  { %1635 = vmatmul.mubr.f32.gmra.mxu0 %v4147_v21  ;;  %v5441_v24 = vadd.f32 %v926_v9, %v722_v15  ;;  %3498 = vmatprep.subr.mxu1 %v2189_v34  ;;  %v2170_v9 = vld [vmem:[%s6732_s4 + $0x48] sm:$0xff] }
 0x15f   :  { %1639 = vmatprep.mubr.f32.mxu0 %v4148_v28  ;;  %3990 = vmatmul.mubr.f32.gmra.mxu1 %v5100_v31  ;;  %v726_v29 = vpop.f32.mrf.mxu0  ;;  %v931_v16 = vpop.f32.mrf.mxu1  ;;  %v2188_v31 = vld [vmem:[%s6732_s4 + $0xd8] sm:$0xff] }
 0x160   :  { %6748 = vst [vmem:[#allocation12_spill] sm:$0xff] %v5441_v24  ;;  %v727_v35 = vadd.f32 %v5165_v46, %v726_v29  ;;  %3499 = vmatpush3.msra.mxu1 %v2173_v60  ;;  %3571 = vmatpush3.msra.mxu0 %v2200_v40 }
 0x161   :  { %v728_v37 = vpop.f32.mrf.mxu0  ;;  %v933_v1 = vpop.f32.mrf.mxu1  ;;  %3500 = vmatprep.subr.mxu1 %v2188_v31  ;;  %3572 = vmatprep.subr.mxu0 %v2215_v43 }
 0x162   :  { %1640 = vmatmul.mubr.f32.gmra.mxu0 %v4149_v2  ;;  %v5466_v51 = vadd.f32 %v931_v16, %v727_v35  ;;  %3501 = vmatpush3.msra.mxu1 %v2172_v11 }
 0x163   :  { %1644 = vmatprep.mubr.f32.mxu0 %v4150_v42  ;;  %v731_v22 = vpop.f32.mrf.mxu0  ;;  %v936_v7 = vpop.f32.mrf.mxu1  ;;  %3502 = vmatprep.subr.mxu1 %v2187_v14  ;;  %v2214_v14 = vld [vmem:[%s6732_s4 + $0x1a8] sm:$0xff] }
 0x164   :  { %v732_v39 = vadd.f32 %v5165_v46, %v731_v22  ;;  %3503 = vmatpush3.msra.mxu1 %v2171_v8  ;;  %3573 = vmatpush3.msra.mxu0 %v2199_v17  ;;  %v2198_v8 = vld [vmem:[%s6732_s4 + $0x128] sm:$0xff] }
 0x165   :  { %v733_v3 = vpop.f32.mrf.mxu0  ;;  %v938_v47 = vpop.f32.mrf.mxu1  ;;  %3504 = vmatprep.subr.mxu1 %v2186_v59  ;;  %3574 = vmatprep.subr.mxu0 %v2214_v14  ;;  %v2182_v59 = vld [vmem:[%s6732_s4 + $0xa8] sm:$0xff] }
 0x166   :  { %1645 = vmatmul.mubr.f32.gmra.mxu0 %v4148_v28  ;;  %v5478_v52 = vadd.f32 %v936_v7, %v732_v39  ;;  %3505 = vmatpush3.msra.mxu1 %v2170_v9  ;;  %v2168_v39 = vld [vmem:[%s6732_s4 + $0x38] sm:$0xff]  ;;  %v2166_v17 = vld [vmem:[%s6732_s4 + $0x28] sm:$0xff] }
 0x167   :  { %v736_v53 = vpop.f32.mrf.mxu0  ;;  %v941_v54 = vpop.f32.mrf.mxu1  ;;  %3575 = vmatpush3.msra.mxu0 %v2198_v8 }
 0x168   :  { %v737_v56 = vadd.f32 %v5165_v46, %v736_v53  ;;  %v2183_v53 = vld [vmem:[%s6732_s4 + $0xb0] sm:$0xff] }
 0x169   :  { %v738_v62 = vpop.f32.mrf.mxu0  ;;  %v943_v30 = vpop.f32.mrf.mxu1 }
 0x16a   :  { %v5496_v57 = vadd.f32 %v941_v54, %v737_v56  ;;  %v2167_v56 = vld [vmem:[%s6732_s4 + $0x30] sm:$0xff]  ;;  %v2181_v30 = vld [vmem:[%s6732_s4 + $0xa0] sm:$0xff] }
 0x16b   :  { %v741_v12 = vpop.f32.mrf.mxu0  ;;  %v946_v15 = vpop.f32.mrf.mxu1 }
 0x16c   :  { %v742_v23 = vadd.f32 %v5165_v46, %v741_v12 }
 0x16d   :  { %v743_v20 = vpop.f32.mrf.mxu0  ;;  %v948_v13 = vpop.f32.mrf.mxu1 }
 0x16e   :  { %v5499_v21 = vadd.f32 %v946_v15, %v742_v23  ;;  %v2165_v15 = vld [vmem:[%s6732_s4 + $0x20] sm:$0xff]  ;;  %v2180_v20 = vld [vmem:[%s6732_s4 + $0x98] sm:$0xff] }
 0x16f   :  { %v746_v28 = vpop.f32.mrf.mxu0  ;;  %v951_v29 = vpop.f32.mrf.mxu1 }
 0x170   :  { %v747_v16 = vadd.f32 %v5165_v46, %v746_v28  ;;  %v2185_v46 = vld [vmem:[%s6732_s4 + $0xc0] sm:$0xff] }
 0x171   :  { %v748_v34 = vpop.f32.mrf.mxu0  ;;  %v953_v35 = vpop.f32.mrf.mxu1  ;;  %3506 = vmatprep.subr.mxu1 %v2185_v46  ;;  %v2213_v28 = vld [vmem:[%s6732_s4 + $0x1a0] sm:$0xff] }
 0x172   :  { %v5502_v60 = vadd.f32 %v951_v29, %v747_v16  ;;  %v2197_v29 = vld [vmem:[%s6732_s4 + $0x120] sm:$0xff]  ;;  %v2179_v16 = vld [vmem:[%s6732_s4 + $0x90] sm:$0xff]  ;;  %3576 = vmatprep.subr.mxu0 %v2213_v28 }
 0x173   :  { %v3878_v4 = vpop.f32.mrf.mxu0  ;;  %v5504_v37 = vpop.f32.mrf.mxu1  ;;  %v2163_v35 = vld [vmem:[%s6732_s4 + $0x10] sm:$0xff]  ;;  %3577 = vmatpush3.msra.mxu0 %v2197_v29  ;;  %v2193_v29 = vld [vmem:[%s6732_s4 + $0x100] sm:$0xff] }
 0x174   :  { %v5507_v1 = vadd.f32 %v3878_v4, %v5186_v10  ;;  %v2169_v10 = vld [vmem:[%s6732_s4 + $0x40] sm:$0xff] }
 0x175   :  { %v5509_v31 = vpop.f32.mrf.mxu0  ;;  %v1308_v40 = vpop.f32.mrf.mxu1  ;;  %3507 = vmatpush3.msra.mxu1 %v2169_v10  ;;  %v2162_v10 = vld [vmem:[%s6732_s4 + $0x8] sm:$0xff] }
 0x177   :  { %v3881_v2 = vpop.f32.mrf.mxu0 }
 0x178   :  { %v5512_v42 = vadd.f32 %v3881_v2, %v5200_v32  ;;  %v5514_v22 = vpop.f32.mrf.mxu1  ;;  %v2184_v32 = vld [vmem:[%s6732_s4 + $0xb8] sm:$0xff]  ;;  %v2178_v2 = vld [vmem:[%s6732_s4 + $0x88] sm:$0xff] }
 0x179   :  { %v5519_v7 = vpop.f32.mrf.mxu0  ;;  %3508 = vmatprep.subr.mxu1 %v2184_v32 }
 0x17a   :  { %v1313_v11 = vpop.f32.mrf.mxu1  ;;  %3509 = vmatpush3.msra.mxu1 %v2168_v39  ;;  %v2212_v39 = vld [vmem:[%s6732_s4 + $0x198] sm:$0xff] }
 0x17b   :  { %3510 = vmatprep.subr.mxu1 %v2183_v53  ;;  %3578 = vmatprep.subr.mxu0 %v2212_v39 }
 0x17c   :  { %v3884_v3 = vpop.f32.mrf.mxu0  ;;  %v5530_v47 = vpop.f32.mrf.mxu1  ;;  %3511 = vmatpush3.msra.mxu1 %v2167_v56  ;;  %v2196_v56 = vld [vmem:[%s6732_s4 + $0x118] sm:$0xff] }
 0x17d   :  { %v5539_v54 = vadd.f32 %v3884_v3, %v5214_v44  ;;  %3512 = vmatprep.subr.mxu1 %v2182_v59  ;;  %v2161_v3 = vld [vmem:[%s6732_s4] sm:$0xff]  ;;  %3579 = vmatpush3.msra.mxu0 %v2196_v56  ;;  %v2211_v59 = vld [vmem:[%s6732_s4 + $0x190] sm:$0xff] }
 0x17e   :  { %v5575_v44 = vpop.f32.mrf.mxu0  ;;  %v1318_v43 = vpop.f32.mrf.mxu1  ;;  %3513 = vmatpush3.msra.mxu1 %v2166_v17  ;;  %3580 = vmatprep.subr.mxu0 %v2211_v59 }
 0x17f   :  { %3514 = vmatprep.subr.mxu1 %v2181_v30 }
 0x180   :  { %v3887_v62 = vpop.f32.mrf.mxu0  ;;  %3515 = vmatpush3.msra.mxu1 %v2165_v15 }
 0x181   :  { %v5587_v9 = vadd.f32 %v3887_v62, %v5228_v58  ;;  %v5589_v12 = vpop.f32.mrf.mxu1  ;;  %3516 = vmatprep.subr.mxu1 %v2180_v20  ;;  %v2164_v58 = vld [vmem:[%s6732_s4 + $0x18] sm:$0xff]  ;;  %v2210_v62 = vld [vmem:[%s6732_s4 + $0x188] sm:$0xff] }
 0x182   :  { %v5594_v23 = vpop.f32.mrf.mxu0  ;;  %3517 = vmatpush3.msra.mxu1 %v2164_v58  ;;  %v2194_v20 = vld [vmem:[%s6732_s4 + $0x108] sm:$0xff]  ;;  %v2209_v58 = vld [vmem:[%s6732_s4 + $0x180] sm:$0xff] }
 0x183   :  { %v1323_v13 = vpop.f32.mrf.mxu1  ;;  %3518 = vmatprep.subr.mxu1 %v2179_v16 }
 0x184   :  { %3519 = vmatpush3.msra.mxu1 %v2163_v35 }
 0x185   :  { %v3890_v34 = vpop.f32.mrf.mxu0  ;;  %3520 = vmatprep.subr.mxu1 %v2178_v2 }
 0x186   :  { %v5615_v4 = vadd.f32 %v3890_v34, %v5250_v26  ;;  %v5617_v40 = vpop.f32.mrf.mxu1  ;;  %3521 = vmatpush3.msra.mxu1 %v2162_v10  ;;  %v2177_v26 = vld [vmem:[%s6732_s4 + $0x80] sm:$0xff] }
 0x187   :  { %v5622_v46 = vpop.f32.mrf.mxu0  ;;  %3522 = vmatprep.subr.mxu1 %v2177_v26 }
 0x188   :  { %v1328_v11 = vpop.f32.mrf.mxu1  ;;  %3523 = vmatpush3.msra.mxu1 %v2161_v3 }
 0x189   :  { %v3893_v32 = vpop.f32.mrf.mxu0 }
 0x18a   :  { %v5637_v14 = vadd.f32 %v3893_v32, %v5278_v49  ;;  %v5639_v53 = vpop.f32.mrf.mxu1  ;;  %v2195_v49 = vld [vmem:[%s6732_s4 + $0x110] sm:$0xff] }
 0x18b   :  { %v5641_v8 = vpop.f32.mrf.mxu0  ;;  %3581 = vmatpush3.msra.mxu0 %v2195_v49 }
 0x18c   :  { %v1333_v43 = vpop.f32.mrf.mxu1  ;;  %3582 = vmatprep.subr.mxu0 %v2210_v62 }
 0x18d   :  { %3583 = vmatpush3.msra.mxu0 %v2194_v20 }
 0x18e   :  { %v3896_v17 = vpop.f32.mrf.mxu0  ;;  %3584 = vmatprep.subr.mxu0 %v2209_v58 }
 0x18f   :  { %v5656_v30 = vadd.f32 %v3896_v17, %v5306_v33  ;;  %v5658_v15 = vpop.f32.mrf.mxu1  ;;  %v5671_v33 = vld [vmem:[%s6732_s4 + $0x278] sm:$0xff]  ;;  %3585 = vmatpush3.msra.mxu0 %v2193_v29 }
 0x190   :  { %v5663_v13 = vpop.f32.mrf.mxu0  ;;  %6749 = vst [vmem:[#allocation13_spill] sm:$0xff] %v5671_v33  ;;  %3992 = vmatprep.subr.mxu1 %v5671_v33  ;;  %v2624_v17 = vld [vmem:[%s6733_s5 + $0xf8] sm:$0xff] }
 0x191   :  { %v1338_v28 = vpop.f32.mrf.mxu1  ;;  %3642 = vmatprep.subr.mxu0 %v2624_v17 }
 0x192   :  { %v3899_v16 = vpop.f32.mrf.mxu0 }
 0x193   :  { %v5678_v34 = vadd.f32 %v3899_v16, %v5334_v5  ;;  %v5680_v35 = vpop.f32.mrf.mxu1 }
 0x194   :  { %v5682_v2 = vpop.f32.mrf.mxu0 }
 0x195   :  { %6750 = vst [vmem:[#allocation14_spill] sm:$0xff] %v5678_v34  ;;  %6751 = vst [vmem:[#allocation15_spill] sm:$0xff] %v5682_v2  ;;  %v1343_v10 = vpop.f32.mrf.mxu1  ;;  %v1022_v2 = vadd.f32 %v5509_v31, %v5179_v55  ;;  %v1032_v31 = vadd.f32 %v5519_v7, %v5193_v19 }
 0x197   :  { %v3902_v11 = vpop.f32.mrf.mxu0 }
 0x198   :  { %v5685_v26 = vadd.f32 %v3902_v11, %v5362_v45  ;;  %v5687_v32 = vpop.f32.mrf.mxu1 }
 0x199   :  { %v5689_v39 = vpop.f32.mrf.mxu0 }
 0x19a   :  { %6752 = vst [vmem:[#allocation16_spill] sm:$0xff] %v5685_v26  ;;  %6753 = vst [vmem:[#allocation17_spill] sm:$0xff] %v5689_v39  ;;  %v1348_v3 = vpop.f32.mrf.mxu1 }
 0x19c   :  { %v3905_v56 = vpop.f32.mrf.mxu0  ;;  %v5691_v43 = vpop.f32.mrf.mxu1 }
 0x19d   :  { %v5694_v5 = vadd.f32 %v3905_v56, %v5384_v41 }
 0x19e   :  { %v5696_v59 = vpop.f32.mrf.mxu0  ;;  %v1353_v49 = vpop.f32.mrf.mxu1 }
 0x19f   :  { %6754 = vst [vmem:[#allocation18_spill] sm:$0xff] %v5694_v5  ;;  %6755 = vst [vmem:[#allocation19_spill] sm:$0xff] %v5696_v59 }
 0x1a0   :  { %v3908_v45 = vpop.f32.mrf.mxu0 }
 0x1a1   :  { %v5702_v62 = vadd.f32 %v3908_v45, %v5423_v63  ;;  %v5704_v20 = vpop.f32.mrf.mxu1 }
 0x1a2   :  { %v5706_v58 = vpop.f32.mrf.mxu0 }
 0x1a3   :  { %6756 = vst [vmem:[#allocation20_spill] sm:$0xff] %v5702_v62  ;;  %6757 = vst [vmem:[#allocation21_spill] sm:$0xff] %v5706_v58  ;;  %v1358_v28 = vpop.f32.mrf.mxu1 }
 0x1a5   :  { %v3911_v29 = vpop.f32.mrf.mxu0 }
 0x1a6   :  { %v5709_v41 = vadd.f32 %v3911_v29, %v5466_v51  ;;  %v5711_v16 = vpop.f32.mrf.mxu1 }
 0x1a7   :  { %v5713_v10 = vpop.f32.mrf.mxu0 }
 0x1a8   :  { %6758 = vst [vmem:[#allocation22_spill] sm:$0xff] %v5709_v41  ;;  %6759 = vst [vmem:[#allocation23_spill] sm:$0xff] %v5713_v10  ;;  %v1363_v11 = vpop.f32.mrf.mxu1 }
 0x1a9   :  { %v3914_v3 = vpop.f32.mrf.mxu0 }
 0x1aa   :  { %v5716_v56 = vadd.f32 %v3914_v3, %v5496_v57  ;;  %v5718_v63 = vpop.f32.mrf.mxu1 }
 0x1ab   :  { %v1141_v49 = vpop.f32.mrf.mxu0 }
 0x1ac   :  { %6760 = vst [vmem:[#allocation24_spill] sm:$0xff] %v5716_v56  ;;  %v5721_v17 = vadd.f32 %v1141_v49, %v5478_v52  ;;  %v1368_v45 = vpop.f32.mrf.mxu1 }
 0x1ae   :  { %6761 = vst [vmem:[#allocation25_spill] sm:$0xff] %v5721_v17  ;;  %v3917_v28 = vpop.f32.mrf.mxu0 }
 0x1af   :  { %v5724_v51 = vadd.f32 %v3917_v28, %v5502_v60  ;;  %v5726_v29 = vpop.f32.mrf.mxu1 }
 0x1b0   :  { %v1151_v0 = vpop.f32.mrf.mxu0 }
 0x1b1   :  { %6762 = vst [vmem:[#allocation26_spill] sm:$0xff] %v5724_v51  ;;  %v5729_v11 = vadd.f32 %v1151_v0, %v5499_v21  ;;  %v1373_v41 = vpop.f32.mrf.mxu1 }
 0x1b3   :  { %6763 = vst [vmem:[#allocation27_spill] sm:$0xff] %v5729_v11  ;;  %v5731_v57 = vpop.f32.mrf.mxu1 }
 0x1b5   :  { %v1378_v3 = vpop.f32.mrf.mxu1 }
 0x1b7   :  { %v5733_v56 = vpop.f32.mrf.mxu1 }
 0x1b9   :  { %v1383_v10 = vpop.f32.mrf.mxu1 }
 0x1ba   :  { %v1511_v52 = vpop.f32.mrf.mxu0 }
 0x1bb   :  { %v5735_v49 = vpop.f32.mrf.mxu1 }
 0x1bc   :  { %6764 = vst [vmem:[#allocation28_spill] sm:$0xff] %v5735_v49  ;;  %v1513_v45 = vpop.f32.mrf.mxu0 }
 0x1bd   :  { %v1388_v17 = vpop.f32.mrf.mxu1 }
 0x1be   :  { %v1516_v60 = vpop.f32.mrf.mxu0 }
 0x1bf   :  { %v5737_v28 = vpop.f32.mrf.mxu1 }
 0x1c0   :  { %v1518_v51 = vpop.f32.mrf.mxu0 }
 0x1c1   :  { %v1393_v24 = vpop.f32.mrf.mxu1 }
 0x1c2   :  { %v1521_v62 = vpop.f32.mrf.mxu0 }
 0x1c3   :  { %v5739_v0 = vpop.f32.mrf.mxu1 }
 0x1c4   :  { %6765 = vst [vmem:[#allocation29_spill] sm:$0xff] %v5739_v0  ;;  %v1523_v21 = vpop.f32.mrf.mxu0 }
 0x1c5   :  { %v1398_v41 = vpop.f32.mrf.mxu1 }
 0x1c6   :  { %v1526_v11 = vpop.f32.mrf.mxu0 }
 0x1c7   :  { %v5741_v3 = vpop.f32.mrf.mxu1 }
 0x1c8   :  { %6766 = vst [vmem:[#allocation30_spill] sm:$0xff] %v5741_v3  ;;  %v1528_v58 = vpop.f32.mrf.mxu0 }
 0x1c9   :  { %v1403_v10 = vpop.f32.mrf.mxu1 }
 0x1ca   :  { %v5743_v25 = vpop.f32.mrf.mxu0 }
 0x1cb   :  { %v5745_v5 = vpop.f32.mrf.mxu1 }
 0x1cc   :  { %6767 = vst [vmem:[#allocation31_spill] sm:$0xff] %v5745_v5  ;;  %v1533_v17 = vpop.f32.mrf.mxu0 }
 0x1cd   :  { %v1408_v45 = vpop.f32.mrf.mxu1 }
 0x1ce   :  { %v1536_v59 = vpop.f32.mrf.mxu0 }
 0x1cf   :  { %v5747_v48 = vpop.f32.mrf.mxu1 }
 0x1d0   :  { %6768 = vst [vmem:[#allocation32_spill] sm:$0xff] %v5747_v48  ;;  %v1538_v24 = vpop.f32.mrf.mxu0 }
 0x1d1   :  { %v1413_v51 = vpop.f32.mrf.mxu1 }
 0x1d2   :  { %v5749_v26 = vpop.f32.mrf.mxu0 }
 0x1d3   :  { %v5751_v21 = vpop.f32.mrf.mxu1 }
 0x1d4   :  { %6769 = vst [vmem:[#allocation33_spill] sm:$0xff] %v5751_v21  ;;  %v1543_v41 = vpop.f32.mrf.mxu0 }
 0x1d5   :  { %v1418_v0 = vpop.f32.mrf.mxu1 }
 0x1d6   :  { %v5753_v39 = vpop.f32.mrf.mxu0 }
 0x1d7   :  { %v5755_v58 = vpop.f32.mrf.mxu1 }
 0x1d8   :  { %6770 = vst [vmem:[#allocation34_spill] sm:$0xff] %v5755_v58  ;;  %v1548_v10 = vpop.f32.mrf.mxu0 }
 0x1d9   :  { %v1423_v27 = vpop.f32.mrf.mxu1 }
 0x1da   :  { %v5757_v5 = vpop.f32.mrf.mxu0 }
 0x1db   :  { %v5759_v17 = vpop.f32.mrf.mxu1 }
 0x1dc   :  { %6771 = vst [vmem:[#allocation35_spill] sm:$0xff] %v5759_v17  ;;  %v1553_v45 = vpop.f32.mrf.mxu0 }
 0x1dd   :  { %v1428_v48 = vpop.f32.mrf.mxu1 }
 0x1de   :  { %v5761_v24 = vpop.f32.mrf.mxu0  ;;  %v5776_v48 = vld [vmem:[%s6731_s3] ss:$0 sm:$0xff] }
 0x1df   :  { %v5763_v51 = vpop.f32.mrf.mxu1  ;;  %v1312_v45 = vadd.f32 %v5776_v48, %v5514_v22  ;;  %v1317_v22 = vadd.f32 %v5776_v48, %v5530_v47  ;;  %v1327_v47 = vadd.f32 %v5776_v48, %v5617_v40 }
 0x1e0   :  { %6772 = vst [vmem:[#allocation36_spill] sm:$0xff] %v5763_v51  ;;  %v1558_v33 = vpop.f32.mrf.mxu0  ;;  %v1307_v51 = vadd.f32 %v5776_v48, %v5504_v37 }
 0x1e1   :  { %v1433_v21 = vpop.f32.mrf.mxu1 }
 0x1e2   :  { %v5765_v41 = vpop.f32.mrf.mxu0  ;;  %v1512_v17 = vadd.f32 %v1511_v52, %v1307_v51  ;;  %v1522_v52 = vadd.f32 %v1521_v62, %v1317_v22 }
 0x1e3   :  { %v5767_v0 = vpop.f32.mrf.mxu1 }
 0x1e4   :  { %6773 = vst [vmem:[#allocation37_spill] sm:$0xff] %v5767_v0  ;;  %v1563_v3 = vpop.f32.mrf.mxu0  ;;  %v1517_v0 = vadd.f32 %v1516_v60, %v1312_v45 }
 0x1e5   :  { %v1438_v58 = vpop.f32.mrf.mxu1 }
 0x1e6   :  { %v5769_v10 = vpop.f32.mrf.mxu0 }
 0x1e7   :  { %v5771_v27 = vpop.f32.mrf.mxu1 }
 0x1e8   :  { %6774 = vst [vmem:[#allocation38_spill] sm:$0xff] %v5771_v27  ;;  %v1568_v33 = vpop.f32.mrf.mxu0  ;;  %v1322_v27 = vadd.f32 %v5776_v48, %v5589_v12 }
 0x1e9   :  { %v1443_v21 = vpop.f32.mrf.mxu1 }
 0x1ea   :  { %v5782_v3 = vpop.f32.mrf.mxu0  ;;  %v1527_v33 = vadd.f32 %v1526_v11, %v1322_v27  ;;  %v1332_v21 = vadd.f32 %v5776_v48, %v5639_v53  ;;  %v1532_v27 = vadd.f32 %v5743_v25, %v1327_v47  ;;  %v1362_v47 = vadd.f32 %v5776_v48, %v5711_v16 }
 0x1eb   :  { %v3952_v58 = vpop.f32.mrf.mxu1 }
 0x1ec   :  { %v1722_v34 = vadd.f32 %v3952_v58, %v1517_v0  ;;  %v1573_v49 = vpop.f32.mrf.mxu0  ;;  %v1042_v58 = vadd.f32 %v5575_v44, %v5207_v38  ;;  %v1567_v16 = vadd.f32 %v5769_v10, %v1362_v47 }
 0x1ed   :  { %v1716_v36 = vpop.f32.mrf.mxu1 }
 0x1ee   :  { %v1856_v37 = vmax.f32 %v5507_v1, %v1722_v34  ;;  %v1717_v60 = vadd.f32 %v1716_v36, %v1512_v17  ;;  %v5791_v45 = vpop.f32.mrf.mxu0  ;;  %v1537_v36 = vadd.f32 %v1536_v59, %v1332_v21  ;;  %v1352_v21 = vadd.f32 %v5776_v48, %v5691_v43 }
 0x1ef   :  { %v3955_v12 = vpop.f32.mrf.mxu1 }
 0x1f0   :  { %v1884_v49 = vmax.f32 %v1856_v37, 0.0  ;;  %v1855_v51 = vmax.f32 %v1022_v2, %v1717_v60  ;;  %v1732_v0 = vadd.f32 %v3955_v12, %v1527_v33  ;;  %v1578_v55 = vpop.f32.mrf.mxu0  ;;  %v1342_v2 = vadd.f32 %v5776_v48, %v5680_v35 }
 0x1f1   :  { %v1726_v1 = vpop.f32.mrf.mxu1 }
 0x1f2   :  { %1913 = vst.msk [vmem:[#allocation3 + $0x8] sm:$0xff] %vm1911_vm1, %v1884_v49  ;;  %v1883_v34 = vmax.f32 %v1855_v51, 0.0  ;;  %v1858_v53 = vmax.f32 %v5512_v42, %v1732_v0  ;;  %v1727_v11 = vadd.f32 %v1726_v1, %v1522_v52  ;;  %v5801_v17 = vpop.f32.mrf.mxu0  ;;  %v1337_v42 = vadd.f32 %v5776_v48, %v5658_v15 }
 0x1f3   :  { %v3958_v62 = vpop.f32.mrf.mxu1  ;;  %v1547_v33 = vadd.f32 %v5753_v39, %v1342_v2  ;;  %v1052_v49 = vadd.f32 %v5594_v23, %v5221_v50  ;;  %v1557_v0 = vadd.f32 %v5761_v24, %v1352_v21  ;;  %v1357_v2 = vadd.f32 %v5776_v48, %v5704_v20 }
 0x1f4   :  { %1912 = vst.msk [vmem:[#allocation3] sm:$0xff] %vm1911_vm1, %v1883_v34  ;;  %v1886_v19 = vmax.f32 %v1858_v53, 0.0  ;;  %v1857_v7 = vmax.f32 %v1032_v31, %v1727_v11  ;;  %v1742_v40 = vadd.f32 %v3958_v62, %v1537_v36  ;;  %v1583_v59 = vpop.f32.mrf.mxu0  ;;  %v1542_v38 = vadd.f32 %v5749_v26, %v1337_v42 }
 0x1f5   :  { %v1736_v22 = vpop.f32.mrf.mxu1 }
 0x1f6   :  { %1915 = vst.msk [vmem:[#allocation3 + $0x18] sm:$0xff] %vm1911_vm1, %v1886_v19  ;;  %v1885_v35 = vmax.f32 %v1857_v7, 0.0  ;;  %v1860_v25 = vmax.f32 %v5539_v54, %v1742_v40  ;;  %v1737_v37 = vadd.f32 %v1736_v22, %v1532_v27  ;;  %v5814_v60 = vpop.f32.mrf.mxu0  ;;  %v1347_v54 = vadd.f32 %v5776_v48, %v5687_v32 }
 0x1f7   :  { %v3961_v12 = vpop.f32.mrf.mxu1  ;;  %v1372_v40 = vadd.f32 %v5776_v48, %v5726_v29 }
 0x1f8   :  { %1914 = vst.msk [vmem:[#allocation3 + $0x10] sm:$0xff] %vm1911_vm1, %v1885_v35  ;;  %v1888_v44 = vmax.f32 %v1860_v25, 0.0  ;;  %v1859_v15 = vmax.f32 %v1042_v58, %v1737_v37  ;;  %v1752_v52 = vadd.f32 %v3961_v12, %v1547_v33  ;;  %v1588_v39 = vpop.f32.mrf.mxu0  ;;  %v1552_v1 = vadd.f32 %v5757_v5, %v1347_v54 }
 0x1f9   :  { %v1746_v51 = vpop.f32.mrf.mxu1  ;;  %v1956_v50 = vld [vmem:[#allocation3 + $0x8] sm:$0xff]  ;;  %v1367_v35 = vadd.f32 %v5776_v48, %v5718_v63  ;;  %v1577_v29 = vadd.f32 %v5791_v45, %v1372_v40  ;;  %v1377_v54 = vadd.f32 %v5776_v48, %v5731_v57  ;;  %v6779_v40 = vld [vmem:[#allocation30_spill] sm:$0xff] }
 0x1fa   :  { %1917 = vst.msk [vmem:[#allocation3 + $0x28] sm:$0xff] %vm1911_vm1, %v1888_v44  ;;  %v1887_v43 = vmax.f32 %v1859_v15, 0.0  ;;  %v1862_v26 = vmax.f32 %v5587_v9, %v1752_v52  ;;  %v1747_v55 = vadd.f32 %v1746_v51, %v1542_v38  ;;  %v5827_v31 = vpop.f32.mrf.mxu0  ;;  %v1062_v9 = vadd.f32 %v5622_v46, %v5235_v6 }
 0x1fb   :  { %v1955_v23 = vld [vmem:[#allocation3] sm:$0xff]  ;;  %v3964_v36 = vpop.f32.mrf.mxu1  ;;  %v1562_v6 = vadd.f32 %v5765_v41, %v1357_v2  ;;  %v1382_v38 = vadd.f32 %v5776_v48, %v5733_v56  ;;  %v6778_v2 = vld [vmem:[#allocation14_spill] sm:$0xff] }
 0x1fc   :  { %v1957_v32 = vmax.f32 %v1955_v23, %v1956_v50  ;;  %1916 = vst.msk [vmem:[#allocation3 + $0x20] sm:$0xff] %vm1911_vm1, %v1887_v43  ;;  %v1890_v24 = vmax.f32 %v1862_v26, 0.0  ;;  %v1861_v34 = vmax.f32 %v1052_v49, %v1747_v55  ;;  %v1762_v53 = vadd.f32 %v3964_v36, %v1557_v0  ;;  %v1593_v11 = vpop.f32.mrf.mxu0 }
 0x1fd   :  { %v1756_v62 = vpop.f32.mrf.mxu1  ;;  %v1960_v46 = vld [vmem:[#allocation3 + $0x18] sm:$0xff]  ;;  %v1082_v49 = vadd.f32 %v5663_v13, %v5292_v61  ;;  %v1587_v56 = vadd.f32 %v5814_v60, %v1382_v38  ;;  %v1392_v55 = vadd.f32 %v5776_v48, %v5737_v28  ;;  %v1582_v61 = vadd.f32 %v5801_v17, %v1377_v54 }
 0x1fe   :  { %1919 = vst.msk [vmem:[#allocation3 + $0x38] sm:$0xff] %vm1911_vm1, %v1890_v24  ;;  %v1889_v5 = vmax.f32 %v1861_v34, 0.0  ;;  %v1864_v27 = vmax.f32 %v5615_v4, %v1762_v53  ;;  %v1757_v19 = vadd.f32 %v1756_v62, %v1552_v1  ;;  %v1596_v7 = vpop.f32.mrf.mxu0  ;;  %1958 = vst.msk [vmem:[#allocation4] sm:$0xff] %vm1911_vm1, %v1957_v32  ;;  %v1072_v4 = vadd.f32 %v5641_v8, %v5261_v18  ;;  %v6776_v32 = vld [vmem:[#allocation15_spill] sm:$0xff]  ;;  %v6777_v34 = vld [vmem:[#allocation28_spill] sm:$0xff] }
 0x1ff   :  { %v1959_v59 = vld [vmem:[#allocation3 + $0x10] sm:$0xff]  ;;  %v3967_v20 = vpop.f32.mrf.mxu1  ;;  %v1572_v18 = vadd.f32 %v5782_v3, %v1367_v35  ;;  %v1387_v53 = vadd.f32 %v5776_v48, %v6777_v34  ;;  %v1597_v17 = vadd.f32 %v1596_v7, %v1392_v55  ;;  %v1402_v7 = vadd.f32 %v5776_v48, %v6779_v40  ;;  %v2238_v35 = vld [vmem:[%s6732_s4 + $0x268] sm:$0xff] }
 0x200   :  { %v1961_v58 = vmax.f32 %v1959_v59, %v1960_v46  ;;  %1918 = vst.msk [vmem:[#allocation3 + $0x30] sm:$0xff] %vm1911_vm1, %v1889_v5  ;;  %v1892_v10 = vmax.f32 %v1864_v27, 0.0  ;;  %v1863_v42 = vmax.f32 %v1062_v9, %v1757_v19  ;;  %v1772_v22 = vadd.f32 %v3967_v20, %v1567_v16  ;;  %v1598_v33 = vpop.f32.mrf.mxu0  ;;  %v2239_v19 = vld [vmem:[%s6732_s4 + $0x270] sm:$0xff] }
 0x201   :  { %v1766_v25 = vpop.f32.mrf.mxu1  ;;  %v1964_v8 = vld [vmem:[#allocation3 + $0x28] sm:$0xff] }
 0x202   :  { %1921 = vst.msk [vmem:[#allocation3 + $0x48] sm:$0xff] %vm1911_vm1, %v1892_v10  ;;  %v1891_v41 = vmax.f32 %v1863_v42, 0.0  ;;  %v1866_v37 = vmax.f32 %v5637_v14, %v1772_v22  ;;  %v1767_v21 = vadd.f32 %v1766_v25, %v1562_v6  ;;  %v5852_v12 = vpop.f32.mrf.mxu0  ;;  %1962 = vst.msk [vmem:[#allocation4 + $0x8] sm:$0xff] %vm1911_vm1, %v1961_v58  ;;  %v1592_v6 = vadd.f32 %v5827_v31, %v1387_v53  ;;  %v6781_v25 = vld [vmem:[#allocation9_spill] sm:$0xff]  ;;  %v2236_v53 = vld [vmem:[%s6732_s4 + $0x258] sm:$0xff] }
 0x203   :  { %v1963_v63 = vld [vmem:[#allocation3 + $0x20] sm:$0xff]  ;;  %v3970_v44 = vpop.f32.mrf.mxu1  ;;  %v6782_v31 = vld [vmem:[#allocation17_spill] sm:$0xff] }
 0x204   :  { %v1965_v15 = vmax.f32 %v1963_v63, %v1964_v8  ;;  %1920 = vst.msk [vmem:[#allocation3 + $0x40] sm:$0xff] %vm1911_vm1, %v1891_v41  ;;  %v1894_v45 = vmax.f32 %v1866_v37, 0.0  ;;  %v1865_v52 = vmax.f32 %v1072_v4, %v1767_v21  ;;  %v1782_v39 = vadd.f32 %v3970_v44, %v1577_v29  ;;  %v1603_v14 = vpop.f32.mrf.mxu0  ;;  %v6780_v4 = vld [vmem:[#allocation13_spill] sm:$0xff]  ;;  %v6784_v63 = vld [vmem:[#allocation16_spill] sm:$0xff] }
 0x205   :  { %v1776_v51 = vpop.f32.mrf.mxu1  ;;  %v1968_v13 = vld [vmem:[#allocation3 + $0x38] sm:$0xff]  ;;  %v5883_v27 = vld [vmem:[#allocation4] sm:$0xff]  ;;  %v1102_v29 = vadd.f32 %v6782_v31, %v6781_v25  ;;  %v6783_v41 = vld [vmem:[#allocation29_spill] sm:$0xff] }
 0x206   :  { %1923 = vst.msk [vmem:[#allocation3 + $0x58] sm:$0xff] %vm1911_vm1, %v1894_v45  ;;  %v1893_v3 = vmax.f32 %v1865_v52, 0.0  ;;  %v1868_v0 = vmax.f32 %v5656_v30, %v1782_v39  ;;  %v1777_v43 = vadd.f32 %v1776_v51, %v1572_v18  ;;  %v1606_v26 = vpop.f32.mrf.mxu0  ;;  %1966 = vst.msk [vmem:[#allocation4 + $0x10] sm:$0xff] %vm1911_vm1, %v1965_v15  ;;  %v6775_v30 = vld [vmem:[#allocation8_spill] sm:$0xff]  ;;  %v1397_v37 = vadd.f32 %v5776_v48, %v6783_v41 }
 0x207   :  { %v1967_v47 = vld [vmem:[#allocation3 + $0x30] sm:$0xff]  ;;  %v3973_v57 = vpop.f32.mrf.mxu1  ;;  %v1092_v24 = vadd.f32 %v6776_v32, %v6775_v30  ;;  %v1607_v18 = vadd.f32 %v1606_v26, %v1402_v7  ;;  %v2237_v52 = vld [vmem:[%s6732_s4 + $0x260] sm:$0xff] }
 0x208   :  { %v1969_v1 = vmax.f32 %v1967_v47, %v1968_v13  ;;  %1922 = vst.msk [vmem:[#allocation3 + $0x50] sm:$0xff] %vm1911_vm1, %v1893_v3  ;;  %v1896_v60 = vmax.f32 %v1868_v0, 0.0  ;;  %v1867_v50 = vmax.f32 %v1082_v49, %v1777_v43  ;;  %v1792_v23 = vadd.f32 %v3973_v57, %v1587_v56  ;;  %v1608_v36 = vpop.f32.mrf.mxu0  ;;  %v6785_v39 = vld [vmem:[#allocation32_spill] sm:$0xff]  ;;  %v6787_v13 = vld [vmem:[#allocation19_spill] sm:$0xff]  ;;  %v6789_v30 = vld [vmem:[#allocation18_spill] sm:$0xff] }
 0x209   :  { %v1786_v11 = vpop.f32.mrf.mxu1  ;;  %v5875_v28 = vld [vmem:[#allocation4 + $0x8] sm:$0xff]  ;;  %v1412_v14 = vadd.f32 %v5776_v48, %v6785_v39  ;;  %v1602_v51 = vadd.f32 %v5852_v12, %v1397_v37  ;;  %v6788_v57 = vld [vmem:[#allocation31_spill] sm:$0xff]  ;;  %v6794_v25 = vld [vmem:[#allocation20_spill] sm:$0xff] }
 0x20a   :  { %1925 = vst.msk [vmem:[#allocation3 + $0x68] sm:$0xff] %vm1911_vm1, %v1896_v60  ;;  %v1895_v9 = vmax.f32 %v1867_v50, 0.0  ;;  %v1870_v62 = vmax.f32 %v6778_v2, %v1792_v23  ;;  %v1787_v16 = vadd.f32 %v1786_v11, %v1582_v61  ;;  %v5879_v5 = vpop.f32.mrf.mxu0  ;;  %2312 = vmatprep.mubr.f32.mxu1 %v5875_v28  ;;  %1970 = vst.msk [vmem:[#allocation4 + $0x18] sm:$0xff] %vm1911_vm1, %v1969_v1  ;;  %v1972_v46 = vld [vmem:[#allocation3 + $0x48] sm:$0xff]  ;;  %v6786_v61 = vld [vmem:[#allocation10_spill] sm:$0xff] }
 0x20b   :  { %v1971_v59 = vld [vmem:[#allocation3 + $0x40] sm:$0xff]  ;;  %v3976_v20 = vpop.f32.mrf.mxu1  ;;  %2313 = vmatmul.mubr.f32.vlgmr.msra.gmra.mxu1 %v5883_v27  ;;  %v1112_v47 = vadd.f32 %v6787_v13, %v6786_v61  ;;  %v1407_v1 = vadd.f32 %v5776_v48, %v6788_v57  ;;  %v2608_v50 = vld [vmem:[%s6733_s5 + $0x78] sm:$0xff]  ;;  %v2623_v11 = vld [vmem:[%s6733_s5 + $0xf0] sm:$0xff] }
 0x20c   :  { %v1973_v58 = vmax.f32 %v1971_v59, %v1972_v46  ;;  %1924 = vst.msk [vmem:[#allocation3 + $0x60] sm:$0xff] %vm1911_vm1, %v1895_v9  ;;  %v1898_v10 = vmax.f32 %v1870_v62, 0.0  ;;  %v1869_v42 = vmax.f32 %v1092_v24, %v1787_v16  ;;  %v1802_v22 = vadd.f32 %v3976_v20, %v1597_v17  ;;  %v1613_v33 = vpop.f32.mrf.mxu0  ;;  %3993 = vmatpush3.msra.mxu1 %v6780_v4  ;;  %v6790_v46 = vld [vmem:[#allocation11_spill] sm:$0xff]  ;;  %v6791_v59 = vld [vmem:[#allocation21_spill] sm:$0xff]  ;;  %v2607_v37 = vld [vmem:[%s6733_s5 + $0x70] sm:$0xff] }
 0x20d   :  { %v1796_v21 = vpop.f32.mrf.mxu1  ;;  %v5901_v38 = vld [vmem:[#allocation4 + $0x10] sm:$0xff]  ;;  %3994 = vmatprep.subr.mxu1 %v2239_v19  ;;  %v1976_v49 = vld [vmem:[#allocation3 + $0x58] sm:$0xff]  ;;  %v1612_v2 = vadd.f32 %v5879_v5, %v1407_v1  ;;  %v1122_v20 = vadd.f32 %v6791_v59, %v6790_v46  ;;  %v6793_v33 = vld [vmem:[#allocation33_spill] sm:$0xff] }
 0x20e   :  { %1927 = vst.msk [vmem:[#allocation3 + $0x78] sm:$0xff] %vm1911_vm1, %v1898_v10  ;;  %v1897_v8 = vmax.f32 %v1869_v42, 0.0  ;;  %1974 = vst.msk [vmem:[#allocation4 + $0x20] sm:$0xff] %vm1911_vm1, %v1973_v58  ;;  %v1872_v44 = vmax.f32 %v6784_v63, %v1802_v22  ;;  %v1797_v15 = vadd.f32 %v1796_v21, %v1592_v6  ;;  %v1616_v45 = vpop.f32.mrf.mxu0  ;;  %2317 = vmatprep.mubr.f32.mxu1 %v5901_v38  ;;  %3995 = vmatpush3.msra.mxu1 %v2239_v19  ;;  %v6792_v58 = vld [vmem:[#allocation34_spill] sm:$0xff]  ;;  %v2606_v57 = vld [vmem:[%s6733_s5 + $0x68] sm:$0xff] }
 0x20f   :  { %v1975_v54 = vld [vmem:[#allocation3 + $0x50] sm:$0xff]  ;;  %v3979_v56 = vpop.f32.mrf.mxu1  ;;  %2318 = vmatmul.mubr.f32.gmra.mxu1 %v5875_v28  ;;  %3996 = vmatprep.subr.mxu1 %v2238_v35  ;;  %v1617_v36 = vadd.f32 %v1616_v45, %v1412_v14  ;;  %v1422_v5 = vadd.f32 %v5776_v48, %v6792_v58  ;;  %v1417_v4 = vadd.f32 %v5776_v48, %v6793_v33  ;;  %v2234_v14 = vld [vmem:[%s6732_s4 + $0x248] sm:$0xff]  ;;  %v2605_v58 = vld [vmem:[%s6733_s5 + $0x60] sm:$0xff] }
 0x210   :  { %v1977_v3 = vmax.f32 %v1975_v54, %v1976_v49  ;;  %1926 = vst.msk [vmem:[#allocation3 + $0x70] sm:$0xff] %vm1911_vm1, %v1897_v8  ;;  %v1900_v0 = vmax.f32 %v1872_v44, 0.0  ;;  %v1871_v43 = vmax.f32 %v1102_v29, %v1797_v15  ;;  %v1812_v26 = vadd.f32 %v3979_v56, %v1607_v18  ;;  %v1618_v55 = vpop.f32.mrf.mxu0  ;;  %3997 = vmatpush3.msra.mxu1 %v2238_v35  ;;  %v2235_v22 = vld [vmem:[%s6732_s4 + $0x250] sm:$0xff]  ;;  %v6795_v49 = vld [vmem:[#allocation35_spill] sm:$0xff] }
 0x211   :  { %v1806_v60 = vpop.f32.mrf.mxu1  ;;  %v5919_v12 = vld [vmem:[#allocation4 + $0x18] sm:$0xff]  ;;  %3998 = vmatprep.subr.mxu1 %v2237_v52  ;;  %v1980_v17 = vld [vmem:[#allocation3 + $0x68] sm:$0xff]  ;;  %v1427_v54 = vadd.f32 %v5776_v48, %v6795_v49 }
 0x212   :  { %1978 = vst.msk [vmem:[#allocation4 + $0x28] sm:$0xff] %vm1911_vm1, %v1977_v3  ;;  %1929 = vst.msk [vmem:[#allocation3 + $0x88] sm:$0xff] %vm1911_vm1, %v1900_v0  ;;  %v1899_v23 = vmax.f32 %v1871_v43, 0.0  ;;  %v1874_v32 = vmax.f32 %v6789_v30, %v1812_v26  ;;  %v1807_v24 = vadd.f32 %v1806_v60, %v1602_v51  ;;  %v1621_v34 = vpop.f32.mrf.mxu0  ;;  %2322 = vmatprep.mubr.f32.mxu1 %v5919_v12  ;;  %2427 = vmatprep.mubr.f32.mxu0 %v5919_v12  ;;  %v2622_v0 = vld [vmem:[%s6733_s5 + $0xe8] sm:$0xff]  ;;  %v6796_v43 = vld [vmem:[#allocation12_spill] sm:$0xff] }
 0x213   :  { %v1979_v9 = vld [vmem:[#allocation3 + $0x60] sm:$0xff]  ;;  %v3982_v62 = vpop.f32.mrf.mxu1  ;;  %2323 = vmatmul.mubr.f32.gmra.mxu1 %v5901_v38  ;;  %2428 = vmatmul.mubr.f32.vlgmr.msra.gmra.mxu0 %v5901_v38  ;;  %v1622_v15 = vadd.f32 %v1621_v34, %v1417_v4  ;;  %v6797_v26 = vld [vmem:[#allocation23_spill] sm:$0xff] }
 0x214   :  { %v1981_v16 = vmax.f32 %v1979_v9, %v1980_v17  ;;  %1928 = vst.msk [vmem:[#allocation3 + $0x80] sm:$0xff] %vm1911_vm1, %v1899_v23  ;;  %v1902_v19 = vmax.f32 %v1874_v32, 0.0  ;;  %v1873_v40 = vmax.f32 %v1112_v47, %v1807_v24  ;;  %v1822_v7 = vadd.f32 %v3982_v62, %v1617_v36  ;;  %v1623_v6 = vpop.f32.mrf.mxu0  ;;  %3999 = vmatpush3.msra.mxu1 %v2237_v52  ;;  %v2233_v32 = vld [vmem:[%s6732_s4 + $0x240] sm:$0xff] }
 0x215   :  { %3643 = vmatpush3.msra.mxu0 %v2608_v50  ;;  %v1816_v10 = vpop.f32.mrf.mxu1  ;;  %4000 = vmatprep.subr.mxu1 %v2236_v53  ;;  %v5943_v42 = vld [vmem:[#allocation4 + $0x20] sm:$0xff]  ;;  %v1984_v21 = vld [vmem:[#allocation3 + $0x78] sm:$0xff]  ;;  %v1132_v55 = vadd.f32 %v6797_v26, %v6796_v43  ;;  %v6798_v50 = vld [vmem:[#allocation22_spill] sm:$0xff] }
 0x216   :  { %3644 = vmatprep.subr.mxu0 %v2623_v11  ;;  %1982 = vst.msk [vmem:[#allocation4 + $0x30] sm:$0xff] %vm1911_vm1, %v1981_v16  ;;  %1931 = vst.msk [vmem:[#allocation3 + $0x98] sm:$0xff] %vm1911_vm1, %v1902_v19  ;;  %v1901_v35 = vmax.f32 %v1873_v40, 0.0  ;;  %v1876_v31 = vmax.f32 %v6794_v25, %v1822_v7  ;;  %v1817_v29 = vadd.f32 %v1816_v10, %v1612_v2  ;;  %v1626_v41 = vpop.f32.mrf.mxu0  ;;  %2327 = vmatprep.mubr.f32.mxu1 %v5943_v42  ;;  %v6799_v11 = vld [vmem:[#allocation36_spill] sm:$0xff]  ;;  %v2232_v7 = vld [vmem:[%s6732_s4 + $0x238] sm:$0xff] }
 0x217   :  { %2432 = vmatprep.mubr.f32.mxu0 %v5943_v42  ;;  %v1983_v18 = vld [vmem:[#allocation3 + $0x70] sm:$0xff]  ;;  %v1627_v8 = vadd.f32 %v1626_v41, %v1422_v5  ;;  %4001 = vmatpush3.msra.mxu1 %v2236_v53  ;;  %v3985_v63 = vpop.f32.mrf.mxu1  ;;  %v1432_v17 = vadd.f32 %v5776_v48, %v6799_v11  ;;  %v2621_v6 = vld [vmem:[%s6733_s5 + $0xe0] sm:$0xff] }
 0x218   :  { %2433 = vmatmul.mubr.f32.gmra.mxu0 %v5919_v12  ;;  %v1985_v44 = vmax.f32 %v1983_v18, %v1984_v21  ;;  %1930 = vst.msk [vmem:[#allocation3 + $0x90] sm:$0xff] %vm1911_vm1, %v1901_v35  ;;  %v1904_v45 = vmax.f32 %v1876_v31, 0.0  ;;  %v1875_v52 = vmax.f32 %v1122_v20, %v1817_v29  ;;  %2328 = vmatmul.mubr.f32.gmra.mxu1 %v5919_v12  ;;  %v1628_v39 = vpop.f32.mrf.mxu0  ;;  %v6801_v35 = vld [vmem:[#allocation37_spill] sm:$0xff]  ;;  %v2231_v41 = vld [vmem:[%s6732_s4 + $0x230] sm:$0xff] }
 0x219   :  { %4002 = vmatprep.subr.mxu1 %v2235_v22  ;;  %v1832_v51 = vadd.f32 %v3985_v63, %v1627_v8  ;;  %v1826_v56 = vpop.f32.mrf.mxu1  ;;  %v5966_v3 = vld [vmem:[#allocation4 + $0x28] sm:$0xff]  ;;  %3645 = vmatpush3.msra.mxu0 %v2607_v37  ;;  %v1437_v25 = vadd.f32 %v5776_v48, %v6801_v35  ;;  %v2620_v37 = vld [vmem:[%s6733_s5 + $0xd8] sm:$0xff] }
 0x21a   :  { %4003 = vmatpush3.msra.mxu1 %v2235_v22  ;;  %1986 = vst.msk [vmem:[#allocation4 + $0x38] sm:$0xff] %vm1911_vm1, %v1985_v44  ;;  %1933 = vst.msk [vmem:[#allocation3 + $0xa8] sm:$0xff] %vm1911_vm1, %v1904_v45  ;;  %v1903_v61 = vmax.f32 %v1875_v52, 0.0  ;;  %v1827_v13 = vadd.f32 %v1826_v56, %v1622_v15  ;;  %v1631_v47 = vpop.f32.mrf.mxu0  ;;  %2332 = vmatprep.mubr.f32.mxu1 %v5966_v3  ;;  %v1988_v1 = vld [vmem:[#allocation3 + $0x88] sm:$0xff]  ;;  %v6802_v15 = vld [vmem:[#allocation24_spill] sm:$0xff] }
 0x21b   :  { %2437 = vmatprep.mubr.f32.mxu0 %v5966_v3  ;;  %v1987_v60 = vld [vmem:[#allocation3 + $0x80] sm:$0xff]  ;;  %v1878_v23 = vmax.f32 %v6798_v50, %v1832_v51  ;;  %v1632_v36 = vadd.f32 %v1631_v47, %v1427_v54  ;;  %4004 = vmatprep.subr.mxu1 %v2234_v14  ;;  %v3988_v30 = vpop.f32.mrf.mxu1  ;;  %v6800_v22 = vld [vmem:[#allocation25_spill] sm:$0xff]  ;;  %v2604_v39 = vld [vmem:[%s6733_s5 + $0x58] sm:$0xff] }
 0x21c   :  { %2438 = vmatmul.mubr.f32.gmra.mxu0 %v5943_v42  ;;  %v1989_v24 = vmax.f32 %v1987_v60, %v1988_v1  ;;  %1932 = vst.msk [vmem:[#allocation3 + $0xa0] sm:$0xff] %vm1911_vm1, %v1903_v61  ;;  %v1877_v34 = vmax.f32 %v1132_v55, %v1827_v13  ;;  %2333 = vmatmul.mubr.f32.gmra.mxu1 %v5943_v42  ;;  %v1633_v53 = vpop.f32.mrf.mxu0  ;;  %v2230_v54 = vld [vmem:[%s6732_s4 + $0x228] sm:$0xff]  ;;  %v2619_v51 = vld [vmem:[%s6733_s5 + $0xd0] sm:$0xff] }
 0x21d   :  { %3646 = vmatprep.subr.mxu0 %v2622_v0  ;;  %v1906_v9 = vmax.f32 %v1878_v23, 0.0  ;;  %4005 = vmatpush3.msra.mxu1 %v2234_v14  ;;  %v1836_v2 = vpop.f32.mrf.mxu1  ;;  %v5989_v62 = vld [vmem:[#allocation4 + $0x30] sm:$0xff]  ;;  %v1992_v46 = vld [vmem:[#allocation3 + $0x98] sm:$0xff]  ;;  %v2229_v23 = vld [vmem:[%s6732_s4 + $0x220] sm:$0xff] }
 0x21e   :  { %3647 = vmatpush3.msra.mxu0 %v2606_v57  ;;  %1990 = vst.msk [vmem:[#allocation4 + $0x40] sm:$0xff] %vm1911_vm1, %v1989_v24  ;;  %v1905_v16 = vmax.f32 %v1877_v34, 0.0  ;;  %v1837_v19 = vadd.f32 %v1836_v2, %v1632_v36  ;;  %4006 = vmatprep.subr.mxu1 %v2233_v32  ;;  %v1636_v40 = vpop.f32.mrf.mxu0  ;;  %v6803_v56 = vld [vmem:[#allocation38_spill] sm:$0xff]  ;;  %v2618_v36 = vld [vmem:[%s6733_s5 + $0xc8] sm:$0xff]  ;;  %v2228_v53 = vld [vmem:[%s6732_s4 + $0x218] sm:$0xff] }
 0x21f   :  { %2337 = vmatprep.mubr.f32.mxu1 %v5989_v62  ;;  %v1991_v59 = vld [vmem:[#allocation3 + $0x90] sm:$0xff]  ;;  %1935 = vst.msk [vmem:[#allocation3 + $0xb8] sm:$0xff] %vm1911_vm1, %v1906_v9  ;;  %v1637_v20 = vadd.f32 %v1636_v40, %v1432_v17  ;;  %2442 = vmatprep.mubr.f32.mxu0 %v5989_v62  ;;  %v3991_v5 = vpop.f32.mrf.mxu1  ;;  %v1442_v0 = vadd.f32 %v5776_v48, %v6803_v56  ;;  %v6804_v48 = vld [vmem:[#allocation27_spill] sm:$0xff]  ;;  %v2602_v34 = vld [vmem:[%s6733_s5 + $0x48] sm:$0xff] }
 0x220   :  { %4007 = vmatpush3.msra.mxu1 %v2233_v32  ;;  %v1993_v10 = vmax.f32 %v1991_v59, %v1992_v46  ;;  %1934 = vst.msk [vmem:[#allocation3 + $0xb0] sm:$0xff] %vm1911_vm1, %v1905_v16  ;;  %v1879_v33 = vmax.f32 %v6800_v22, %v1837_v19  ;;  %2443 = vmatmul.mubr.f32.gmra.mxu0 %v5966_v3  ;;  %v1638_v4 = vpop.f32.mrf.mxu0  ;;  %v2603_v47 = vld [vmem:[%s6733_s5 + $0x50] sm:$0xff]  ;;  %v2617_v2 = vld [vmem:[%s6733_s5 + $0xc0] sm:$0xff]  ;;  %v2616_v46 = vld [vmem:[%s6733_s5 + $0xb8] sm:$0xff] }
 0x221   :  { %2338 = vmatmul.mubr.f32.gmra.mxu1 %v5966_v3  ;;  %v1842_v31 = vadd.f32 %v3988_v30, %v1637_v20  ;;  %4008 = vmatprep.subr.mxu1 %v2232_v7  ;;  %v6010_v29 = vld [vmem:[#allocation4 + $0x38] sm:$0xff]  ;;  %v1846_v8 = vpop.f32.mrf.mxu1  ;;  %v1996_v63 = vld [vmem:[#allocation3 + $0xa8] sm:$0xff]  ;;  %v6805_v17 = vld [vmem:[#allocation26_spill] sm:$0xff] }
 0x222   :  { %3648 = vmatprep.subr.mxu0 %v2621_v6  ;;  %1994 = vst.msk [vmem:[#allocation4 + $0x48] sm:$0xff] %vm1911_vm1, %v1993_v10  ;;  %v1907_v21 = vmax.f32 %v1879_v33, 0.0  ;;  %4009 = vmatpush3.msra.mxu1 %v2232_v7  ;;  %v1641_v18 = vpop.f32.mrf.mxu0  ;;  %v2227_v19 = vld [vmem:[%s6732_s4 + $0x210] sm:$0xff]  ;;  %v2601_v6 = vld [vmem:[%s6733_s5 + $0x40] sm:$0xff]  ;;  %v2614_v4 = vld [vmem:[%s6733_s5 + $0xa8] sm:$0xff] }
 0x223   :  { %3649 = vmatpush3.msra.mxu0 %v2605_v58  ;;  %v1995_v44 = vld [vmem:[#allocation3 + $0xa0] sm:$0xff]  ;;  %v1880_v45 = vmax.f32 %v6802_v15, %v1842_v31  ;;  %v1642_v52 = vadd.f32 %v1641_v18, %v1437_v25  ;;  %2342 = vmatprep.mubr.f32.mxu1 %v6010_v29  ;;  %v2600_v58 = vld [vmem:[%s6733_s5 + $0x38] sm:$0xff]  ;;  %v2615_v10 = vld [vmem:[%s6733_s5 + $0xb0] sm:$0xff] }
 0x224   :  { %2447 = vmatprep.mubr.f32.mxu0 %v6010_v29  ;;  %v1997_v14 = vmax.f32 %v1995_v44, %v1996_v63  ;;  %1936 = vst.msk [vmem:[#allocation3 + $0xc0] sm:$0xff] %vm1911_vm1, %v1907_v21  ;;  %4010 = vmatprep.subr.mxu1 %v2231_v41  ;;  %v1643_v49 = vpop.f32.mrf.mxu0  ;;  %v2225_v22 = vld [vmem:[%s6732_s4 + $0x200] sm:$0xff]  ;;  %v2599_v33 = vld [vmem:[%s6733_s5 + $0x30] sm:$0xff]  ;;  %v2598_v35 = vld [vmem:[%s6733_s5 + $0x28] sm:$0xff] }
 0x225   :  { %3650 = vmatprep.subr.mxu0 %v2620_v37  ;;  %v1908_v43 = vmax.f32 %v1880_v45, 0.0  ;;  %2343 = vmatmul.mubr.f32.gmra.mxu1 %v5989_v62  ;;  %v1847_v26 = vadd.f32 %v1846_v8, %v1642_v52  ;;  %v6036_v55 = vld [vmem:[#allocation4 + $0x40] sm:$0xff]  ;;  %v2656_v37 = vld [vmem:[%s6733_s5 + $0x1f8] sm:$0xff]  ;;  %v2655_v63 = vld [vmem:[%s6733_s5 + $0x1f0] sm:$0xff] }
 0x226   :  { %2448 = vmatmul.mubr.f32.gmra.mxu0 %v5989_v62  ;;  %1998 = vst.msk [vmem:[#allocation4 + $0x50] sm:$0xff] %vm1911_vm1, %v1997_v14  ;;  %v2000_v61 = vld [vmem:[#allocation3 + $0xb8] sm:$0xff]  ;;  %4011 = vmatpush3.msra.mxu1 %v2231_v41  ;;  %v1646_v13 = vpop.f32.mrf.mxu0  ;;  %v2613_v18 = vld [vmem:[%s6733_s5 + $0xa0] sm:$0xff]  ;;  %v2639_v15 = vld [vmem:[%s6733_s5 + $0x170] sm:$0xff] }
 0x227   :  { %3651 = vmatpush3.msra.mxu0 %v2604_v39  ;;  %v1999_v57 = vld [vmem:[#allocation3 + $0xb0] sm:$0xff]  ;;  %1937 = vst.msk [vmem:[#allocation3 + $0xc8] sm:$0xff] %vm1911_vm1, %v1908_v43  ;;  %v1881_v1 = vmax.f32 %v6804_v48, %v1847_v26  ;;  %4012 = vmatprep.subr.mxu1 %v2230_v54  ;;  %v1647_v60 = vadd.f32 %v1646_v13, %v1442_v0  ;;  %v2640_v8 = vld [vmem:[%s6733_s5 + $0x178] sm:$0xff]  ;;  %v2597_v44 = vld [vmem:[%s6733_s5 + $0x20] sm:$0xff] }
 0x228   :  { %3652 = vmatprep.subr.mxu0 %v2619_v51  ;;  %v2001_v50 = vmax.f32 %v1999_v57, %v2000_v61  ;;  %4013 = vmatpush3.msra.mxu1 %v2230_v54  ;;  %v1648_v30 = vpop.f32.mrf.mxu0  ;;  %v2612_v45 = vld [vmem:[%s6733_s5 + $0x98] sm:$0xff]  ;;  %v2654_v52 = vld [vmem:[%s6733_s5 + $0x1e8] sm:$0xff]  ;;  %v2611_v49 = vld [vmem:[%s6733_s5 + $0x90] sm:$0xff] }
 0x229   :  { %2347 = vmatprep.mubr.f32.mxu1 %v6036_v55  ;;  %v1909_v32 = vmax.f32 %v1881_v1, 0.0  ;;  %v1852_v24 = vadd.f32 %v3991_v5, %v1647_v60  ;;  %2452 = vmatprep.mubr.f32.mxu0 %v6036_v55  ;;  %v6061_v11 = vld [vmem:[#allocation4 + $0x48] sm:$0xff]  ;;  %v2596_v39 = vld [vmem:[%s6733_s5 + $0x18] sm:$0xff]  ;;  %v2653_v54 = vld [vmem:[%s6733_s5 + $0x1e0] sm:$0xff] }
 0x22a   :  { %3653 = vmatpush3.msra.mxu0 %v2603_v47  ;;  %2002 = vst.msk [vmem:[#allocation4 + $0x58] sm:$0xff] %vm1911_vm1, %v2001_v50  ;;  %2348 = vmatmul.mubr.f32.gmra.mxu1 %v6010_v29  ;;  %v2226_v5 = vld [vmem:[%s6732_s4 + $0x208] sm:$0xff]  ;;  %v2595_v56 = vld [vmem:[%s6733_s5 + $0x10] sm:$0xff]  ;;  %v2637_v0 = vld [vmem:[%s6733_s5 + $0x160] sm:$0xff] }
 0x22b   :  { %2453 = vmatmul.mubr.f32.gmra.mxu0 %v6010_v29  ;;  %1938 = vst.msk [vmem:[#allocation3 + $0xd0] sm:$0xff] %vm1911_vm1, %v1909_v32  ;;  %v1882_v9 = vmax.f32 %v6805_v17, %v1852_v24  ;;  %4014 = vmatprep.subr.mxu1 %v2229_v23  ;;  %v2003_v40 = vld [vmem:[#allocation3 + $0xc0] sm:$0xff]  ;;  %v2638_v14 = vld [vmem:[%s6733_s5 + $0x168] sm:$0xff]  ;;  %v2652_v26 = vld [vmem:[%s6733_s5 + $0x1d8] sm:$0xff] }
 0x22c   :  { %3654 = vmatprep.subr.mxu0 %v2618_v36  ;;  %4015 = vmatpush3.msra.mxu1 %v2229_v23  ;;  %v2610_v43 = vld [vmem:[%s6733_s5 + $0x88] sm:$0xff]  ;;  %v2636_v13 = vld [vmem:[%s6733_s5 + $0x158] sm:$0xff]  ;;  %v2609_v47 = vld [vmem:[%s6733_s5 + $0x80] sm:$0xff] }
 0x22d   :  { %3655 = vmatpush3.msra.mxu0 %v2602_v34  ;;  %v1910_v16 = vmax.f32 %v1882_v9, 0.0  ;;  %4016 = vmatprep.subr.mxu1 %v2228_v53  ;;  %v6081_v59 = vld [vmem:[#allocation4 + $0x50] sm:$0xff]  ;;  %v2594_v61 = vld [vmem:[%s6733_s5 + $0x8] sm:$0xff]  ;;  %v2593_v48 = vld [vmem:[%s6733_s5] sm:$0xff] }
 0x22e   :  { %2352 = vmatprep.mubr.f32.mxu1 %v6061_v11  ;;  %v2004_v7 = vld [vmem:[#allocation3 + $0xc8] sm:$0xff]  ;;  %2457 = vmatprep.mubr.f32.mxu0 %v6061_v11  ;;  %v2651_v57 = vld [vmem:[%s6733_s5 + $0x1d0] sm:$0xff]  ;;  %v2649_v23 = vld [vmem:[%s6733_s5 + $0x1c0] sm:$0xff] }
 0x22f   :  { %4017 = vmatpush3.msra.mxu1 %v2228_v53  ;;  %1939 = vst.msk [vmem:[#allocation3 + $0xd8] sm:$0xff] %vm1911_vm1, %v1910_v16  ;;  %3656 = vmatprep.subr.mxu0 %v2617_v2  ;;  %v2005_v20 = vmax.f32 %v2003_v40, %v2004_v7  ;;  %v2635_v1 = vld [vmem:[%s6733_s5 + $0x150] sm:$0xff]  ;;  %v2650_v60 = vld [vmem:[%s6733_s5 + $0x1c8] sm:$0xff]  ;;  %v2672_v36 = vld [vmem:[%s6733_s5 + $0x278] sm:$0xff] }
 0x230   :  { %2353 = vmatmul.mubr.f32.gmra.mxu1 %v6036_v55  ;;  %2458 = vmatmul.mubr.f32.gmra.mxu0 %v6036_v55  ;;  %v2634_v50 = vld [vmem:[%s6733_s5 + $0x148] sm:$0xff]  ;;  %v2633_v30 = vld [vmem:[%s6733_s5 + $0x140] sm:$0xff]  ;;  %v2632_v32 = vld [vmem:[%s6733_s5 + $0x138] sm:$0xff] }
 0x231   :  { %4018 = vmatprep.subr.mxu1 %v2227_v19  ;;  %3657 = vmatpush3.msra.mxu0 %v2601_v6  ;;  %2006 = vst.msk [vmem:[#allocation4 + $0x60] sm:$0xff] %vm1911_vm1, %v2005_v20  ;;  %v6110_v41 = vld [vmem:[#allocation4 + $0x58] sm:$0xff]  ;;  %v2671_v24 = vld [vmem:[%s6733_s5 + $0x270] sm:$0xff]  ;;  %v2646_v9 = vld [vmem:[%s6733_s5 + $0x1a8] sm:$0xff] }
 0x232   :  { %4019 = vmatpush3.msra.mxu1 %v2227_v19  ;;  %3658 = vmatprep.subr.mxu0 %v2616_v46  ;;  %v2007_v25 = vld [vmem:[#allocation3 + $0xd0] sm:$0xff]  ;;  %v2630_v2 = vld [vmem:[%s6733_s5 + $0x128] sm:$0xff]  ;;  %v2645_v16 = vld [vmem:[%s6733_s5 + $0x1a0] sm:$0xff] }
 0x233   :  { %2357 = vmatprep.mubr.f32.mxu1 %v6081_v59  ;;  %3659 = vmatpush3.msra.mxu0 %v2600_v58  ;;  %v2647_v53 = vld [vmem:[%s6733_s5 + $0x1b0] sm:$0xff]  ;;  %v2669_v19 = vld [vmem:[%s6733_s5 + $0x260] sm:$0xff]  ;;  %v2644_v7 = vld [vmem:[%s6733_s5 + $0x198] sm:$0xff] }
 0x234   :  { %2462 = vmatprep.mubr.f32.mxu0 %v6081_v59  ;;  %4020 = vmatprep.subr.mxu1 %v2226_v5  ;;  %v2631_v17 = vld [vmem:[%s6733_s5 + $0x130] sm:$0xff]  ;;  %v2629_v40 = vld [vmem:[%s6733_s5 + $0x120] sm:$0xff]  ;;  %v2668_v6 = vld [vmem:[%s6733_s5 + $0x258] sm:$0xff] }
 0x235   :  { %2358 = vmatmul.mubr.f32.gmra.mxu1 %v6061_v11  ;;  %2463 = vmatmul.mubr.f32.gmra.mxu0 %v6061_v11  ;;  %v2628_v46 = vld [vmem:[%s6733_s5 + $0x118] sm:$0xff]  ;;  %v2643_v20 = vld [vmem:[%s6733_s5 + $0x190] sm:$0xff] }
 0x236   :  { %4021 = vmatpush3.msra.mxu1 %v2226_v5  ;;  %v2008_v31 = vld [vmem:[#allocation3 + $0xd8] sm:$0xff]  ;;  %3660 = vmatprep.subr.mxu0 %v2615_v10  ;;  %v2667_v58 = vld [vmem:[%s6733_s5 + $0x250] sm:$0xff]  ;;  %v2642_v10 = vld [vmem:[%s6733_s5 + $0x188] sm:$0xff] }
 0x237   :  { %4022 = vmatprep.subr.mxu1 %v2225_v22  ;;  %4024 = vmatprep.mubr.f32.mxu1 %v5943_v42  ;;  %v2009_v21 = vmax.f32 %v2007_v25, %v2008_v31  ;;  %v2627_v5 = vld [vmem:[%s6733_s5 + $0x110] sm:$0xff]  ;;  %v2665_v25 = vld [vmem:[%s6733_s5 + $0x240] sm:$0xff]  ;;  %v2664_v31 = vld [vmem:[%s6733_s5 + $0x238] sm:$0xff] }
 0x238   :  { %3661 = vmatpush3.msra.mxu0 %v2599_v33  ;;  %4023 = vmatpush3.msra.mxu1 %v2225_v22  ;;  %v6155_v51 = vld [vmem:[#allocation4 + $0x60] sm:$0xff]  ;;  %v2626_v22 = vld [vmem:[%s6733_s5 + $0x108] sm:$0xff] }
 0x239   :  { %3662 = vmatprep.subr.mxu0 %v2614_v4  ;;  %2467 = vmatprep.mubr.f32.mxu0 %v6110_v41  ;;  %2010 = vst.msk [vmem:[#allocation4 + $0x68] sm:$0xff] %vm1911_vm1, %v2009_v21  ;;  %v2666_v33 = vld [vmem:[%s6733_s5 + $0x248] sm:$0xff]  ;;  %v2641_v4 = vld [vmem:[%s6733_s5 + $0x180] sm:$0xff] }
 0x23a   :  { %3663 = vmatpush3.msra.mxu0 %v2598_v35  ;;  %3704 = vmatprep.subr.mxu1 %v2656_v37  ;;  %v2625_v35 = vld [vmem:[%s6733_s5 + $0x100] sm:$0xff]  ;;  %v2663_v37 = vld [vmem:[%s6733_s5 + $0x230] sm:$0xff] }
 0x23b   :  { %2468 = vmatmul.mubr.f32.gmra.mxu0 %v6081_v59  ;;  %4025 = vmatmul.mubr.f32.vlgmr.msra.gmra.mxu1 %v5966_v3  ;;  %v2661_v21 = vld [vmem:[%s6733_s5 + $0x220] sm:$0xff] }
 0x23c   :  { %3664 = vmatprep.subr.mxu0 %v2613_v18  ;;  %3705 = vmatpush3.msra.mxu1 %v2640_v8  ;;  %v2659_v18 = vld [vmem:[%s6733_s5 + $0x210] sm:$0xff]  ;;  %v2658_v8 = vld [vmem:[%s6733_s5 + $0x208] sm:$0xff] }
 0x23d   :  { %4027 = vmatprep.mubr.f32.mxu1 %v5989_v62  ;;  %3706 = vmatprep.subr.mxu1 %v2655_v63  ;;  %v2657_v63 = vld [vmem:[%s6733_s5 + $0x200] sm:$0xff] }
 0x23e   :  { %3665 = vmatpush3.msra.mxu0 %v2597_v44  ;;  %3707 = vmatpush3.msra.mxu1 %v2639_v15  ;;  %v6806_v44 = vmov 0.0  }
 0x23f   :  { %3666 = vmatprep.subr.mxu0 %v2612_v45  ;;  %3708 = vmatprep.subr.mxu1 %v2654_v52 }
 0x240   :  { %4028 = vmatmul.mubr.f32.gmra.mxu1 %v6010_v29  ;;  %3667 = vmatpush3.msra.mxu0 %v2596_v39  ;;  %v6222_v34 = vld [vmem:[#allocation4 + $0x68] sm:$0xff] }
 0x241   :  { %3709 = vmatpush3.msra.mxu1 %v2638_v14  ;;  %4030 = vmatprep.mubr.f32.mxu1 %v6036_v55 }
 0x242   :  { %3668 = vmatprep.subr.mxu0 %v2611_v49  ;;  %3710 = vmatprep.subr.mxu1 %v2653_v54 }
 0x243   :  { %2472 = vmatprep.mubr.f32.mxu0 %v6155_v51  ;;  %3669 = vmatpush3.msra.mxu0 %v2595_v56 }
 0x244   :  { %3711 = vmatpush3.msra.mxu1 %v2637_v0  ;;  %2473 = vmatmul.mubr.f32.gmra.mxu0 %v6110_v41 }
 0x245   :  { %3670 = vmatprep.subr.mxu0 %v2610_v43  ;;  %3712 = vmatprep.subr.mxu1 %v2652_v26 }
 0x246   :  { %4031 = vmatmul.mubr.f32.gmra.mxu1 %v6061_v11  ;;  %3671 = vmatpush3.msra.mxu0 %v2594_v61 }
 0x247   :  { %2737 = vmatprep.mubr.f32.mxu0 %v5875_v28  ;;  %3713 = vmatpush3.msra.mxu1 %v2636_v13 }
 0x248   :  { %4033 = vmatprep.mubr.f32.mxu1 %v6081_v59  ;;  %3672 = vmatprep.subr.mxu0 %v2609_v47 }
 0x249   :  { %3714 = vmatprep.subr.mxu1 %v2651_v57  ;;  %3673 = vmatpush3.msra.mxu0 %v2593_v48 }
 0x24a   :  { %3715 = vmatpush3.msra.mxu1 %v2635_v1  ;;  %2738 = vmatmul.mubr.f32.vlgmr.msra.gmra.mxu0 %v5883_v27  ;;  %v2648_v27 = vld [vmem:[%s6733_s5 + $0x1b8] sm:$0xff] }
 0x24b   :  { %3716 = vmatprep.subr.mxu1 %v2650_v60  ;;  %4034 = vmatmul.mubr.f32.gmra.mxu1 %v6110_v41 }
 0x24c   :  { %2742 = vmatprep.mubr.f32.mxu0 %v5901_v38  ;;  %3717 = vmatpush3.msra.mxu1 %v2634_v50 }
 0x24d   :  { %4036 = vmatprep.mubr.f32.mxu1 %v6155_v51  ;;  %3718 = vmatprep.subr.mxu1 %v2649_v23 }
 0x24e   :  { %4039 = vmatprep.subr.mxu0 %v2672_v36  ;;  %3719 = vmatpush3.msra.mxu1 %v2633_v30  ;;  %v3114_v30 = vld [vmem:[%s6735_s7 + $0x78] sm:$0xff] }
 0x24f   :  { %4040 = vmatpush3.msra.mxu0 %v2672_v36  ;;  %3720 = vmatprep.subr.mxu1 %v2648_v27  ;;  %v3130_v36 = vld [vmem:[%s6735_s7 + $0xf8] sm:$0xff]  ;;  %v3129_v27 = vld [vmem:[%s6735_s7 + $0xf0] sm:$0xff] }
 0x250   :  { %2743 = vmatmul.mubr.f32.gmra.mxu0 %v5875_v28  ;;  %4037 = vmatmul.mubr.f32.gmra.mxu1 %v6222_v34  ;;  %v2670_v28 = vld [vmem:[%s6733_s5 + $0x268] sm:$0xff] }
 0x251   :  { %2747 = vmatprep.mubr.f32.mxu0 %v5919_v12  ;;  %3721 = vmatpush3.msra.mxu1 %v2632_v32 }
 0x252   :  { %4041 = vmatprep.subr.mxu0 %v2671_v24  ;;  %3722 = vmatprep.subr.mxu1 %v2647_v53 }
 0x253   :  { %2852 = vmatprep.mubr.f32.mxu1 %v5919_v12  ;;  %4042 = vmatpush3.msra.mxu0 %v2671_v24  ;;  %v3113_v24 = vld [vmem:[%s6735_s7 + $0x70] sm:$0xff] }
 0x254   :  { %3723 = vmatpush3.msra.mxu1 %v2631_v17  ;;  %4043 = vmatprep.subr.mxu0 %v2670_v28 }
 0x255   :  { %2748 = vmatmul.mubr.f32.gmra.mxu0 %v5901_v38  ;;  %3724 = vmatprep.subr.mxu1 %v2646_v9  ;;  %v3112_v9 = vld [vmem:[%s6735_s7 + $0x68] sm:$0xff] }
 0x256   :  { %4044 = vmatpush3.msra.mxu0 %v2670_v28  ;;  %2752 = vmatprep.mubr.f32.mxu0 %v5943_v42  ;;  %v3128_v28 = vld [vmem:[%s6735_s7 + $0xe8] sm:$0xff] }
 0x257   :  { %3725 = vmatpush3.msra.mxu1 %v2630_v2  ;;  %4045 = vmatprep.subr.mxu0 %v2669_v19  ;;  %v3146_v2 = vld [vmem:[%s6735_s7 + $0x178] sm:$0xff] }
 0x258   :  { %3726 = vmatprep.subr.mxu1 %v2645_v16  ;;  %4046 = vmatpush3.msra.mxu0 %v2669_v19 }
 0x259   :  { %3727 = vmatpush3.msra.mxu1 %v2629_v40  ;;  %2753 = vmatmul.mubr.f32.gmra.mxu0 %v5919_v12  ;;  %v3127_v40 = vld [vmem:[%s6735_s7 + $0xe0] sm:$0xff] }
 0x25a   :  { %3728 = vmatprep.subr.mxu1 %v2644_v7  ;;  %4047 = vmatprep.subr.mxu0 %v2668_v6  ;;  %v3145_v7 = vld [vmem:[%s6735_s7 + $0x170] sm:$0xff] }
 0x25b   :  { %2757 = vmatprep.mubr.f32.mxu0 %v5966_v3  ;;  %3729 = vmatpush3.msra.mxu1 %v2628_v46 }
 0x25c   :  { %4048 = vmatpush3.msra.mxu0 %v2668_v6  ;;  %3730 = vmatprep.subr.mxu1 %v2643_v20  ;;  %v3111_v20 = vld [vmem:[%s6735_s7 + $0x60] sm:$0xff] }
 0x25d   :  { %4049 = vmatprep.subr.mxu0 %v2667_v58  ;;  %3731 = vmatpush3.msra.mxu1 %v2627_v5  ;;  %v3126_v5 = vld [vmem:[%s6735_s7 + $0xd8] sm:$0xff] }
 0x25e   :  { %2758 = vmatmul.mubr.f32.gmra.mxu0 %v5943_v42  ;;  %3732 = vmatprep.subr.mxu1 %v2642_v10 }
 0x25f   :  { %4050 = vmatpush3.msra.mxu0 %v2667_v58  ;;  %2762 = vmatprep.mubr.f32.mxu0 %v5989_v62  ;;  %v3144_v58 = vld [vmem:[%s6735_s7 + $0x168] sm:$0xff] }
 0x260   :  { %3733 = vmatpush3.msra.mxu1 %v2626_v22  ;;  %4051 = vmatprep.subr.mxu0 %v2666_v33 }
 0x261   :  { %3734 = vmatprep.subr.mxu1 %v2641_v4  ;;  %4052 = vmatpush3.msra.mxu0 %v2666_v33  ;;  %v3110_v4 = vld [vmem:[%s6735_s7 + $0x58] sm:$0xff] }
 0x262   :  { %3735 = vmatpush3.msra.mxu1 %v2625_v35  ;;  %2763 = vmatmul.mubr.f32.gmra.mxu0 %v5966_v3  ;;  %v3143_v35 = vld [vmem:[%s6735_s7 + $0x160] sm:$0xff] }
 0x263   :  { %2853 = vmatmul.mubr.f32.vlgmr.msra.gmra.mxu1 %v5901_v38  ;;  %4053 = vmatprep.subr.mxu0 %v2665_v25  ;;  %v2662_v38 = vld [vmem:[%s6733_s5 + $0x228] sm:$0xff] }
 0x264   :  { %2767 = vmatprep.mubr.f32.mxu0 %v6010_v29  ;;  %2857 = vmatprep.mubr.f32.mxu1 %v5943_v42 }
 0x265   :  { %4054 = vmatpush3.msra.mxu0 %v2665_v25  ;;  %3792 = vmatprep.subr.mxu1 %v3130_v36  ;;  %v3125_v25 = vld [vmem:[%s6735_s7 + $0xd0] sm:$0xff] }
 0x266   :  { %4055 = vmatprep.subr.mxu0 %v2664_v31  ;;  %2768 = vmatmul.mubr.f32.gmra.mxu0 %v5989_v62 }
 0x267   :  { %4056 = vmatpush3.msra.mxu0 %v2664_v31  ;;  %2858 = vmatmul.mubr.f32.gmra.mxu1 %v5919_v12  ;;  %v2660_v12 = vld [vmem:[%s6733_s5 + $0x218] sm:$0xff] }
 0x268   :  { %2862 = vmatprep.mubr.f32.mxu1 %v5966_v3  ;;  %2772 = vmatprep.mubr.f32.mxu0 %v6036_v55 }
 0x269   :  { %4057 = vmatprep.subr.mxu0 %v2663_v37  ;;  %3793 = vmatpush3.msra.mxu1 %v3114_v30 }
 0x26a   :  { %4058 = vmatpush3.msra.mxu0 %v2663_v37  ;;  %3794 = vmatprep.subr.mxu1 %v3129_v27 }
 0x26b   :  { %4059 = vmatprep.subr.mxu0 %v2662_v38  ;;  %2863 = vmatmul.mubr.f32.gmra.mxu1 %v5943_v42 }
 0x26c   :  { %2773 = vmatmul.mubr.f32.gmra.mxu0 %v6010_v29  ;;  %2867 = vmatprep.mubr.f32.mxu1 %v5989_v62 }
 0x26d   :  { %4060 = vmatpush3.msra.mxu0 %v2662_v38  ;;  %2777 = vmatprep.mubr.f32.mxu0 %v6061_v11  ;;  %v3109_v38 = vld [vmem:[%s6735_s7 + $0x50] sm:$0xff] }
 0x26e   :  { %4061 = vmatprep.subr.mxu0 %v2661_v21  ;;  %3795 = vmatpush3.msra.mxu1 %v3113_v24 }
 0x26f   :  { %4062 = vmatpush3.msra.mxu0 %v2661_v21  ;;  %2868 = vmatmul.mubr.f32.gmra.mxu1 %v5966_v3  ;;  %v3142_v21 = vld [vmem:[%s6735_s7 + $0x158] sm:$0xff] }
 0x270   :  { %2778 = vmatmul.mubr.f32.gmra.mxu0 %v6036_v55  ;;  %4063 = vmatprep.subr.mxu0 %v2660_v12 }
 0x271   :  { %2782 = vmatprep.mubr.f32.mxu0 %v6081_v59  ;;  %2872 = vmatprep.mubr.f32.mxu1 %v6010_v29 }
 0x272   :  { %4064 = vmatpush3.msra.mxu0 %v2660_v12  ;;  %3796 = vmatprep.subr.mxu1 %v3128_v28 }
 0x273   :  { %4065 = vmatprep.subr.mxu0 %v2659_v18  ;;  %2873 = vmatmul.mubr.f32.gmra.mxu1 %v5989_v62 }
 0x274   :  { %4066 = vmatpush3.msra.mxu0 %v2659_v18  ;;  %2877 = vmatprep.mubr.f32.mxu1 %v6036_v55 }
 0x275   :  { %2783 = vmatmul.mubr.f32.gmra.mxu0 %v6061_v11  ;;  %4067 = vmatprep.subr.mxu0 %v2658_v8 }
 0x276   :  { %4068 = vmatpush3.msra.mxu0 %v2658_v8  ;;  %4071 = vmatprep.mubr.f32.mxu0 %v5943_v42 }
 0x277   :  { %4069 = vmatprep.subr.mxu0 %v2657_v63  ;;  %2878 = vmatmul.mubr.f32.gmra.mxu1 %v6010_v29 }
 0x278   :  { %4070 = vmatpush3.msra.mxu0 %v2657_v63  ;;  %2882 = vmatprep.mubr.f32.mxu1 %v6061_v11  ;;  %v3124_v63 = vld [vmem:[%s6735_s7 + $0xc8] sm:$0xff] }
 0x279   :  { %4072 = vmatmul.mubr.f32.vlgmr.msra.gmra.mxu0 %v5966_v3  ;;  %3229 = vmatprep.subr.mxu0 %v6806_v44 }
 0x27a   :  { %4074 = vmatprep.mubr.f32.mxu0 %v5989_v62  ;;  %3230 = vmatpush1.msra.mxu0 %v3146_v2 }
 0x27b   :  { %2883 = vmatmul.mubr.f32.gmra.mxu1 %v6036_v55  ;;  %3231 = vmatprep.subr.mxu0 %v6806_v44 }
 0x27c   :  { %2887 = vmatprep.mubr.f32.mxu1 %v6081_v59  ;;  %3797 = vmatpush3.msra.mxu1 %v3112_v9 }
 0x27d   :  { %4075 = vmatmul.mubr.f32.gmra.mxu0 %v6010_v29  ;;  %3798 = vmatprep.subr.mxu1 %v3127_v40 }
 0x27e   :  { %4077 = vmatprep.mubr.f32.mxu0 %v6036_v55  ;;  %3232 = vmatpush1.msra.mxu0 %v3145_v7 }
 0x27f   :  { %2888 = vmatmul.mubr.f32.gmra.mxu1 %v6061_v11  ;;  %3233 = vmatprep.subr.mxu0 %v6806_v44 }
 0x280   :  { %2892 = vmatprep.mubr.f32.mxu1 %v6110_v41  ;;  %3799 = vmatpush3.msra.mxu1 %v3111_v20 }
 0x281   :  { %4078 = vmatmul.mubr.f32.gmra.mxu0 %v6061_v11  ;;  %3800 = vmatprep.subr.mxu1 %v3126_v5 }
 0x282   :  { %4080 = vmatprep.mubr.f32.mxu0 %v6081_v59  ;;  %3234 = vmatpush1.msra.mxu0 %v3144_v58 }
 0x283   :  { %2893 = vmatmul.mubr.f32.gmra.mxu1 %v6081_v59  ;;  %v6359_v59 = vld [vmem:[%s6734_s6] ss:$0 sm:$0xff]  ;;  %3235 = vmatprep.subr.mxu0 %v6806_v44 }
 0x284   :  { %2897 = vmatprep.mubr.f32.mxu1 %v6155_v51  ;;  %3801 = vmatpush3.msra.mxu1 %v3110_v4 }
 0x285   :  { %4081 = vmatmul.mubr.f32.gmra.mxu0 %v6110_v41  ;;  %3802 = vmatprep.subr.mxu1 %v3125_v25 }
 0x286   :  { %4083 = vmatprep.mubr.f32.mxu0 %v6155_v51  ;;  %3236 = vmatpush1.msra.mxu0 %v3143_v35 }
 0x287   :  { %2898 = vmatmul.mubr.f32.gmra.mxu1 %v6110_v41  ;;  %3237 = vmatprep.subr.mxu0 %v6806_v44 }
 0x288   :  { %3803 = vmatpush3.msra.mxu1 %v3109_v38  ;;  %3238 = vmatpush1.msra.mxu0 %v3142_v21 }
 0x289   :  { %4084 = vmatmul.mubr.f32.gmra.mxu0 %v6222_v34  ;;  %3804 = vmatprep.subr.mxu1 %v3124_v63 }
 0x28a   :  { %3239 = vmatprep.subr.mxu0 %v6806_v44 }
 0x2cb   :  { %v3524_v42 = vpop.f32.mrf.mxu1 }
 0x2cd   :  { %v3525_v3 = vpop.f32.mrf.mxu1 }
 0x2ce   :  { %v3526_v62 = vadd.f32 %v3525_v3, %v3524_v42  ;;  %v3108_v3 = vld [vmem:[%s6735_s7 + $0x48] sm:$0xff] }
 0x2cf   :  { %v3527_v29 = vpop.f32.mrf.mxu1  ;;  %3805 = vmatpush3.msra.mxu1 %v3108_v3 }
 0x2d0   :  { %v2315_v14 = vadd.f32 %v3526_v62, %v6359_v59 }
 0x2d1   :  { %v3528_v55 = vpop.f32.mrf.mxu1 }
 0x2d2   :  { %v3529_v11 = vadd.f32 %v3528_v55, %v3527_v29 }
 0x2d3   :  { %v3530_v15 = vpop.f32.mrf.mxu1  ;;  %v3586_v45 = vpop.f32.mrf.mxu0 }
 0x2d4   :  { %v2320_v43 = vadd.f32 %v3529_v11, %v6359_v59  ;;  %v3123_v11 = vld [vmem:[%s6735_s7 + $0xc0] sm:$0xff] }
 0x2d5   :  { %v3531_v52 = vpop.f32.mrf.mxu1  ;;  %v3587_v39 = vpop.f32.mrf.mxu0  ;;  %3806 = vmatprep.subr.mxu1 %v3123_v11 }
 0x2d6   :  { %v3532_v41 = vadd.f32 %v3531_v52, %v3530_v15  ;;  %v3588_v49 = vadd.f32 %v3587_v39, %v3586_v45  ;;  %v3107_v15 = vld [vmem:[%s6735_s7 + $0x40] sm:$0xff]  ;;  %v3122_v39 = vld [vmem:[%s6735_s7 + $0xb8] sm:$0xff] }
 0x2d7   :  { %3807 = vmatpush3.msra.mxu1 %v3107_v15 }
 0x2d8   :  { %v3589_v54 = vpop.f32.mrf.mxu0  ;;  %v3533_v51 = vpop.f32.mrf.mxu1  ;;  %v6362_v56 = vadd.f32 %v3588_v49, %v2315_v14  ;;  %v2325_v60 = vadd.f32 %v3532_v41, %v6359_v59  ;;  %3808 = vmatprep.subr.mxu1 %v3122_v39 }
 0x2da   :  { %v3590_v0 = vpop.f32.mrf.mxu0  ;;  %v3534_v26 = vpop.f32.mrf.mxu1 }
 0x2db   :  { %v3591_v61 = vadd.f32 %v3590_v0, %v3589_v54  ;;  %v3535_v13 = vadd.f32 %v3534_v26, %v3533_v51 }
 0x2dc   :  { %v3592_v47 = vpop.f32.mrf.mxu0  ;;  %v3536_v57 = vpop.f32.mrf.mxu1 }
 0x2dd   :  { %v6365_v48 = vadd.f32 %v3591_v61, %v2320_v43  ;;  %v2330_v6 = vadd.f32 %v3535_v13, %v6359_v59 }
 0x2de   :  { %v3593_v1 = vpop.f32.mrf.mxu0  ;;  %v3537_v50 = vpop.f32.mrf.mxu1 }
 0x2df   :  { %v3594_v23 = vadd.f32 %v3593_v1, %v3592_v47  ;;  %v3538_v32 = vadd.f32 %v3537_v50, %v3536_v57 }
 0x2e0   :  { %v3595_v53 = vpop.f32.mrf.mxu0 }
 0x2e1   :  { %v3539_v34 = vpop.f32.mrf.mxu1  ;;  %v6380_v17 = vadd.f32 %v3594_v23, %v2325_v60  ;;  %v2335_v12 = vadd.f32 %v3538_v32, %v6359_v59 }
 0x2e2   :  { %v3596_v19 = vpop.f32.mrf.mxu0 }
 0x2e3   :  { %v3540_v16 = vpop.f32.mrf.mxu1  ;;  %v3597_v46 = vadd.f32 %v3596_v19, %v3595_v53 }
 0x2e4   :  { %v3541_v42 = vadd.f32 %v3540_v16, %v3539_v34 }
 0x2e5   :  { %v3542_v10 = vpop.f32.mrf.mxu1  ;;  %v6408_v33 = vadd.f32 %v3597_v46, %v2330_v6 }
 0x2e6   :  { %v3598_v22 = vpop.f32.mrf.mxu0  ;;  %v2340_v14 = vadd.f32 %v3541_v42, %v6359_v59 }
 0x2e7   :  { %v3543_v31 = vpop.f32.mrf.mxu1 }
 0x2e8   :  { %v3599_v37 = vpop.f32.mrf.mxu0  ;;  %v3544_v18 = vadd.f32 %v3543_v31, %v3542_v10 }
 0x2e9   :  { %v3600_v8 = vadd.f32 %v3599_v37, %v3598_v22 }
 0x2ea   :  { %v6435_v62 = vpop.f32.mrf.mxu1  ;;  %v2345_v26 = vadd.f32 %v3544_v18, %v6359_v59 }
 0x2eb   :  { %v3601_v29 = vpop.f32.mrf.mxu0  ;;  %v6437_v55 = vadd.f32 %v3600_v8, %v2335_v12 }
 0x2ec   :  { %v6446_v45 = vpop.f32.mrf.mxu1 }
 0x2ed   :  { %v3602_v52 = vpop.f32.mrf.mxu0 }
 0x2ee   :  { %v3603_v41 = vadd.f32 %v3602_v52, %v3601_v29 }
 0x2f0   :  { %v6452_v49 = vpop.f32.mrf.mxu1  ;;  %v6454_v54 = vadd.f32 %v3603_v41, %v2340_v14  ;;  %v3604_v51 = vpop.f32.mrf.mxu0  ;;  %v3547_v41 = vadd.f32 %v6446_v45, %v6435_v62 }
 0x2f2   :  { %v6456_v0 = vpop.f32.mrf.mxu1  ;;  %v3605_v43 = vpop.f32.mrf.mxu0 }
 0x2f3   :  { %v3606_v61 = vadd.f32 %v3605_v43, %v3604_v51 }
 0x2f5   :  { %v6459_v13 = vpop.f32.mrf.mxu1  ;;  %v6461_v47 = vadd.f32 %v3606_v61, %v2345_v26  ;;  %v3607_v57 = vpop.f32.mrf.mxu0 }
 0x2f7   :  { %6807 = vst [vmem:[#allocation8_spill] sm:$0xff] %v6461_v47  ;;  %v3552_v1 = vpop.f32.mrf.mxu1  ;;  %v3608_v60 = vpop.f32.mrf.mxu0 }
 0x2f8   :  { %v3609_v47 = vadd.f32 %v3608_v60, %v3607_v57 }
 0x2fb   :  { %v4026_v50 = vpop.f32.mrf.mxu1  ;;  %v6463_v23 = vpop.f32.mrf.mxu0 }
 0x2fc   :  { %v2550_v57 = vadd.f32 %v4026_v50, %v6365_v48 }
 0x2fd   :  { %v6465_v36 = vpop.f32.mrf.mxu1  ;;  %v6467_v30 = vpop.f32.mrf.mxu0 }
 0x300   :  { %v6469_v27 = vpop.f32.mrf.mxu1 }
 0x302   :  { %v6475_v34 = vpop.f32.mrf.mxu1 }
 0x304   :  { %v6471_v32 = vpop.f32.mrf.mxu0 }
 0x305   :  { %6808 = vst [vmem:[#allocation15_spill] sm:$0xff] %v6471_v32 }
 0x306   :  { %v6473_v24 = vpop.f32.mrf.mxu0  ;;  %v6477_v28 = vpop.f32.mrf.mxu1 }
 0x307   :  { %6809 = vst [vmem:[#allocation28_spill] sm:$0xff] %v6473_v24 }
 0x308   :  { %v6479_v16 = vpop.f32.mrf.mxu1 }
 0x30a   :  { %v3674_v53 = vpop.f32.mrf.mxu0 }
 0x30b   :  { %v6481_v40 = vpop.f32.mrf.mxu1 }
 0x30c   :  { %v3675_v9 = vpop.f32.mrf.mxu0 }
 0x30d   :  { %v6483_v46 = vpop.f32.mrf.mxu1  ;;  %v3676_v51 = vadd.f32 %v3675_v9, %v3674_v53  ;;  %v6504_v53 = vadd.f32 %v6456_v0, %v6452_v49  ;;  %v6507_v9 = vadd.f32 %v3552_v1, %v6459_v13 }
 0x30e   :  { %6810 = vst [vmem:[#allocation14_spill] sm:$0xff] %v6483_v46 }
 0x310   :  { %v3677_v2 = vpop.f32.mrf.mxu0  ;;  %v6485_v5 = vpop.f32.mrf.mxu1 }
 0x311   :  { %6811 = vst [vmem:[#allocation30_spill] sm:$0xff] %v6485_v5 }
 0x312   :  { %v3678_v19 = vpop.f32.mrf.mxu0  ;;  %v6487_v4 = vpop.f32.mrf.mxu1 }
 0x313   :  { %6812 = vst [vmem:[#allocation13_spill] sm:$0xff] %v6487_v4  ;;  %v3679_v52 = vadd.f32 %v3678_v19, %v3677_v2  ;;  %v2350_v2 = vadd.f32 %v3547_v41, %v6359_v59  ;;  %v2740_v19 = vadd.f32 %v3676_v51, %v6359_v59 }
 0x315   :  { %v3680_v7 = vpop.f32.mrf.mxu0  ;;  %v2745_v5 = vadd.f32 %v3679_v52, %v6359_v59 }
 0x317   :  { %v3681_v6 = vpop.f32.mrf.mxu0 }
 0x318   :  { %v3682_v24 = vadd.f32 %v3681_v6, %v3680_v7 }
 0x319   :  { %v3683_v20 = vpop.f32.mrf.mxu0 }
 0x31a   :  { %v2750_v49 = vadd.f32 %v3682_v24, %v6359_v59 }
 0x31b   :  { %v3684_v58 = vpop.f32.mrf.mxu0 }
 0x31c   :  { %v3685_v4 = vadd.f32 %v3684_v58, %v3683_v20 }
 0x31e   :  { %v3686_v10 = vpop.f32.mrf.mxu0  ;;  %v2755_v20 = vadd.f32 %v3685_v4, %v6359_v59 }
 0x320   :  { %v3687_v22 = vpop.f32.mrf.mxu0 }
 0x321   :  { %v3688_v0 = vadd.f32 %v3687_v22, %v3686_v10  ;;  %v2555_v10 = vadd.f32 %v6475_v34, %v6380_v17 }
 0x322   :  { %v3689_v35 = vpop.f32.mrf.mxu0 }
 0x323   :  { %v3736_v25 = vpop.f32.mrf.mxu1  ;;  %v2760_v22 = vadd.f32 %v3688_v0, %v6359_v59 }
 0x324   :  { %v3690_v31 = vpop.f32.mrf.mxu0 }
 0x325   :  { %v3737_v37 = vpop.f32.mrf.mxu1  ;;  %v3691_v60 = vadd.f32 %v3690_v31, %v3689_v35  ;;  %v2560_v35 = vadd.f32 %v6469_v27, %v6408_v33 }
 0x326   :  { %v6489_v21 = vpop.f32.mrf.mxu0  ;;  %v3738_v46 = vadd.f32 %v3737_v37, %v3736_v25 }
 0x327   :  { %v3739_v38 = vpop.f32.mrf.mxu1  ;;  %v2765_v4 = vadd.f32 %v3691_v60, %v6359_v59  ;;  %v3106_v60 = vld [vmem:[%s6735_s7 + $0x38] sm:$0xff] }
 0x328   :  { %v3693_v18 = vpop.f32.mrf.mxu0  ;;  %v2855_v37 = vadd.f32 %v3738_v46, %v2740_v19  ;;  %v3612_v19 = vadd.f32 %v6467_v30, %v6463_v23  ;;  %v3140_v23 = vld [vmem:[%s6735_s7 + $0x148] sm:$0xff]  ;;  %3809 = vmatpush3.msra.mxu1 %v3106_v60 }
 0x329   :  { %v3740_v12 = vpop.f32.mrf.mxu1  ;;  %v3694_v33 = vadd.f32 %v3693_v18, %v6489_v21 }
 0x32a   :  { %v3741_v43 = vadd.f32 %v3740_v12, %v3739_v38  ;;  %v2465_v38 = vadd.f32 %v3609_v47, %v2350_v2  ;;  %v3141_v2 = vld [vmem:[%s6735_s7 + $0x150] sm:$0xff] }
 0x32b   :  { %v3742_v8 = vpop.f32.mrf.mxu1  ;;  %3240 = vmatpush1.msra.mxu0 %v3141_v2 }
 0x32c   :  { %v3695_v63 = vpop.f32.mrf.mxu0  ;;  %v2860_v45 = vadd.f32 %v3741_v43, %v2745_v5  ;;  %v2545_v5 = vadd.f32 %v6465_v36, %v6362_v56 }
 0x32d   :  { %v3743_v42 = vpop.f32.mrf.mxu1 }
 0x32e   :  { %v3696_v3 = vpop.f32.mrf.mxu0  ;;  %v3744_v58 = vadd.f32 %v3743_v42, %v3742_v8 }
 0x32f   :  { %v3745_v29 = vpop.f32.mrf.mxu1  ;;  %v3697_v31 = vadd.f32 %v3696_v3, %v3695_v63 }
 0x330   :  { %v6491_v11 = vpop.f32.mrf.mxu0  ;;  %v2865_v24 = vadd.f32 %v3744_v58, %v2750_v49 }
 0x331   :  { %v3746_v15 = vpop.f32.mrf.mxu1  ;;  %v2775_v41 = vadd.f32 %v3697_v31, %v6359_v59 }
 0x332   :  { %v3699_v39 = vpop.f32.mrf.mxu0  ;;  %v3747_v62 = vadd.f32 %v3746_v15, %v3745_v29 }
 0x333   :  { %v3748_v14 = vpop.f32.mrf.mxu1  ;;  %v3700_v51 = vadd.f32 %v3699_v39, %v6491_v11  ;;  %v2565_v11 = vadd.f32 %v6479_v16, %v6437_v55  ;;  %v2580_v39 = vadd.f32 %v6481_v40, %v2465_v38 }
 0x334   :  { %v2870_v50 = vadd.f32 %v3747_v62, %v2755_v20  ;;  %v2770_v62 = vadd.f32 %v3694_v33, %v6359_v59  ;;  %v3105_v20 = vld [vmem:[%s6735_s7 + $0x30] sm:$0xff] }
 0x335   :  { %v6495_v26 = vpop.f32.mrf.mxu0  ;;  %v3749_v61 = vpop.f32.mrf.mxu1  ;;  %v2780_v58 = vadd.f32 %v3700_v51, %v6359_v59 }
 0x336   :  { %v3750_v46 = vadd.f32 %v3749_v61, %v3748_v14 }
 0x337   :  { %v6498_v32 = vpop.f32.mrf.mxu0  ;;  %v3751_v44 = vpop.f32.mrf.mxu1 }
 0x339   :  { %v4073_v7 = vpop.f32.mrf.mxu0  ;;  %v3752_v6 = vpop.f32.mrf.mxu1 }
 0x33a   :  { %v2975_v25 = vadd.f32 %v4073_v7, %v2860_v45  ;;  %v3753_v29 = vadd.f32 %v3752_v6, %v3751_v44  ;;  %v2570_v44 = vadd.f32 %v6477_v28, %v6454_v54  ;;  %v2875_v54 = vadd.f32 %v3750_v46, %v2760_v22  ;;  %v3121_v7 = vld [vmem:[%s6735_s7 + $0xb0] sm:$0xff] }
 0x33b   :  { %v2969_v12 = vpop.f32.mrf.mxu0  ;;  %v3754_v13 = vpop.f32.mrf.mxu1  ;;  %v6813_v6 = vmov 0.0   ;;  %3810 = vmatprep.subr.mxu1 %v3121_v7  ;;  %v3135_v7 = vld [vmem:[%s6735_s7 + $0x120] sm:$0xff] }
 0x33c   :  { %v3019_v1 = vmax.f32 %v2550_v57, %v2975_v25  ;;  %v2970_v48 = vadd.f32 %v2969_v12, %v2855_v37  ;;  %v2880_v14 = vadd.f32 %v3753_v29, %v2765_v4  ;;  %3241 = vmatprep.subr.mxu0 %v6813_v6  ;;  %v3703_v25 = vadd.f32 %v6498_v32, %v6495_v26  ;;  %v6814_v26 = vld [vmem:[#allocation15_spill] sm:$0xff]  ;;  %v6815_v29 = vld [vmem:[#allocation28_spill] sm:$0xff] }
 0x33d   :  { %v4076_v8 = vpop.f32.mrf.mxu0  ;;  %v3755_v42 = vpop.f32.mrf.mxu1  ;;  %3242 = vmatpush1.msra.mxu0 %v3140_v23  ;;  %3811 = vmatpush3.msra.mxu1 %v3105_v20  ;;  %v2355_v32 = vadd.f32 %v6504_v53, %v6359_v59  ;;  %v3116_v23 = vld [vmem:[%s6735_s7 + $0x88] sm:$0xff]  ;;  %v3134_v20 = vld [vmem:[%s6735_s7 + $0x118] sm:$0xff] }
 0x33e   :  { %v3029_v56 = vmax.f32 %v3019_v1, 0.0  ;;  %v3018_v47 = vmax.f32 %v2545_v5, %v2970_v48  ;;  %v2985_v36 = vadd.f32 %v4076_v8, %v2870_v50  ;;  %v3756_v17 = vadd.f32 %v3755_v42, %v3754_v13  ;;  %3243 = vmatprep.subr.mxu0 %v6813_v6  ;;  %v3139_v1 = vld [vmem:[%s6735_s7 + $0x140] sm:$0xff]  ;;  %v3120_v8 = vld [vmem:[%s6735_s7 + $0xa8] sm:$0xff] }
 0x33f   :  { %v2979_v27 = vpop.f32.mrf.mxu0  ;;  %v3757_v15 = vpop.f32.mrf.mxu1  ;;  %v3615_v48 = vadd.f32 %v6815_v29, %v6814_v26  ;;  %v6816_v50 = vld [vmem:[#allocation8_spill] sm:$0xff]  ;;  %3244 = vmatpush1.msra.mxu0 %v3139_v1  ;;  %v3104_v42 = vld [vmem:[%s6735_s7 + $0x28] sm:$0xff]  ;;  %3812 = vmatprep.subr.mxu1 %v3120_v8  ;;  %v2470_v22 = vadd.f32 %v3612_v19, %v2355_v32  ;;  %v2785_v33 = vadd.f32 %v3703_v25, %v6359_v59 }
 0x340   :  { %3040 = vst.msk [vmem:[#allocation6 + $0x8] sm:$0xff] %vm3038_vm2, %v3029_v56  ;;  %v3028_v63 = vmax.f32 %v3018_v47, 0.0  ;;  %v3021_v3 = vmax.f32 %v2560_v35, %v2985_v36  ;;  %v2980_v52 = vadd.f32 %v2979_v27, %v2865_v24  ;;  %v2885_v38 = vadd.f32 %v3756_v17, %v2770_v62  ;;  %v6817_v35 = vld [vmem:[#allocation14_spill] sm:$0xff]  ;;  %3245 = vmatprep.subr.mxu0 %v6813_v6  ;;  %v3138_v24 = vld [vmem:[%s6735_s7 + $0x138] sm:$0xff]  ;;  %v3132_v32 = vld [vmem:[%s6735_s7 + $0x108] sm:$0xff] }
 0x341   :  { %v4079_v34 = vpop.f32.mrf.mxu0  ;;  %v3758_v43 = vpop.f32.mrf.mxu1  ;;  %v2575_v4 = vadd.f32 %v6817_v35, %v6816_v50  ;;  %3813 = vmatpush3.msra.mxu1 %v3104_v42  ;;  %3246 = vmatpush1.msra.mxu0 %v3138_v24  ;;  %v3101_v62 = vld [vmem:[%s6735_s7 + $0x10] sm:$0xff]  ;;  %v3131_v29 = vld [vmem:[%s6735_s7 + $0x100] sm:$0xff]  ;;  %v3148_v50 = vld [vmem:[%s6735_s7 + $0x188] sm:$0xff] }
 0x342   :  { %3039 = vst.msk [vmem:[#allocation6] sm:$0xff] %vm3038_vm2, %v3028_v63  ;;  %v3031_v28 = vmax.f32 %v3021_v3, 0.0  ;;  %v3020_v21 = vmax.f32 %v2555_v10, %v2980_v52  ;;  %v2995_v18 = vadd.f32 %v4079_v34, %v2880_v14  ;;  %v3759_v61 = vadd.f32 %v3758_v43, %v3757_v15  ;;  %v3119_v10 = vld [vmem:[%s6735_s7 + $0xa0] sm:$0xff]  ;;  %3247 = vmatprep.subr.mxu0 %v6813_v6 }
 0x343   :  { %v2989_v45 = vpop.f32.mrf.mxu0  ;;  %v3760_v57 = vpop.f32.mrf.mxu1  ;;  %3814 = vmatprep.subr.mxu1 %v3119_v10  ;;  %v3147_v35 = vld [vmem:[%s6735_s7 + $0x180] sm:$0xff]  ;;  %v3314_v10 = vld [vmem:[%s6736_s9 + $0x70] sm:$0xff] }
 0x344   :  { %3042 = vst.msk [vmem:[#allocation6 + $0x18] sm:$0xff] %vm3038_vm2, %v3031_v28  ;;  %v3030_v55 = vmax.f32 %v3020_v21, 0.0  ;;  %v3023_v30 = vmax.f32 %v2570_v44, %v2995_v18  ;;  %v2990_v16 = vadd.f32 %v2989_v45, %v2875_v54  ;;  %v2890_v40 = vadd.f32 %v3759_v61, %v2775_v41  ;;  %v3118_v54 = vld [vmem:[%s6735_s7 + $0x98] sm:$0xff]  ;;  %v6818_v21 = vld [vmem:[#allocation13_spill] sm:$0xff]  ;;  %v6819_v45 = vld [vmem:[#allocation30_spill] sm:$0xff] }
 0x345   :  { %v4082_v37 = vpop.f32.mrf.mxu0  ;;  %v3761_v5 = vpop.f32.mrf.mxu1  ;;  %v2360_v44 = vadd.f32 %v6507_v9, %v6359_v59  ;;  %v3103_v9 = vld [vmem:[%s6735_s7 + $0x20] sm:$0xff]  ;;  %v3137_v59 = vld [vmem:[%s6735_s7 + $0x130] sm:$0xff]  ;;  %v3102_v28 = vld [vmem:[%s6735_s7 + $0x18] sm:$0xff]  ;;  %v2585_v18 = vadd.f32 %v6818_v21, %v2470_v22 }
 0x346   :  { %3041 = vst.msk [vmem:[#allocation6 + $0x10] sm:$0xff] %vm3038_vm2, %v3030_v55  ;;  %v3033_v49 = vmax.f32 %v3023_v30, 0.0  ;;  %v3022_v0 = vmax.f32 %v2565_v11, %v2990_v16  ;;  %v3005_v12 = vadd.f32 %v4082_v37, %v2890_v40  ;;  %v3762_v13 = vadd.f32 %v3761_v5, %v3760_v57  ;;  %3815 = vmatpush3.msra.mxu1 %v3103_v9  ;;  %v3136_v11 = vld [vmem:[%s6735_s7 + $0x128] sm:$0xff]  ;;  %v3304_v9 = vld [vmem:[%s6736_s9 + $0x20] sm:$0xff] }
 0x347   :  { %v2999_v31 = vpop.f32.mrf.mxu0  ;;  %v3763_v46 = vpop.f32.mrf.mxu1  ;;  %v3050_v3 = vld [vmem:[#allocation6 + $0x8] sm:$0xff]  ;;  %v2475_v17 = vadd.f32 %v3615_v48, %v2360_v44  ;;  %3248 = vmatpush1.msra.mxu0 %v3137_v59  ;;  %3816 = vmatprep.subr.mxu1 %v3118_v54  ;;  %v3100_v40 = vld [vmem:[%s6735_s7 + $0x8] sm:$0xff]  ;;  %v3401_v21 = vld [vmem:[%s6737_s8] ss:$0 sm:$0xff] }
 0x348   :  { %3044 = vst.msk [vmem:[#allocation6 + $0x28] sm:$0xff] %vm3038_vm2, %v3033_v49  ;;  %v3032_v53 = vmax.f32 %v3022_v0, 0.0  ;;  %v3025_v56 = vmax.f32 %v2580_v39, %v3005_v12  ;;  %v3000_v47 = vadd.f32 %v2999_v31, %v2885_v38  ;;  %v2895_v36 = vadd.f32 %v3762_v13, %v2780_v58  ;;  %3249 = vmatprep.subr.mxu0 %v6813_v6  ;;  %v3117_v39 = vld [vmem:[%s6735_s7 + $0x90] sm:$0xff]  ;;  %v3115_v58 = vld [vmem:[%s6735_s7 + $0x80] sm:$0xff]  ;;  %v3313_v44 = vld [vmem:[%s6736_s9 + $0x68] sm:$0xff] }
 0x349   :  { %v4085_v27 = vpop.f32.mrf.mxu0  ;;  %v3764_v15 = vpop.f32.mrf.mxu1  ;;  %v3049_v63 = vld [vmem:[#allocation6] sm:$0xff]  ;;  %v2590_v57 = vadd.f32 %v6819_v45, %v2475_v17  ;;  %3817 = vmatpush3.msra.mxu1 %v3102_v28  ;;  %3250 = vmatpush1.msra.mxu0 %v3136_v11  ;;  %v3099_v49 = vld [vmem:[%s6735_s7] sm:$0xff]  ;;  %v3303_v59 = vld [vmem:[%s6736_s9 + $0x18] sm:$0xff] }
 0x34a   :  { %3043 = vst.msk [vmem:[#allocation6 + $0x20] sm:$0xff] %vm3038_vm2, %v3032_v53  ;;  %v3035_v52 = vmax.f32 %v3025_v56, 0.0  ;;  %v3024_v14 = vmax.f32 %v2575_v4, %v3000_v47  ;;  %v3765_v41 = vadd.f32 %v3764_v15, %v3763_v46  ;;  %v3051_v51 = vmax.f32 %v3049_v63, %v3050_v3  ;;  %3818 = vmatprep.subr.mxu1 %v3117_v39  ;;  %v3133_v13 = vld [vmem:[%s6735_s7 + $0x110] sm:$0xff]  ;;  %v3311_v15 = vld [vmem:[%s6736_s9 + $0x58] sm:$0xff]  ;;  %v3309_v3 = vld [vmem:[%s6736_s9 + $0x48] sm:$0xff] }
 0x34b   :  { %v3009_v34 = vpop.f32.mrf.mxu0  ;;  %v3054_v43 = vld [vmem:[#allocation6 + $0x18] sm:$0xff]  ;;  %3251 = vmatprep.subr.mxu0 %v6813_v6  ;;  %3819 = vmatpush3.msra.mxu1 %v3101_v62  ;;  %v3310_v63 = vld [vmem:[%s6736_s9 + $0x50] sm:$0xff]  ;;  %v3403_v62 = vld [vmem:[%s6738_s10] ss:$0 sm:$0xff] }
 0x34c   :  { %3046 = vst.msk [vmem:[#allocation6 + $0x38] sm:$0xff] %vm3038_vm2, %v3035_v52  ;;  %v3034_v61 = vmax.f32 %v3024_v14, 0.0  ;;  %v2900_v2 = vadd.f32 %v3765_v41, %v2785_v33  ;;  %v3010_v19 = vadd.f32 %v3009_v34, %v2895_v36  ;;  %3052 = vst.msk [vmem:[#allocation7] sm:$0xff] %vm3038_vm2, %v3051_v51  ;;  %3252 = vmatpush1.msra.mxu0 %v3135_v7  ;;  %3820 = vmatprep.subr.mxu1 %v3116_v23  ;;  %v3315_v36 = vld [vmem:[%s6736_s9 + $0x78] sm:$0xff]  ;;  %v3308_v52 = vld [vmem:[%s6736_s9 + $0x40] sm:$0xff] }
 0x34d   :  { %v3053_v60 = vld [vmem:[#allocation6 + $0x10] sm:$0xff]  ;;  %3253 = vmatprep.subr.mxu0 %v6813_v6  ;;  %3821 = vmatpush3.msra.mxu1 %v3100_v40  ;;  %v3307_v14 = vld [vmem:[%s6736_s9 + $0x38] sm:$0xff]  ;;  %v3306_v41 = vld [vmem:[%s6736_s9 + $0x30] sm:$0xff] }
 0x34e   :  { %3045 = vst.msk [vmem:[#allocation6 + $0x30] sm:$0xff] %vm3038_vm2, %v3034_v61  ;;  %v3015_v55 = vadd.f32 %v4085_v27, %v2900_v2  ;;  %v3026_v30 = vmax.f32 %v2585_v18, %v3010_v19  ;;  %v3055_v16 = vmax.f32 %v3053_v60, %v3054_v43  ;;  %3254 = vmatpush1.msra.mxu0 %v3134_v20  ;;  %v3312_v27 = vld [vmem:[%s6736_s9 + $0x60] sm:$0xff]  ;;  %v3305_v51 = vld [vmem:[%s6736_s9 + $0x28] sm:$0xff]  ;;  %v3302_v17 = vld [vmem:[%s6736_s9 + $0x10] sm:$0xff] }
 0x34f   :  { %v3065_v38 = vld [vmem:[#allocation6 + $0x28] sm:$0xff]  ;;  %3822 = vmatprep.subr.mxu1 %v3115_v58  ;;  %3255 = vmatprep.subr.mxu0 %v6813_v6  ;;  %v3301_v34 = vld [vmem:[%s6736_s9 + $0x8] sm:$0xff]  ;;  %v3300_v43 = vld [vmem:[%s6736_s9] sm:$0xff] }
 0x350   :  { %v3027_v25 = vmax.f32 %v2590_v57, %v3015_v55  ;;  %v3036_v37 = vmax.f32 %v3026_v30, 0.0  ;;  %3057 = vrot.lane.b32.xlu0 %v3055_v16, %s4153_s12  ;;  %3823 = vmatpush3.msra.mxu1 %v3099_v49 }
 0x351   :  { %v3064_v5 = vld [vmem:[#allocation6 + $0x20] sm:$0xff]  ;;  %3256 = vmatpush1.msra.mxu0 %v3133_v13  ;;  %4086 = vmatprep.subr.mxu1 %v6813_v6 }
 0x352   :  { %v3037_v0 = vmax.f32 %v3027_v25, 0.0  ;;  %3047 = vst.msk [vmem:[#allocation6 + $0x40] sm:$0xff] %vm3038_vm2, %v3036_v37  ;;  %v3066_v12 = vmax.f32 %v3064_v5, %v3065_v38  ;;  %3257 = vmatprep.subr.mxu0 %v6813_v6 }
 0x353   :  { %v3074_v1 = vld [vmem:[#allocation6 + $0x38] sm:$0xff]  ;;  %3258 = vmatpush1.msra.mxu0 %v3132_v32 }
 0x354   :  { %3048 = vst.msk [vmem:[#allocation6 + $0x48] sm:$0xff] %vm3038_vm2, %v3037_v0  ;;  %3068 = vrot.lane.b32.xlu0 %v3066_v12, %s4154_s0  ;;  %3259 = vmatprep.subr.mxu0 %v6813_v6 }
 0x355   :  { %v3073_v26 = vld [vmem:[#allocation6 + $0x30] sm:$0xff]  ;;  %3260 = vmatpush1.msra.mxu0 %v3131_v29 }
 0x356   :  { %v3075_v48 = vmax.f32 %v3073_v26, %v3074_v1  ;;  %3289 = vmatprep.subr.mxu0 %v6813_v6 }
 0x357   :  { %3290 = vmatpush2.msra.mxu0 %v3148_v50 }
 0x358   :  { %3077 = vrot.lane.b32.xlu1 %v3075_v48, %s4155_s22  ;;  %3291 = vmatprep.subr.mxu0 %v6813_v6 }
 0x359   :  { %v3084_v4 = vld [vmem:[#allocation6 + $0x40] sm:$0xff]  ;;  %3292 = vmatpush2.msra.mxu0 %v3147_v35 }
 0x35b   :  { %v3085_v31 = vld [vmem:[#allocation6 + $0x48] sm:$0xff] }
 0x35c   :  { %v3086_v46 = vmax.f32 %v3084_v4, %v3085_v31 }
 0x35e   :  { %3088 = vrot.lane.b32.xlu1 %v3086_v46, %s4156_s1 }
 0x3c2   :  { %v3058_v8 = vpop.permute.xlu0 %3057 }
 0x3c3   :  { %3061 = vst.msk [vmem:[#allocation7] sm:$0xff] %vm3060_vm3, %v3058_v8 }
 0x3c4   :  { %3063 = vst.msk [vmem:[#allocation7 + $0x8] sm:$0xff] %vm3062_vm4, %v3058_v8 }
 0x3c6   :  { %v3069_v42 = vpop.permute.xlu0 %3068 }
 0x3c7   :  { %3072 = vst.msk [vmem:[#allocation7 + $0x8] sm:$0xff] %vm3071_vm5, %v3069_v42 }
 0x3ca   :  { %v3078_v53 = vpop.permute.xlu1 %3077  ;;  %v3095_v24 = vld [vmem:[#allocation7] sm:$0xff] }
 0x3cb   :  { %3081 = vst.msk [vmem:[#allocation7 + $0x8] sm:$0xff] %vm3080_vm6, %v3078_v53 }
 0x3cc   :  { %3083 = vst.msk [vmem:[#allocation7 + $0x10] sm:$0xff] %vm3082_vm7, %v3078_v53 }
 0x3d0   :  { %v3089_v56 = vpop.permute.xlu1 %3088 }
 0x3d1   :  { %3092 = vst.msk [vmem:[#allocation7 + $0x10] sm:$0xff] %vm3091_vm8, %v3089_v56 }
 0x3d2   :  { %3094 = vst.msk [vmem:[#allocation7 + $0x18] sm:$0xff] %vm3093_vm9, %v3089_v56  ;;  %v3096_v47 = vld [vmem:[#allocation7 + $0x8] sm:$0xff] }
 0x3d3   :  { %3223 = vmatprep.mubr.f32.mxu1 %v3096_v47 }
 0x3d4   :  { %3224 = vmatmul.mubr.f32.vlgmr.msra.gmra.mxu1 %v3095_v24 }
 0x3d5   :  { %4087 = vmatpush3.msra.mxu1 %v3315_v36  ;;  %4118 = vmatprep.mubr.msk.f32.mxu1 %vm4157_vm10, %v6813_v6 }
 0x3d6   :  { %4088 = vmatprep.subr.mxu1 %v6813_v6 }
 0x3d7   :  { %4089 = vmatpush3.msra.mxu1 %v3314_v10 }
 0x3d8   :  { %v3097_v33 = vld [vmem:[#allocation7 + $0x10] sm:$0xff]  ;;  %4090 = vmatprep.subr.mxu1 %v6813_v6 }
 0x3d9   :  { %v3098_v22 = vld [vmem:[#allocation7 + $0x18] sm:$0xff]  ;;  %4091 = vmatpush3.msra.mxu1 %v3313_v44 }
 0x3da   :  { %3402 = vmatprep.mubr.msk.f32.mxu0 %vm3093_vm9, %v3098_v22  ;;  %4092 = vmatprep.subr.mxu1 %v6813_v6 }
 0x3db   :  { %3294 = vmatmul.mubr.f32.vlgmr.msra.gmra.mxu0 %v3097_v33  ;;  %4093 = vmatpush3.msra.mxu1 %v3312_v27 }
 0x3dc   :  { %4094 = vmatprep.subr.mxu1 %v6813_v6 }
 0x3dd   :  { %4095 = vmatpush3.msra.mxu1 %v3311_v15 }
 0x3de   :  { %4096 = vmatprep.subr.mxu1 %v6813_v6 }
 0x3df   :  { %4097 = vmatpush3.msra.mxu1 %v3310_v63 }
 0x3e0   :  { %4098 = vmatprep.subr.mxu1 %v6813_v6 }
 0x3e1   :  { %4099 = vmatpush3.msra.mxu1 %v3309_v3 }
 0x3e2   :  { %4100 = vmatprep.subr.mxu1 %v6813_v6 }
 0x3e3   :  { %4101 = vmatpush3.msra.mxu1 %v3308_v52 }
 0x3e4   :  { %4102 = vmatprep.subr.mxu1 %v6813_v6 }
 0x3e5   :  { %4103 = vmatpush3.msra.mxu1 %v3307_v14 }
 0x3e6   :  { %4104 = vmatprep.subr.mxu1 %v6813_v6 }
 0x3e7   :  { %4105 = vmatpush3.msra.mxu1 %v3306_v41 }
 0x3e8   :  { %4106 = vmatprep.subr.mxu1 %v6813_v6 }
 0x3e9   :  { %4107 = vmatpush3.msra.mxu1 %v3305_v51 }
 0x3ea   :  { %4108 = vmatprep.subr.mxu1 %v6813_v6 }
 0x3eb   :  { %4109 = vmatpush3.msra.mxu1 %v3304_v9 }
 0x3ec   :  { %4110 = vmatprep.subr.mxu1 %v6813_v6 }
 0x3ed   :  { %4111 = vmatpush3.msra.mxu1 %v3303_v59 }
 0x3ee   :  { %4112 = vmatprep.subr.mxu1 %v6813_v6 }
 0x3ef   :  { %4113 = vmatpush3.msra.mxu1 %v3302_v17 }
 0x3f0   :  { %4114 = vmatprep.subr.mxu1 %v6813_v6 }
 0x3f1   :  { %4115 = vmatpush3.msra.mxu1 %v3301_v34 }
 0x3f2   :  { %4116 = vmatprep.subr.mxu1 %v6813_v6 }
 0x3f3   :  { %4117 = vmatpush3.msra.mxu1 %v3300_v43 }
 0x494   :  { %v3824_v54 = vpop.f32.mrf.mxu1 }
 0x496   :  { %v3825_v28 = vpop.f32.mrf.mxu1 }
 0x497   :  { %v3826_v18 = vadd.f32 %v3825_v28, %v3824_v54 }
 0x499   :  { %v3226_v61 = vadd.f32 %v3826_v18, %v3401_v21 }
 0x49b   :  { %v3295_v2 = vpop.f32.mrf.mxu0 }
 0x49c   :  { %v3296_v19 = vadd.f32 %v3295_v2, %v3226_v61 }
 0x49d   :  { %v3297_v11 = vpop.f32.mrf.mxu0 }
 0x49e   :  { %v3299_v39 = vmax.f32 %v3296_v19, 0.0 }
 0x4a0   :  { %4119 = vmatmul.mubr.f32.vlgmr.msra.gmra.mxu1 %v3299_v39 }
 0x560   :  { %v3389_v45 = vpop.f32.mrf.mxu1 }
 0x561   :  { %v3390_v6 = vadd.f32 %v3403_v62, %v3389_v45 }
 0x562   :  { %v4120_v57 = vpop.f32.mrf.mxu1 }
 0x563   :  { %v3393_v60 = vmax.f32 %v3390_v6, 0.0 }
 0x565   :  { %3394 = vst [vmem:[%s6739_s11] sm:$0xff] %v3393_v60 }

</bundles_post_ra>
